<compile_context>
chip_gen: v6e
topology: v6e:2x2x1
jax: 0.10.0
libtpu: 0.0.40
codegen_flags: <defaults>
</compile_context>

<pallas_src>
import jax
import jax.numpy as jnp
from jax.experimental import pallas as pl
from jax.experimental.pallas import tpu as pltpu

# ----------------------------- configuration --------------------------------
B = 2              # batch
C_IN = 4           # num_channels
L = 128            # input length (forced by cnn_output_size = 64 * 64)
K = 5              # conv kernel size
C_OUT = 64         # conv output channels
P = L // 2         # pooled length = 64
H = 32             # hidden_dim
FEAT = C_OUT * P   # 4096 = LSTM input size

T_POS = 8          # pooled positions packed into one conv-matmul row (lane blocks)
N_GRP = P // T_POS # 8 position groups
B_PAD = 8          # batch rows padded to a full sublane tile
HALF = N_GRP * B_PAD        # 64 rows per parity in the conv matmul output
CHUNK = T_POS * C_OUT       # 512 feature lanes per group


# ------------------------------ fused kernel ---------------------------------
def fused_kernel(patches_ref, convw_ref, aux_ref, w0_hbm, o_ref,
                 w0_vmem, w0_sem, out_stage):
    """patches_ref: (128, 160) f32  rows = (parity, group, padded-batch),
                                     cols = (pos-in-group, tap, c_in)
       convw_ref : (160, 512) f32   block-diagonal im2col conv weight
       aux_ref   : (40, 512)  f32   packed small params (see preprocess_params)
       w0_hbm    : (4096, 128) bf16 permuted LSTM layer-0 input weight (in HBM)
       o_ref     : (B, 1) f32 output
    """
    # Kick off the dominant weight DMA immediately; it overlaps the conv matmul.
    w0_copy = pltpu.make_async_copy(w0_hbm, w0_vmem, w0_sem)
    w0_copy.start()

    # ---- Conv1d(k=5, pad=2) as one im2col matmul + bias + ReLU --------------
    conv = jnp.dot(patches_ref[...], convw_ref[...],
                   preferred_element_type=jnp.float32)            # (128, 512)
    conv = jnp.maximum(conv + aux_ref[0:1, :], 0.0)
    # ---- MaxPool1d(2,2): rows 0:64 hold even conv positions, 64:128 odd -----
    pooled = jnp.maximum(conv[0:HALF, :], conv[HALF:2 * HALF, :])  # (64, 512)

    # ---- LSTM layer 0, single timestep, h0 = c0 = 0 -------------------------
    # gates = x @ W_ih0 + (b_ih0 + b_hh0); the h_prev @ W_hh0 term is exactly 0.
    # The channel-major flatten is already folded into the row order of w0, so
    # the contraction is just a sum over the 8 position-group chunks.
    w0_copy.wait()
    terms = []
    for grp in range(N_GRP):
        lhs = pooled[grp * B_PAD:(grp + 1) * B_PAD, :].astype(jnp.bfloat16)
        rhs = w0_vmem[grp * CHUNK:(grp + 1) * CHUNK, :]            # (512, 128) bf16
        terms.append(jnp.dot(lhs, rhs, preferred_element_type=jnp.float32))
    pre0 = sum(terms) + aux_ref[1:2, 0:4 * H]                      # (8, 128)

    # PyTorch gate order (i, f, g, o); f is dead because c_prev == 0.
    i1 = jax.nn.sigmoid(pre0[:, 0 * H:1 * H])
    g1 = jnp.tanh(pre0[:, 2 * H:3 * H])
    o1 = jax.nn.sigmoid(pre0[:, 3 * H:4 * H])
    h1 = o1 * jnp.tanh(i1 * g1)                                    # (8, 32)

    # ---- LSTM layer 1 (same simplification) ---------------------------------
    pre1 = (jnp.dot(h1, aux_ref[8:8 + H, 0:4 * H],
                    preferred_element_type=jnp.float32)
            + aux_ref[2:3, 0:4 * H])                               # (8, 128)
    i2 = jax.nn.sigmoid(pre1[:, 0 * H:1 * H])
    g2 = jnp.tanh(pre1[:, 2 * H:3 * H])
    o2 = jax.nn.sigmoid(pre1[:, 3 * H:4 * H])
    h2 = o2 * jnp.tanh(i2 * g2)                                    # (8, 32)

    # ---- attention over a length-1 sequence is identically 1.0 --------------
    # so context_vector == lstm_out == h2 exactly; only the fc head remains.
    logit = (jnp.sum(h2 * aux_ref[3:4, 0:H], axis=1, keepdims=True)
             + aux_ref[4:5, 0:1])                                  # (8, 1)
    out_stage[...] = jax.nn.sigmoid(logit)
    # first B rows are the real batch; the rest are zero-padded junk rows
    o_ref[...] = out_stage[0:o_ref.shape[0], :]


# --------------------------------- wrapper -----------------------------------
def cnn_rnn_forward(x, prep):
    Bn = x.shape[0]

    # --- glue: grouped im2col patches (fuses into one small XLA copy chain) ---
    x_pad = jnp.pad(x, ((0, 0), (0, 0), (2, 2)))                      # (B,C,L+4)
    taps = jnp.stack([x_pad[:, :, k:k + L] for k in range(K)], axis=1)  # (B,K,C,L)
    pat = jnp.transpose(taps, (0, 3, 1, 2)).reshape(Bn, L, K * C_IN)  # (B,L,20)
    # conv position = 16*group + 2*pos_in_group + parity
    pat = pat.reshape(Bn, N_GRP, T_POS, 2, K * C_IN)
    pat = jnp.transpose(pat, (3, 1, 0, 2, 4))            # (parity, grp, B, j, 20)
    pat = jnp.pad(pat, ((0, 0), (0, 0), (0, B_PAD - Bn), (0, 0), (0, 0)))
    patches = pat.reshape(2 * N_GRP * B_PAD, T_POS * K * C_IN)        # (128,160)

    return pl.pallas_call(
        fused_kernel,
        out_shape=jax.ShapeDtypeStruct((Bn, 1), jnp.float32),
        in_specs=[
            pl.BlockSpec(memory_space=pltpu.MemorySpace.VMEM),   # patches
            pl.BlockSpec(memory_space=pltpu.MemorySpace.VMEM),   # conv weight
            pl.BlockSpec(memory_space=pltpu.MemorySpace.VMEM),   # packed small params
            pl.BlockSpec(memory_space=pl.ANY),                   # w0 stays in HBM
        ],
        out_specs=pl.BlockSpec(memory_space=pltpu.MemorySpace.VMEM),
        scratch_shapes=[
            pltpu.VMEM((FEAT, 4 * H), jnp.bfloat16),   # landing buffer for w0
            pltpu.SemaphoreType.DMA,                   # its completion semaphore
            pltpu.VMEM((B_PAD, 1), jnp.float32),       # output staging (padded batch)
        ],
    )(patches, prep["conv_w"], prep["aux"], prep["w0"])


# ------------------ one-time weight repacking (outside jit) -------------------
def preprocess_params(params):
    # Conv1d weight (C_OUT, C_IN, K) -> im2col matrix (K*C_IN, C_OUT), then a
    # block-diagonal copy per position-in-group so the conv is ONE matmul.
    w_mat = jnp.transpose(params["w_conv"], (2, 1, 0)).reshape(K * C_IN, C_OUT)
    conv_w = jnp.kron(jnp.eye(T_POS, dtype=jnp.float32), w_mat)       # (160, 512)

    # LSTM layer-0 input weight, stored (FEAT, 4H) with torch feature order
    # f = channel*P + position (channel-major flatten).  Permute rows to the
    # (group, pos-in-group, channel) order the pooled activations use, so no
    # activation transpose is ever needed.  bf16: it is >60% of all HBM bytes.
    w0 = params["w_ih0"].reshape(C_OUT, N_GRP, T_POS, 4 * H)
    w0 = jnp.transpose(w0, (1, 2, 0, 3)).reshape(FEAT, 4 * H)
    w0 = w0.astype(jnp.bfloat16)

    # Pack every remaining small operand into one f32 slab (one DMA).
    aux = jnp.zeros((8 + H, CHUNK), jnp.float32)
    aux = aux.at[0, :].set(jnp.tile(params["b_conv"], T_POS))          # conv bias
    aux = aux.at[1, 0:4 * H].set(params["b_ih0"][0] + params["b_hh0"][0])
    aux = aux.at[2, 0:4 * H].set(params["b_ih1"][0] + params["b_hh1"][0])
    aux = aux.at[3, 0:H].set(params["w_fc"][:, 0])                     # fc weight
    aux = aux.at[4, 0].set(params["b_fc"][0, 0])                       # fc bias
    aux = aux.at[8:8 + H, 0:4 * H].set(params["w_ih1"])                # layer-1 W_ih
    # w_hh0 / w_hh1 (multiplied by h0 == 0) and the attention layer (softmax
    # over a length-1 sequence == 1.0) are mathematically inert in this forward
    # pass and are intentionally not shipped to the kernel.
    return {"conv_w": conv_w, "aux": aux, "w0": w0}


# ------------------------ deterministic parameter init -----------------------
def init_params(key):
    ks = jax.random.split(key, 14)
    s = 0.05

    def rnd(k, shape):
        return (s * jax.random.normal(k, shape, jnp.float32)).astype(jnp.float32)

    return {
        # Conv1d(num_channels, 64, kernel_size=5)
        "w_conv": rnd(ks[0], (C_OUT, C_IN, K)),
        "b_conv": rnd(ks[1], (C_OUT,)),
        # LSTM layer 0: input 4096 -> H   (weights stored transposed: (in, 4H))
        "w_ih0": rnd(ks[2], (FEAT, 4 * H)),
        "w_hh0": rnd(ks[3], (H, 4 * H)),      # inert: h0 == 0
        "b_ih0": rnd(ks[4], (1, 4 * H)),
        "b_hh0": rnd(ks[5], (1, 4 * H)),
        # LSTM layer 1: H -> H
        "w_ih1": rnd(ks[6], (H, 4 * H)),
        "w_hh1": rnd(ks[7], (H, 4 * H)),      # inert: h0 == 0
        "b_ih1": rnd(ks[8], (1, 4 * H)),
        "b_hh1": rnd(ks[9], (1, 4 * H)),
        # attention_layer: Linear(H, 1) -- softmax over length-1 seq == 1.0
        "w_attn": rnd(ks[10], (H, 1)),
        "b_attn": rnd(ks[11], (1, 1)),
        # fc: Linear(H, 1)   (bidirectional=False)
        "w_fc": rnd(ks[12], (H, 1)),
        "b_fc": rnd(ks[13], (1, 1)),
    }


if __name__ == "__main__":
    key = jax.random.PRNGKey(0)
    k_x, k_p = jax.random.split(key)
    x = jax.random.normal(k_x, (B, C_IN, L), jnp.float32)
    params = init_params(k_p)
    prep = preprocess_params(params)      # one-time weight permutation / packing

    fwd = jax.jit(cnn_rnn_forward)
    out = jax.block_until_ready(fwd(x, prep))

    assert out.shape == (B, 1), out.shape
    assert bool(jnp.all((out > 0.0) & (out < 1.0))), "sigmoid output out of range"
    print("KERNEL_OK")
</pallas_src>

<mosaic_0001>
module attributes {stable_mosaic.version = 11 : i64} {
  func.func @fused_kernel(%arg0: memref<128x160xf32, #tpu.memory_space<vmem>>, %arg1: memref<160x512xf32, #tpu.memory_space<vmem>>, %arg2: memref<40x512xf32, #tpu.memory_space<vmem>>, %arg3: memref<4096x128xbf16, #tpu.memory_space<any>>, %arg4: memref<2x1xf32, #tpu.memory_space<vmem>>, %arg5: memref<4096x128xbf16, #tpu.memory_space<vmem>>, %arg6: memref<!tpu.dma_semaphore, #tpu.memory_space<semaphore_mem>>, %arg7: memref<8x1xf32, #tpu.memory_space<vmem>>) attributes {dimension_semantics = [], scalar_prefetch = 0 : i64, scratch_operands = 3 : i64, tpu.core_type = #tpu.core_type<tc>} {
    tpu.enqueue_dma source(%arg3 : memref<4096x128xbf16, #tpu.memory_space<any>>) target(%arg5 : memref<4096x128xbf16, #tpu.memory_space<vmem>>) target_semaphore(%arg6 : memref<!tpu.dma_semaphore, #tpu.memory_space<semaphore_mem>>)
    %c0 = arith.constant 0 : index
    %c0_0 = arith.constant 0 : index
    %0 = vector.load %arg0[%c0, %c0_0] : memref<128x160xf32, #tpu.memory_space<vmem>>, vector<128x160xf32>
    %c0_1 = arith.constant 0 : index
    %c0_2 = arith.constant 0 : index
    %1 = vector.load %arg1[%c0_1, %c0_2] : memref<160x512xf32, #tpu.memory_space<vmem>>, vector<160x512xf32>
    %cst = arith.constant dense<0.000000e+00> : vector<128x512xf32>
    %2 = tpu.matmul %0, %1, %cst {dimension_numbers = #tpu.dot_dimension_numbers<[1], [0], [0], [1], [0, 0, 1, 1], [], []>} : vector<128x160xf32>, vector<160x512xf32>, vector<128x512xf32> -> vector<128x512xf32>
    %c0_3 = arith.constant 0 : index
    %c0_4 = arith.constant 0 : index
    %3 = vector.load %arg2[%c0_3, %c0_4] : memref<40x512xf32, #tpu.memory_space<vmem>>, vector<1x512xf32>
    %4 = vector.broadcast %3 : vector<1x512xf32> to vector<128x512xf32>
    %5 = arith.addf %2, %4 : vector<128x512xf32>
    %cst_5 = arith.constant 0.000000e+00 : f32
    %6 = vector.broadcast %cst_5 : f32 to vector<128x512xf32>
    %7 = arith.maximumf %5, %6 : vector<128x512xf32>
    %8 = vector.extract_strided_slice %7 {offsets = [0, 0], sizes = [64, 512], strides = [1, 1]} : vector<128x512xf32> to vector<64x512xf32>
    %9 = vector.extract_strided_slice %7 {offsets = [64, 0], sizes = [64, 512], strides = [1, 1]} : vector<128x512xf32> to vector<64x512xf32>
    %10 = arith.maximumf %8, %9 : vector<64x512xf32>
    tpu.wait_dma2 semaphore(%arg6 : memref<!tpu.dma_semaphore, #tpu.memory_space<semaphore_mem>>) src(%arg3 : memref<4096x128xbf16, #tpu.memory_space<any>>) dst(%arg5 : memref<4096x128xbf16, #tpu.memory_space<vmem>>)
    %11 = vector.extract_strided_slice %10 {offsets = [0, 0], sizes = [8, 512], strides = [1, 1]} : vector<64x512xf32> to vector<8x512xf32>
    %12 = arith.truncf %11 : vector<8x512xf32> to vector<8x512xbf16>
    %c0_6 = arith.constant 0 : index
    %c0_7 = arith.constant 0 : index
    %13 = vector.load %arg5[%c0_6, %c0_7] : memref<4096x128xbf16, #tpu.memory_space<vmem>>, vector<512x128xbf16>
    %cst_8 = arith.constant dense<0.000000e+00> : vector<8x128xf32>
    %14 = tpu.matmul %12, %13, %cst_8 {dimension_numbers = #tpu.dot_dimension_numbers<[1], [0], [0], [1], [0, 0, 1, 1], [], []>} : vector<8x512xbf16>, vector<512x128xbf16>, vector<8x128xf32> -> vector<8x128xf32>
    %15 = vector.extract_strided_slice %10 {offsets = [8, 0], sizes = [8, 512], strides = [1, 1]} : vector<64x512xf32> to vector<8x512xf32>
    %16 = arith.truncf %15 : vector<8x512xf32> to vector<8x512xbf16>
    %c512 = arith.constant 512 : index
    %c0_9 = arith.constant 0 : index
    %17 = vector.load %arg5[%c512, %c0_9] : memref<4096x128xbf16, #tpu.memory_space<vmem>>, vector<512x128xbf16>
    %cst_10 = arith.constant dense<0.000000e+00> : vector<8x128xf32>
    %18 = tpu.matmul %16, %17, %cst_10 {dimension_numbers = #tpu.dot_dimension_numbers<[1], [0], [0], [1], [0, 0, 1, 1], [], []>} : vector<8x512xbf16>, vector<512x128xbf16>, vector<8x128xf32> -> vector<8x128xf32>
    %19 = vector.extract_strided_slice %10 {offsets = [16, 0], sizes = [8, 512], strides = [1, 1]} : vector<64x512xf32> to vector<8x512xf32>
    %20 = arith.truncf %19 : vector<8x512xf32> to vector<8x512xbf16>
    %c1024 = arith.constant 1024 : index
    %c0_11 = arith.constant 0 : index
    %21 = vector.load %arg5[%c1024, %c0_11] : memref<4096x128xbf16, #tpu.memory_space<vmem>>, vector<512x128xbf16>
    %cst_12 = arith.constant dense<0.000000e+00> : vector<8x128xf32>
    %22 = tpu.matmul %20, %21, %cst_12 {dimension_numbers = #tpu.dot_dimension_numbers<[1], [0], [0], [1], [0, 0, 1, 1], [], []>} : vector<8x512xbf16>, vector<512x128xbf16>, vector<8x128xf32> -> vector<8x128xf32>
    %23 = vector.extract_strided_slice %10 {offsets = [24, 0], sizes = [8, 512], strides = [1, 1]} : vector<64x512xf32> to vector<8x512xf32>
    %24 = arith.truncf %23 : vector<8x512xf32> to vector<8x512xbf16>
    %c1536 = arith.constant 1536 : index
    %c0_13 = arith.constant 0 : index
    %25 = vector.load %arg5[%c1536, %c0_13] : memref<4096x128xbf16, #tpu.memory_space<vmem>>, vector<512x128xbf16>
    %cst_14 = arith.constant dense<0.000000e+00> : vector<8x128xf32>
    %26 = tpu.matmul %24, %25, %cst_14 {dimension_numbers = #tpu.dot_dimension_numbers<[1], [0], [0], [1], [0, 0, 1, 1], [], []>} : vector<8x512xbf16>, vector<512x128xbf16>, vector<8x128xf32> -> vector<8x128xf32>
    %27 = vector.extract_strided_slice %10 {offsets = [32, 0], sizes = [8, 512], strides = [1, 1]} : vector<64x512xf32> to vector<8x512xf32>
    %28 = arith.truncf %27 : vector<8x512xf32> to vector<8x512xbf16>
    %c2048 = arith.constant 2048 : index
    %c0_15 = arith.constant 0 : index
    %29 = vector.load %arg5[%c2048, %c0_15] : memref<4096x128xbf16, #tpu.memory_space<vmem>>, vector<512x128xbf16>
    %cst_16 = arith.constant dense<0.000000e+00> : vector<8x128xf32>
    %30 = tpu.matmul %28, %29, %cst_16 {dimension_numbers = #tpu.dot_dimension_numbers<[1], [0], [0], [1], [0, 0, 1, 1], [], []>} : vector<8x512xbf16>, vector<512x128xbf16>, vector<8x128xf32> -> vector<8x128xf32>
    %31 = vector.extract_strided_slice %10 {offsets = [40, 0], sizes = [8, 512], strides = [1, 1]} : vector<64x512xf32> to vector<8x512xf32>
    %32 = arith.truncf %31 : vector<8x512xf32> to vector<8x512xbf16>
    %c2560 = arith.constant 2560 : index
    %c0_17 = arith.constant 0 : index
    %33 = vector.load %arg5[%c2560, %c0_17] : memref<4096x128xbf16, #tpu.memory_space<vmem>>, vector<512x128xbf16>
    %cst_18 = arith.constant dense<0.000000e+00> : vector<8x128xf32>
    %34 = tpu.matmul %32, %33, %cst_18 {dimension_numbers = #tpu.dot_dimension_numbers<[1], [0], [0], [1], [0, 0, 1, 1], [], []>} : vector<8x512xbf16>, vector<512x128xbf16>, vector<8x128xf32> -> vector<8x128xf32>
    %35 = vector.extract_strided_slice %10 {offsets = [48, 0], sizes = [8, 512], strides = [1, 1]} : vector<64x512xf32> to vector<8x512xf32>
    %36 = arith.truncf %35 : vector<8x512xf32> to vector<8x512xbf16>
    %c3072 = arith.constant 3072 : index
    %c0_19 = arith.constant 0 : index
    %37 = vector.load %arg5[%c3072, %c0_19] : memref<4096x128xbf16, #tpu.memory_space<vmem>>, vector<512x128xbf16>
    %cst_20 = arith.constant dense<0.000000e+00> : vector<8x128xf32>
    %38 = tpu.matmul %36, %37, %cst_20 {dimension_numbers = #tpu.dot_dimension_numbers<[1], [0], [0], [1], [0, 0, 1, 1], [], []>} : vector<8x512xbf16>, vector<512x128xbf16>, vector<8x128xf32> -> vector<8x128xf32>
    %39 = vector.extract_strided_slice %10 {offsets = [56, 0], sizes = [8, 512], strides = [1, 1]} : vector<64x512xf32> to vector<8x512xf32>
    %40 = arith.truncf %39 : vector<8x512xf32> to vector<8x512xbf16>
    %c3584 = arith.constant 3584 : index
    %c0_21 = arith.constant 0 : index
    %41 = vector.load %arg5[%c3584, %c0_21] : memref<4096x128xbf16, #tpu.memory_space<vmem>>, vector<512x128xbf16>
    %cst_22 = arith.constant dense<0.000000e+00> : vector<8x128xf32>
    %42 = tpu.matmul %40, %41, %cst_22 {dimension_numbers = #tpu.dot_dimension_numbers<[1], [0], [0], [1], [0, 0, 1, 1], [], []>} : vector<8x512xbf16>, vector<512x128xbf16>, vector<8x128xf32> -> vector<8x128xf32>
    %cst_23 = arith.constant 0.000000e+00 : f32
    %43 = vector.broadcast %cst_23 : f32 to vector<8x128xf32>
    %44 = arith.addf %43, %14 : vector<8x128xf32>
    %45 = arith.addf %44, %18 : vector<8x128xf32>
    %46 = arith.addf %45, %22 : vector<8x128xf32>
    %47 = arith.addf %46, %26 : vector<8x128xf32>
    %48 = arith.addf %47, %30 : vector<8x128xf32>
    %49 = arith.addf %48, %34 : vector<8x128xf32>
    %50 = arith.addf %49, %38 : vector<8x128xf32>
    %51 = arith.addf %50, %42 : vector<8x128xf32>
    %c1 = arith.constant 1 : index
    %c0_24 = arith.constant 0 : index
    %52 = vector.load %arg2[%c1, %c0_24] : memref<40x512xf32, #tpu.memory_space<vmem>>, vector<1x128xf32>
    %53 = vector.broadcast %52 : vector<1x128xf32> to vector<8x128xf32>
    %54 = arith.addf %51, %53 : vector<8x128xf32>
    %55 = vector.extract_strided_slice %54 {offsets = [0, 0], sizes = [8, 32], strides = [1, 1]} : vector<8x128xf32> to vector<8x32xf32>
    %56 = arith.negf %55 : vector<8x32xf32>
    %57 = math.exp %56 : vector<8x32xf32>
    %cst_25 = arith.constant 1.000000e+00 : f32
    %58 = vector.broadcast %cst_25 : f32 to vector<8x32xf32>
    %59 = arith.addf %58, %57 : vector<8x32xf32>
    %60 = arith.divf %58, %59 : vector<8x32xf32>
    %61 = vector.extract_strided_slice %54 {offsets = [0, 64], sizes = [8, 32], strides = [1, 1]} : vector<8x128xf32> to vector<8x32xf32>
    %62 = math.tanh %61 : vector<8x32xf32>
    %63 = vector.extract_strided_slice %54 {offsets = [0, 96], sizes = [8, 32], strides = [1, 1]} : vector<8x128xf32> to vector<8x32xf32>
    %64 = arith.negf %63 : vector<8x32xf32>
    %65 = math.exp %64 : vector<8x32xf32>
    %cst_26 = arith.constant 1.000000e+00 : f32
    %66 = vector.broadcast %cst_26 : f32 to vector<8x32xf32>
    %67 = arith.addf %66, %65 : vector<8x32xf32>
    %68 = arith.divf %66, %67 : vector<8x32xf32>
    %69 = arith.mulf %60, %62 : vector<8x32xf32>
    %70 = math.tanh %69 : vector<8x32xf32>
    %71 = arith.mulf %68, %70 : vector<8x32xf32>
    %c8 = arith.constant 8 : index
    %c0_27 = arith.constant 0 : index
    %72 = vector.load %arg2[%c8, %c0_27] : memref<40x512xf32, #tpu.memory_space<vmem>>, vector<32x128xf32>
    %cst_28 = arith.constant dense<0.000000e+00> : vector<8x128xf32>
    %73 = tpu.matmul %71, %72, %cst_28 {dimension_numbers = #tpu.dot_dimension_numbers<[1], [0], [0], [1], [0, 0, 1, 1], [], []>} : vector<8x32xf32>, vector<32x128xf32>, vector<8x128xf32> -> vector<8x128xf32>
    %c2 = arith.constant 2 : index
    %c0_29 = arith.constant 0 : index
    %74 = vector.load %arg2[%c2, %c0_29] : memref<40x512xf32, #tpu.memory_space<vmem>>, vector<1x128xf32>
    %75 = vector.broadcast %74 : vector<1x128xf32> to vector<8x128xf32>
    %76 = arith.addf %73, %75 : vector<8x128xf32>
    %77 = vector.extract_strided_slice %76 {offsets = [0, 0], sizes = [8, 32], strides = [1, 1]} : vector<8x128xf32> to vector<8x32xf32>
    %78 = arith.negf %77 : vector<8x32xf32>
    %79 = math.exp %78 : vector<8x32xf32>
    %cst_30 = arith.constant 1.000000e+00 : f32
    %80 = vector.broadcast %cst_30 : f32 to vector<8x32xf32>
    %81 = arith.addf %80, %79 : vector<8x32xf32>
    %82 = arith.divf %80, %81 : vector<8x32xf32>
    %83 = vector.extract_strided_slice %76 {offsets = [0, 64], sizes = [8, 32], strides = [1, 1]} : vector<8x128xf32> to vector<8x32xf32>
    %84 = math.tanh %83 : vector<8x32xf32>
    %85 = vector.extract_strided_slice %76 {offsets = [0, 96], sizes = [8, 32], strides = [1, 1]} : vector<8x128xf32> to vector<8x32xf32>
    %86 = arith.negf %85 : vector<8x32xf32>
    %87 = math.exp %86 : vector<8x32xf32>
    %cst_31 = arith.constant 1.000000e+00 : f32
    %88 = vector.broadcast %cst_31 : f32 to vector<8x32xf32>
    %89 = arith.addf %88, %87 : vector<8x32xf32>
    %90 = arith.divf %88, %89 : vector<8x32xf32>
    %91 = arith.mulf %82, %84 : vector<8x32xf32>
    %92 = math.tanh %91 : vector<8x32xf32>
    %93 = arith.mulf %90, %92 : vector<8x32xf32>
    %c3 = arith.constant 3 : index
    %c0_32 = arith.constant 0 : index
    %94 = vector.load %arg2[%c3, %c0_32] : memref<40x512xf32, #tpu.memory_space<vmem>>, vector<1x32xf32>
    %95 = vector.broadcast %94 : vector<1x32xf32> to vector<8x32xf32>
    %96 = arith.mulf %93, %95 : vector<8x32xf32>
    %cst_33 = arith.constant dense<0.000000e+00> : vector<8xf32>
    %97 = vector.multi_reduction <add>, %96, %cst_33 [1] : vector<8x32xf32> to vector<8xf32>
    %98 = vector.shape_cast %97 : vector<8xf32> to vector<8x1xf32>
    %c4 = arith.constant 4 : index
    %c0_34 = arith.constant 0 : index
    %99 = vector.load %arg2[%c4, %c0_34] : memref<40x512xf32, #tpu.memory_space<vmem>>, vector<1x1xf32>
    %100 = vector.broadcast %99 : vector<1x1xf32> to vector<8x1xf32>
    %101 = arith.addf %98, %100 : vector<8x1xf32>
    %102 = arith.negf %101 : vector<8x1xf32>
    %103 = math.exp %102 : vector<8x1xf32>
    %cst_35 = arith.constant 1.000000e+00 : f32
    %104 = vector.broadcast %cst_35 : f32 to vector<8x1xf32>
    %105 = arith.addf %104, %103 : vector<8x1xf32>
    %106 = arith.divf %104, %105 : vector<8x1xf32>
    %c0_36 = arith.constant 0 : index
    %c0_37 = arith.constant 0 : index
    %107 = vector.load %arg7[%c0_36, %c0_37] : memref<8x1xf32, #tpu.memory_space<vmem>>, vector<8x1xf32>
    tpu.vector_store %arg7[%c0_36, %c0_37], %106 {strides = array<i32>} : memref<8x1xf32, #tpu.memory_space<vmem>>, vector<8x1xf32>,
    %c0_38 = arith.constant 0 : index
    %c0_39 = arith.constant 0 : index
    %108 = vector.load %arg7[%c0_38, %c0_39] : memref<8x1xf32, #tpu.memory_space<vmem>>, vector<2x1xf32>
    %c0_40 = arith.constant 0 : index
    %c0_41 = arith.constant 0 : index
    %109 = vector.load %arg4[%c0_40, %c0_41] : memref<2x1xf32, #tpu.memory_space<vmem>>, vector<2x1xf32>
    tpu.vector_store %arg4[%c0_40, %c0_41], %108 {strides = array<i32>} : memref<2x1xf32, #tpu.memory_space<vmem>>, vector<2x1xf32>,
    return
  }
}

</mosaic_0001>

<bundles_post_ra>
// kernel: cnn_rnn_forward.1
= control target key start
LH: loop header
LB: loop body
LE: loop exit
PB: predicated region body
PF: predicated region fallthrough
CT: control target
= control target key end

     0   :  { %s6538_s0 = inlined_call_operand.vmem [shape: f32[128,160], index: 0, kind: input, shape index: {}]   ;;  %s6539_s1 = inlined_call_operand.vmem [shape: f32[160,512], index: 1, kind: input, shape index: {}]   ;;  %s6540_s2 = inlined_call_operand.vmem [shape: f32[40,512], index: 2, kind: input, shape index: {}]   ;;  %s6541_s3 = inlined_call_operand.vmem [shape: bf16[4096,128], index: 3, kind: input, shape index: {}]   ;;  %s6542_s4 = inlined_call_operand.vmem [shape: f32[2,1], index: 4, kind: output, shape index: {}]  }
   0x1   :  { %v49_v0 = vld [vmem:[%s6541_s3] sm:$0xff]  ;;  %v51_v1 = vld [vmem:[%s6541_s3 + $0x8] sm:$0xff]  ;;  %v53_v2 = vld [vmem:[%s6541_s3 + $0x10] sm:$0xff] }
   0x2   :  { %50 = vst [vmem:[#allocation2] sm:$0xff] %v49_v0  ;;  %52 = vst [vmem:[#allocation2 + $0x8] sm:$0xff] %v51_v1  ;;  %v55_v3 = vld [vmem:[%s6541_s3 + $0x18] sm:$0xff]  ;;  %v57_v4 = vld [vmem:[%s6541_s3 + $0x20] sm:$0xff] }
   0x3   :  { %54 = vst [vmem:[#allocation2 + $0x10] sm:$0xff] %v53_v2  ;;  %v59_v5 = vld [vmem:[%s6541_s3 + $0x28] sm:$0xff]  ;;  %56 = vst [vmem:[#allocation2 + $0x18] sm:$0xff] %v55_v3  ;;  %v61_v6 = vld [vmem:[%s6541_s3 + $0x30] sm:$0xff] }
   0x4   :  { %58 = vst [vmem:[#allocation2 + $0x20] sm:$0xff] %v57_v4  ;;  %60 = vst [vmem:[#allocation2 + $0x28] sm:$0xff] %v59_v5  ;;  %v63_v7 = vld [vmem:[%s6541_s3 + $0x38] sm:$0xff]  ;;  %v65_v8 = vld [vmem:[%s6541_s3 + $0x40] sm:$0xff] }
   0x5   :  { %62 = vst [vmem:[#allocation2 + $0x30] sm:$0xff] %v61_v6  ;;  %64 = vst [vmem:[#allocation2 + $0x38] sm:$0xff] %v63_v7  ;;  %v67_v9 = vld [vmem:[%s6541_s3 + $0x48] sm:$0xff]  ;;  %v69_v10 = vld [vmem:[%s6541_s3 + $0x50] sm:$0xff] }
   0x6   :  { %66 = vst [vmem:[#allocation2 + $0x40] sm:$0xff] %v65_v8  ;;  %v71_v11 = vld [vmem:[%s6541_s3 + $0x58] sm:$0xff]  ;;  %68 = vst [vmem:[#allocation2 + $0x48] sm:$0xff] %v67_v9  ;;  %v73_v12 = vld [vmem:[%s6541_s3 + $0x60] sm:$0xff] }
   0x7   :  { %70 = vst [vmem:[#allocation2 + $0x50] sm:$0xff] %v69_v10  ;;  %72 = vst [vmem:[#allocation2 + $0x58] sm:$0xff] %v71_v11  ;;  %v75_v13 = vld [vmem:[%s6541_s3 + $0x68] sm:$0xff]  ;;  %v77_v14 = vld [vmem:[%s6541_s3 + $0x70] sm:$0xff] }
   0x8   :  { %74 = vst [vmem:[#allocation2 + $0x60] sm:$0xff] %v73_v12  ;;  %76 = vst [vmem:[#allocation2 + $0x68] sm:$0xff] %v75_v13  ;;  %v79_v15 = vld [vmem:[%s6541_s3 + $0x78] sm:$0xff]  ;;  %v81_v16 = vld [vmem:[%s6541_s3 + $0x80] sm:$0xff] }
   0x9   :  { %78 = vst [vmem:[#allocation2 + $0x70] sm:$0xff] %v77_v14  ;;  %v83_v17 = vld [vmem:[%s6541_s3 + $0x88] sm:$0xff]  ;;  %80 = vst [vmem:[#allocation2 + $0x78] sm:$0xff] %v79_v15  ;;  %v85_v18 = vld [vmem:[%s6541_s3 + $0x90] sm:$0xff] }
   0xa   :  { %82 = vst [vmem:[#allocation2 + $0x80] sm:$0xff] %v81_v16  ;;  %84 = vst [vmem:[#allocation2 + $0x88] sm:$0xff] %v83_v17  ;;  %v87_v19 = vld [vmem:[%s6541_s3 + $0x98] sm:$0xff]  ;;  %v89_v20 = vld [vmem:[%s6541_s3 + $0xa0] sm:$0xff] }
   0xb   :  { %86 = vst [vmem:[#allocation2 + $0x90] sm:$0xff] %v85_v18  ;;  %88 = vst [vmem:[#allocation2 + $0x98] sm:$0xff] %v87_v19  ;;  %v91_v21 = vld [vmem:[%s6541_s3 + $0xa8] sm:$0xff]  ;;  %v93_v22 = vld [vmem:[%s6541_s3 + $0xb0] sm:$0xff] }
   0xc   :  { %90 = vst [vmem:[#allocation2 + $0xa0] sm:$0xff] %v89_v20  ;;  %v95_v23 = vld [vmem:[%s6541_s3 + $0xb8] sm:$0xff]  ;;  %92 = vst [vmem:[#allocation2 + $0xa8] sm:$0xff] %v91_v21  ;;  %v97_v24 = vld [vmem:[%s6541_s3 + $0xc0] sm:$0xff] }
   0xd   :  { %94 = vst [vmem:[#allocation2 + $0xb0] sm:$0xff] %v93_v22  ;;  %96 = vst [vmem:[#allocation2 + $0xb8] sm:$0xff] %v95_v23  ;;  %v99_v25 = vld [vmem:[%s6541_s3 + $0xc8] sm:$0xff]  ;;  %v101_v26 = vld [vmem:[%s6541_s3 + $0xd0] sm:$0xff] }
   0xe   :  { %98 = vst [vmem:[#allocation2 + $0xc0] sm:$0xff] %v97_v24  ;;  %100 = vst [vmem:[#allocation2 + $0xc8] sm:$0xff] %v99_v25  ;;  %v103_v27 = vld [vmem:[%s6541_s3 + $0xd8] sm:$0xff]  ;;  %v105_v28 = vld [vmem:[%s6541_s3 + $0xe0] sm:$0xff] }
   0xf   :  { %102 = vst [vmem:[#allocation2 + $0xd0] sm:$0xff] %v101_v26  ;;  %v107_v29 = vld [vmem:[%s6541_s3 + $0xe8] sm:$0xff]  ;;  %104 = vst [vmem:[#allocation2 + $0xd8] sm:$0xff] %v103_v27  ;;  %v109_v30 = vld [vmem:[%s6541_s3 + $0xf0] sm:$0xff] }
  0x10   :  { %106 = vst [vmem:[#allocation2 + $0xe0] sm:$0xff] %v105_v28  ;;  %108 = vst [vmem:[#allocation2 + $0xe8] sm:$0xff] %v107_v29  ;;  %v111_v31 = vld [vmem:[%s6541_s3 + $0xf8] sm:$0xff]  ;;  %v113_v32 = vld [vmem:[%s6541_s3 + $0x100] sm:$0xff] }
  0x11   :  { %110 = vst [vmem:[#allocation2 + $0xf0] sm:$0xff] %v109_v30  ;;  %112 = vst [vmem:[#allocation2 + $0xf8] sm:$0xff] %v111_v31  ;;  %v115_v33 = vld [vmem:[%s6541_s3 + $0x108] sm:$0xff]  ;;  %v117_v34 = vld [vmem:[%s6541_s3 + $0x110] sm:$0xff] }
  0x12   :  { %114 = vst [vmem:[#allocation2 + $0x100] sm:$0xff] %v113_v32  ;;  %v119_v35 = vld [vmem:[%s6541_s3 + $0x118] sm:$0xff]  ;;  %116 = vst [vmem:[#allocation2 + $0x108] sm:$0xff] %v115_v33  ;;  %v121_v36 = vld [vmem:[%s6541_s3 + $0x120] sm:$0xff] }
  0x13   :  { %118 = vst [vmem:[#allocation2 + $0x110] sm:$0xff] %v117_v34  ;;  %120 = vst [vmem:[#allocation2 + $0x118] sm:$0xff] %v119_v35  ;;  %v123_v37 = vld [vmem:[%s6541_s3 + $0x128] sm:$0xff]  ;;  %v125_v38 = vld [vmem:[%s6541_s3 + $0x130] sm:$0xff] }
  0x14   :  { %122 = vst [vmem:[#allocation2 + $0x120] sm:$0xff] %v121_v36  ;;  %124 = vst [vmem:[#allocation2 + $0x128] sm:$0xff] %v123_v37  ;;  %v127_v39 = vld [vmem:[%s6541_s3 + $0x138] sm:$0xff]  ;;  %v129_v40 = vld [vmem:[%s6541_s3 + $0x140] sm:$0xff] }
  0x15   :  { %126 = vst [vmem:[#allocation2 + $0x130] sm:$0xff] %v125_v38  ;;  %v131_v41 = vld [vmem:[%s6541_s3 + $0x148] sm:$0xff]  ;;  %128 = vst [vmem:[#allocation2 + $0x138] sm:$0xff] %v127_v39  ;;  %v133_v42 = vld [vmem:[%s6541_s3 + $0x150] sm:$0xff] }
  0x16   :  { %130 = vst [vmem:[#allocation2 + $0x140] sm:$0xff] %v129_v40  ;;  %132 = vst [vmem:[#allocation2 + $0x148] sm:$0xff] %v131_v41  ;;  %v135_v43 = vld [vmem:[%s6541_s3 + $0x158] sm:$0xff]  ;;  %v137_v44 = vld [vmem:[%s6541_s3 + $0x160] sm:$0xff] }
  0x17   :  { %134 = vst [vmem:[#allocation2 + $0x150] sm:$0xff] %v133_v42  ;;  %136 = vst [vmem:[#allocation2 + $0x158] sm:$0xff] %v135_v43  ;;  %v139_v45 = vld [vmem:[%s6541_s3 + $0x168] sm:$0xff]  ;;  %v141_v46 = vld [vmem:[%s6541_s3 + $0x170] sm:$0xff] }
  0x18   :  { %138 = vst [vmem:[#allocation2 + $0x160] sm:$0xff] %v137_v44  ;;  %v143_v47 = vld [vmem:[%s6541_s3 + $0x178] sm:$0xff]  ;;  %140 = vst [vmem:[#allocation2 + $0x168] sm:$0xff] %v139_v45  ;;  %v145_v48 = vld [vmem:[%s6541_s3 + $0x180] sm:$0xff] }
  0x19   :  { %142 = vst [vmem:[#allocation2 + $0x170] sm:$0xff] %v141_v46  ;;  %144 = vst [vmem:[#allocation2 + $0x178] sm:$0xff] %v143_v47  ;;  %v147_v49 = vld [vmem:[%s6541_s3 + $0x188] sm:$0xff]  ;;  %v149_v50 = vld [vmem:[%s6541_s3 + $0x190] sm:$0xff] }
  0x1a   :  { %146 = vst [vmem:[#allocation2 + $0x180] sm:$0xff] %v145_v48  ;;  %148 = vst [vmem:[#allocation2 + $0x188] sm:$0xff] %v147_v49  ;;  %v151_v51 = vld [vmem:[%s6541_s3 + $0x198] sm:$0xff]  ;;  %v153_v52 = vld [vmem:[%s6541_s3 + $0x1a0] sm:$0xff] }
  0x1b   :  { %150 = vst [vmem:[#allocation2 + $0x190] sm:$0xff] %v149_v50  ;;  %v155_v53 = vld [vmem:[%s6541_s3 + $0x1a8] sm:$0xff]  ;;  %152 = vst [vmem:[#allocation2 + $0x198] sm:$0xff] %v151_v51  ;;  %v157_v54 = vld [vmem:[%s6541_s3 + $0x1b0] sm:$0xff] }
  0x1c   :  { %154 = vst [vmem:[#allocation2 + $0x1a0] sm:$0xff] %v153_v52  ;;  %156 = vst [vmem:[#allocation2 + $0x1a8] sm:$0xff] %v155_v53  ;;  %v159_v55 = vld [vmem:[%s6541_s3 + $0x1b8] sm:$0xff]  ;;  %v161_v56 = vld [vmem:[%s6541_s3 + $0x1c0] sm:$0xff] }
  0x1d   :  { %158 = vst [vmem:[#allocation2 + $0x1b0] sm:$0xff] %v157_v54  ;;  %160 = vst [vmem:[#allocation2 + $0x1b8] sm:$0xff] %v159_v55  ;;  %v163_v57 = vld [vmem:[%s6541_s3 + $0x1c8] sm:$0xff]  ;;  %v165_v58 = vld [vmem:[%s6541_s3 + $0x1d0] sm:$0xff] }
  0x1e   :  { %162 = vst [vmem:[#allocation2 + $0x1c0] sm:$0xff] %v161_v56  ;;  %v167_v59 = vld [vmem:[%s6541_s3 + $0x1d8] sm:$0xff]  ;;  %164 = vst [vmem:[#allocation2 + $0x1c8] sm:$0xff] %v163_v57  ;;  %v169_v60 = vld [vmem:[%s6541_s3 + $0x1e0] sm:$0xff] }
  0x1f   :  { %166 = vst [vmem:[#allocation2 + $0x1d0] sm:$0xff] %v165_v58  ;;  %168 = vst [vmem:[#allocation2 + $0x1d8] sm:$0xff] %v167_v59  ;;  %v171_v61 = vld [vmem:[%s6541_s3 + $0x1e8] sm:$0xff]  ;;  %v173_v62 = vld [vmem:[%s6541_s3 + $0x1f0] sm:$0xff] }
  0x20   :  { %170 = vst [vmem:[#allocation2 + $0x1e0] sm:$0xff] %v169_v60  ;;  %172 = vst [vmem:[#allocation2 + $0x1e8] sm:$0xff] %v171_v61  ;;  %v175_v63 = vld [vmem:[%s6541_s3 + $0x1f8] sm:$0xff]  ;;  %v177_v0 = vld [vmem:[%s6541_s3 + $0x200] sm:$0xff] }
  0x21   :  { %174 = vst [vmem:[#allocation2 + $0x1f0] sm:$0xff] %v173_v62  ;;  %v179_v1 = vld [vmem:[%s6541_s3 + $0x208] sm:$0xff]  ;;  %176 = vst [vmem:[#allocation2 + $0x1f8] sm:$0xff] %v175_v63  ;;  %v181_v2 = vld [vmem:[%s6541_s3 + $0x210] sm:$0xff] }
  0x22   :  { %178 = vst [vmem:[#allocation2 + $0x200] sm:$0xff] %v177_v0  ;;  %180 = vst [vmem:[#allocation2 + $0x208] sm:$0xff] %v179_v1  ;;  %v183_v3 = vld [vmem:[%s6541_s3 + $0x218] sm:$0xff]  ;;  %v185_v4 = vld [vmem:[%s6541_s3 + $0x220] sm:$0xff] }
  0x23   :  { %182 = vst [vmem:[#allocation2 + $0x210] sm:$0xff] %v181_v2  ;;  %184 = vst [vmem:[#allocation2 + $0x218] sm:$0xff] %v183_v3  ;;  %v187_v5 = vld [vmem:[%s6541_s3 + $0x228] sm:$0xff]  ;;  %v189_v6 = vld [vmem:[%s6541_s3 + $0x230] sm:$0xff] }
  0x24   :  { %186 = vst [vmem:[#allocation2 + $0x220] sm:$0xff] %v185_v4  ;;  %v191_v7 = vld [vmem:[%s6541_s3 + $0x238] sm:$0xff]  ;;  %188 = vst [vmem:[#allocation2 + $0x228] sm:$0xff] %v187_v5  ;;  %v193_v8 = vld [vmem:[%s6541_s3 + $0x240] sm:$0xff] }
  0x25   :  { %190 = vst [vmem:[#allocation2 + $0x230] sm:$0xff] %v189_v6  ;;  %192 = vst [vmem:[#allocation2 + $0x238] sm:$0xff] %v191_v7  ;;  %v195_v9 = vld [vmem:[%s6541_s3 + $0x248] sm:$0xff]  ;;  %v197_v10 = vld [vmem:[%s6541_s3 + $0x250] sm:$0xff] }
  0x26   :  { %194 = vst [vmem:[#allocation2 + $0x240] sm:$0xff] %v193_v8  ;;  %196 = vst [vmem:[#allocation2 + $0x248] sm:$0xff] %v195_v9  ;;  %v199_v11 = vld [vmem:[%s6541_s3 + $0x258] sm:$0xff]  ;;  %v201_v12 = vld [vmem:[%s6541_s3 + $0x260] sm:$0xff] }
  0x27   :  { %198 = vst [vmem:[#allocation2 + $0x250] sm:$0xff] %v197_v10  ;;  %v203_v13 = vld [vmem:[%s6541_s3 + $0x268] sm:$0xff]  ;;  %200 = vst [vmem:[#allocation2 + $0x258] sm:$0xff] %v199_v11  ;;  %v205_v14 = vld [vmem:[%s6541_s3 + $0x270] sm:$0xff] }
  0x28   :  { %202 = vst [vmem:[#allocation2 + $0x260] sm:$0xff] %v201_v12  ;;  %204 = vst [vmem:[#allocation2 + $0x268] sm:$0xff] %v203_v13  ;;  %v207_v15 = vld [vmem:[%s6541_s3 + $0x278] sm:$0xff]  ;;  %v209_v16 = vld [vmem:[%s6541_s3 + $0x280] sm:$0xff] }
  0x29   :  { %206 = vst [vmem:[#allocation2 + $0x270] sm:$0xff] %v205_v14  ;;  %208 = vst [vmem:[#allocation2 + $0x278] sm:$0xff] %v207_v15  ;;  %v211_v17 = vld [vmem:[%s6541_s3 + $0x288] sm:$0xff]  ;;  %v213_v18 = vld [vmem:[%s6541_s3 + $0x290] sm:$0xff] }
  0x2a   :  { %210 = vst [vmem:[#allocation2 + $0x280] sm:$0xff] %v209_v16  ;;  %v215_v19 = vld [vmem:[%s6541_s3 + $0x298] sm:$0xff]  ;;  %212 = vst [vmem:[#allocation2 + $0x288] sm:$0xff] %v211_v17  ;;  %v217_v20 = vld [vmem:[%s6541_s3 + $0x2a0] sm:$0xff] }
  0x2b   :  { %214 = vst [vmem:[#allocation2 + $0x290] sm:$0xff] %v213_v18  ;;  %216 = vst [vmem:[#allocation2 + $0x298] sm:$0xff] %v215_v19  ;;  %v219_v21 = vld [vmem:[%s6541_s3 + $0x2a8] sm:$0xff]  ;;  %v221_v22 = vld [vmem:[%s6541_s3 + $0x2b0] sm:$0xff] }
  0x2c   :  { %218 = vst [vmem:[#allocation2 + $0x2a0] sm:$0xff] %v217_v20  ;;  %220 = vst [vmem:[#allocation2 + $0x2a8] sm:$0xff] %v219_v21  ;;  %v223_v23 = vld [vmem:[%s6541_s3 + $0x2b8] sm:$0xff]  ;;  %v225_v24 = vld [vmem:[%s6541_s3 + $0x2c0] sm:$0xff] }
  0x2d   :  { %222 = vst [vmem:[#allocation2 + $0x2b0] sm:$0xff] %v221_v22  ;;  %v227_v25 = vld [vmem:[%s6541_s3 + $0x2c8] sm:$0xff]  ;;  %224 = vst [vmem:[#allocation2 + $0x2b8] sm:$0xff] %v223_v23  ;;  %v229_v26 = vld [vmem:[%s6541_s3 + $0x2d0] sm:$0xff] }
  0x2e   :  { %226 = vst [vmem:[#allocation2 + $0x2c0] sm:$0xff] %v225_v24  ;;  %228 = vst [vmem:[#allocation2 + $0x2c8] sm:$0xff] %v227_v25  ;;  %v231_v27 = vld [vmem:[%s6541_s3 + $0x2d8] sm:$0xff]  ;;  %v233_v28 = vld [vmem:[%s6541_s3 + $0x2e0] sm:$0xff] }
  0x2f   :  { %230 = vst [vmem:[#allocation2 + $0x2d0] sm:$0xff] %v229_v26  ;;  %232 = vst [vmem:[#allocation2 + $0x2d8] sm:$0xff] %v231_v27  ;;  %v235_v29 = vld [vmem:[%s6541_s3 + $0x2e8] sm:$0xff]  ;;  %v237_v30 = vld [vmem:[%s6541_s3 + $0x2f0] sm:$0xff] }
  0x30   :  { %234 = vst [vmem:[#allocation2 + $0x2e0] sm:$0xff] %v233_v28  ;;  %v239_v31 = vld [vmem:[%s6541_s3 + $0x2f8] sm:$0xff]  ;;  %236 = vst [vmem:[#allocation2 + $0x2e8] sm:$0xff] %v235_v29  ;;  %v241_v32 = vld [vmem:[%s6541_s3 + $0x300] sm:$0xff] }
  0x31   :  { %238 = vst [vmem:[#allocation2 + $0x2f0] sm:$0xff] %v237_v30  ;;  %240 = vst [vmem:[#allocation2 + $0x2f8] sm:$0xff] %v239_v31  ;;  %v243_v33 = vld [vmem:[%s6541_s3 + $0x308] sm:$0xff]  ;;  %v245_v34 = vld [vmem:[%s6541_s3 + $0x310] sm:$0xff] }
  0x32   :  { %242 = vst [vmem:[#allocation2 + $0x300] sm:$0xff] %v241_v32  ;;  %244 = vst [vmem:[#allocation2 + $0x308] sm:$0xff] %v243_v33  ;;  %v247_v35 = vld [vmem:[%s6541_s3 + $0x318] sm:$0xff]  ;;  %v249_v36 = vld [vmem:[%s6541_s3 + $0x320] sm:$0xff] }
  0x33   :  { %246 = vst [vmem:[#allocation2 + $0x310] sm:$0xff] %v245_v34  ;;  %v251_v37 = vld [vmem:[%s6541_s3 + $0x328] sm:$0xff]  ;;  %248 = vst [vmem:[#allocation2 + $0x318] sm:$0xff] %v247_v35  ;;  %v253_v38 = vld [vmem:[%s6541_s3 + $0x330] sm:$0xff] }
  0x34   :  { %250 = vst [vmem:[#allocation2 + $0x320] sm:$0xff] %v249_v36  ;;  %252 = vst [vmem:[#allocation2 + $0x328] sm:$0xff] %v251_v37  ;;  %v255_v39 = vld [vmem:[%s6541_s3 + $0x338] sm:$0xff]  ;;  %v257_v40 = vld [vmem:[%s6541_s3 + $0x340] sm:$0xff] }
  0x35   :  { %254 = vst [vmem:[#allocation2 + $0x330] sm:$0xff] %v253_v38  ;;  %256 = vst [vmem:[#allocation2 + $0x338] sm:$0xff] %v255_v39  ;;  %v259_v41 = vld [vmem:[%s6541_s3 + $0x348] sm:$0xff]  ;;  %v261_v42 = vld [vmem:[%s6541_s3 + $0x350] sm:$0xff] }
  0x36   :  { %258 = vst [vmem:[#allocation2 + $0x340] sm:$0xff] %v257_v40  ;;  %v263_v43 = vld [vmem:[%s6541_s3 + $0x358] sm:$0xff]  ;;  %260 = vst [vmem:[#allocation2 + $0x348] sm:$0xff] %v259_v41  ;;  %v265_v44 = vld [vmem:[%s6541_s3 + $0x360] sm:$0xff] }
  0x37   :  { %262 = vst [vmem:[#allocation2 + $0x350] sm:$0xff] %v261_v42  ;;  %264 = vst [vmem:[#allocation2 + $0x358] sm:$0xff] %v263_v43  ;;  %v267_v45 = vld [vmem:[%s6541_s3 + $0x368] sm:$0xff]  ;;  %v269_v46 = vld [vmem:[%s6541_s3 + $0x370] sm:$0xff] }
  0x38   :  { %266 = vst [vmem:[#allocation2 + $0x360] sm:$0xff] %v265_v44  ;;  %268 = vst [vmem:[#allocation2 + $0x368] sm:$0xff] %v267_v45  ;;  %v271_v47 = vld [vmem:[%s6541_s3 + $0x378] sm:$0xff]  ;;  %v273_v48 = vld [vmem:[%s6541_s3 + $0x380] sm:$0xff] }
  0x39   :  { %270 = vst [vmem:[#allocation2 + $0x370] sm:$0xff] %v269_v46  ;;  %v275_v49 = vld [vmem:[%s6541_s3 + $0x388] sm:$0xff]  ;;  %272 = vst [vmem:[#allocation2 + $0x378] sm:$0xff] %v271_v47  ;;  %v277_v50 = vld [vmem:[%s6541_s3 + $0x390] sm:$0xff] }
  0x3a   :  { %274 = vst [vmem:[#allocation2 + $0x380] sm:$0xff] %v273_v48  ;;  %276 = vst [vmem:[#allocation2 + $0x388] sm:$0xff] %v275_v49  ;;  %v279_v51 = vld [vmem:[%s6541_s3 + $0x398] sm:$0xff]  ;;  %v281_v52 = vld [vmem:[%s6541_s3 + $0x3a0] sm:$0xff] }
  0x3b   :  { %278 = vst [vmem:[#allocation2 + $0x390] sm:$0xff] %v277_v50  ;;  %280 = vst [vmem:[#allocation2 + $0x398] sm:$0xff] %v279_v51  ;;  %v283_v53 = vld [vmem:[%s6541_s3 + $0x3a8] sm:$0xff]  ;;  %v285_v54 = vld [vmem:[%s6541_s3 + $0x3b0] sm:$0xff] }
  0x3c   :  { %282 = vst [vmem:[#allocation2 + $0x3a0] sm:$0xff] %v281_v52  ;;  %v287_v55 = vld [vmem:[%s6541_s3 + $0x3b8] sm:$0xff]  ;;  %284 = vst [vmem:[#allocation2 + $0x3a8] sm:$0xff] %v283_v53  ;;  %v289_v56 = vld [vmem:[%s6541_s3 + $0x3c0] sm:$0xff] }
  0x3d   :  { %286 = vst [vmem:[#allocation2 + $0x3b0] sm:$0xff] %v285_v54  ;;  %288 = vst [vmem:[#allocation2 + $0x3b8] sm:$0xff] %v287_v55  ;;  %v291_v57 = vld [vmem:[%s6541_s3 + $0x3c8] sm:$0xff]  ;;  %v293_v58 = vld [vmem:[%s6541_s3 + $0x3d0] sm:$0xff] }
  0x3e   :  { %290 = vst [vmem:[#allocation2 + $0x3c0] sm:$0xff] %v289_v56  ;;  %292 = vst [vmem:[#allocation2 + $0x3c8] sm:$0xff] %v291_v57  ;;  %v295_v59 = vld [vmem:[%s6541_s3 + $0x3d8] sm:$0xff]  ;;  %v297_v60 = vld [vmem:[%s6541_s3 + $0x3e0] sm:$0xff] }
  0x3f   :  { %294 = vst [vmem:[#allocation2 + $0x3d0] sm:$0xff] %v293_v58  ;;  %v299_v61 = vld [vmem:[%s6541_s3 + $0x3e8] sm:$0xff]  ;;  %296 = vst [vmem:[#allocation2 + $0x3d8] sm:$0xff] %v295_v59  ;;  %v301_v62 = vld [vmem:[%s6541_s3 + $0x3f0] sm:$0xff] }
  0x40   :  { %298 = vst [vmem:[#allocation2 + $0x3e0] sm:$0xff] %v297_v60  ;;  %300 = vst [vmem:[#allocation2 + $0x3e8] sm:$0xff] %v299_v61  ;;  %v303_v63 = vld [vmem:[%s6541_s3 + $0x3f8] sm:$0xff]  ;;  %v305_v0 = vld [vmem:[%s6541_s3 + $0x400] sm:$0xff] }
  0x41   :  { %302 = vst [vmem:[#allocation2 + $0x3f0] sm:$0xff] %v301_v62  ;;  %304 = vst [vmem:[#allocation2 + $0x3f8] sm:$0xff] %v303_v63  ;;  %v307_v1 = vld [vmem:[%s6541_s3 + $0x408] sm:$0xff]  ;;  %v309_v2 = vld [vmem:[%s6541_s3 + $0x410] sm:$0xff] }
  0x42   :  { %306 = vst [vmem:[#allocation2 + $0x400] sm:$0xff] %v305_v0  ;;  %v311_v3 = vld [vmem:[%s6541_s3 + $0x418] sm:$0xff]  ;;  %308 = vst [vmem:[#allocation2 + $0x408] sm:$0xff] %v307_v1  ;;  %v313_v4 = vld [vmem:[%s6541_s3 + $0x420] sm:$0xff] }
  0x43   :  { %310 = vst [vmem:[#allocation2 + $0x410] sm:$0xff] %v309_v2  ;;  %312 = vst [vmem:[#allocation2 + $0x418] sm:$0xff] %v311_v3  ;;  %v315_v5 = vld [vmem:[%s6541_s3 + $0x428] sm:$0xff]  ;;  %v317_v6 = vld [vmem:[%s6541_s3 + $0x430] sm:$0xff] }
  0x44   :  { %314 = vst [vmem:[#allocation2 + $0x420] sm:$0xff] %v313_v4  ;;  %316 = vst [vmem:[#allocation2 + $0x428] sm:$0xff] %v315_v5  ;;  %v319_v7 = vld [vmem:[%s6541_s3 + $0x438] sm:$0xff]  ;;  %v321_v8 = vld [vmem:[%s6541_s3 + $0x440] sm:$0xff] }
  0x45   :  { %318 = vst [vmem:[#allocation2 + $0x430] sm:$0xff] %v317_v6  ;;  %v323_v9 = vld [vmem:[%s6541_s3 + $0x448] sm:$0xff]  ;;  %320 = vst [vmem:[#allocation2 + $0x438] sm:$0xff] %v319_v7  ;;  %v325_v10 = vld [vmem:[%s6541_s3 + $0x450] sm:$0xff] }
  0x46   :  { %322 = vst [vmem:[#allocation2 + $0x440] sm:$0xff] %v321_v8  ;;  %324 = vst [vmem:[#allocation2 + $0x448] sm:$0xff] %v323_v9  ;;  %v327_v11 = vld [vmem:[%s6541_s3 + $0x458] sm:$0xff]  ;;  %v329_v12 = vld [vmem:[%s6541_s3 + $0x460] sm:$0xff] }
  0x47   :  { %326 = vst [vmem:[#allocation2 + $0x450] sm:$0xff] %v325_v10  ;;  %328 = vst [vmem:[#allocation2 + $0x458] sm:$0xff] %v327_v11  ;;  %v331_v13 = vld [vmem:[%s6541_s3 + $0x468] sm:$0xff]  ;;  %v333_v14 = vld [vmem:[%s6541_s3 + $0x470] sm:$0xff] }
  0x48   :  { %330 = vst [vmem:[#allocation2 + $0x460] sm:$0xff] %v329_v12  ;;  %v335_v15 = vld [vmem:[%s6541_s3 + $0x478] sm:$0xff]  ;;  %332 = vst [vmem:[#allocation2 + $0x468] sm:$0xff] %v331_v13  ;;  %v337_v16 = vld [vmem:[%s6541_s3 + $0x480] sm:$0xff] }
  0x49   :  { %334 = vst [vmem:[#allocation2 + $0x470] sm:$0xff] %v333_v14  ;;  %336 = vst [vmem:[#allocation2 + $0x478] sm:$0xff] %v335_v15  ;;  %v339_v17 = vld [vmem:[%s6541_s3 + $0x488] sm:$0xff]  ;;  %v341_v18 = vld [vmem:[%s6541_s3 + $0x490] sm:$0xff] }
  0x4a   :  { %338 = vst [vmem:[#allocation2 + $0x480] sm:$0xff] %v337_v16  ;;  %340 = vst [vmem:[#allocation2 + $0x488] sm:$0xff] %v339_v17  ;;  %v343_v19 = vld [vmem:[%s6541_s3 + $0x498] sm:$0xff]  ;;  %v345_v20 = vld [vmem:[%s6541_s3 + $0x4a0] sm:$0xff] }
  0x4b   :  { %342 = vst [vmem:[#allocation2 + $0x490] sm:$0xff] %v341_v18  ;;  %v347_v21 = vld [vmem:[%s6541_s3 + $0x4a8] sm:$0xff]  ;;  %344 = vst [vmem:[#allocation2 + $0x498] sm:$0xff] %v343_v19  ;;  %v349_v22 = vld [vmem:[%s6541_s3 + $0x4b0] sm:$0xff] }
  0x4c   :  { %346 = vst [vmem:[#allocation2 + $0x4a0] sm:$0xff] %v345_v20  ;;  %348 = vst [vmem:[#allocation2 + $0x4a8] sm:$0xff] %v347_v21  ;;  %v351_v23 = vld [vmem:[%s6541_s3 + $0x4b8] sm:$0xff]  ;;  %v353_v24 = vld [vmem:[%s6541_s3 + $0x4c0] sm:$0xff] }
  0x4d   :  { %350 = vst [vmem:[#allocation2 + $0x4b0] sm:$0xff] %v349_v22  ;;  %352 = vst [vmem:[#allocation2 + $0x4b8] sm:$0xff] %v351_v23  ;;  %v355_v25 = vld [vmem:[%s6541_s3 + $0x4c8] sm:$0xff]  ;;  %v357_v26 = vld [vmem:[%s6541_s3 + $0x4d0] sm:$0xff] }
  0x4e   :  { %354 = vst [vmem:[#allocation2 + $0x4c0] sm:$0xff] %v353_v24  ;;  %v359_v27 = vld [vmem:[%s6541_s3 + $0x4d8] sm:$0xff]  ;;  %356 = vst [vmem:[#allocation2 + $0x4c8] sm:$0xff] %v355_v25  ;;  %v361_v28 = vld [vmem:[%s6541_s3 + $0x4e0] sm:$0xff] }
  0x4f   :  { %358 = vst [vmem:[#allocation2 + $0x4d0] sm:$0xff] %v357_v26  ;;  %360 = vst [vmem:[#allocation2 + $0x4d8] sm:$0xff] %v359_v27  ;;  %v363_v29 = vld [vmem:[%s6541_s3 + $0x4e8] sm:$0xff]  ;;  %v365_v30 = vld [vmem:[%s6541_s3 + $0x4f0] sm:$0xff] }
  0x50   :  { %362 = vst [vmem:[#allocation2 + $0x4e0] sm:$0xff] %v361_v28  ;;  %364 = vst [vmem:[#allocation2 + $0x4e8] sm:$0xff] %v363_v29  ;;  %v367_v31 = vld [vmem:[%s6541_s3 + $0x4f8] sm:$0xff]  ;;  %v369_v32 = vld [vmem:[%s6541_s3 + $0x500] sm:$0xff] }
  0x51   :  { %366 = vst [vmem:[#allocation2 + $0x4f0] sm:$0xff] %v365_v30  ;;  %v371_v33 = vld [vmem:[%s6541_s3 + $0x508] sm:$0xff]  ;;  %368 = vst [vmem:[#allocation2 + $0x4f8] sm:$0xff] %v367_v31  ;;  %v373_v34 = vld [vmem:[%s6541_s3 + $0x510] sm:$0xff] }
  0x52   :  { %370 = vst [vmem:[#allocation2 + $0x500] sm:$0xff] %v369_v32  ;;  %372 = vst [vmem:[#allocation2 + $0x508] sm:$0xff] %v371_v33  ;;  %v375_v35 = vld [vmem:[%s6541_s3 + $0x518] sm:$0xff]  ;;  %v377_v36 = vld [vmem:[%s6541_s3 + $0x520] sm:$0xff] }
  0x53   :  { %374 = vst [vmem:[#allocation2 + $0x510] sm:$0xff] %v373_v34  ;;  %376 = vst [vmem:[#allocation2 + $0x518] sm:$0xff] %v375_v35  ;;  %v379_v37 = vld [vmem:[%s6541_s3 + $0x528] sm:$0xff]  ;;  %v381_v38 = vld [vmem:[%s6541_s3 + $0x530] sm:$0xff] }
  0x54   :  { %378 = vst [vmem:[#allocation2 + $0x520] sm:$0xff] %v377_v36  ;;  %v383_v39 = vld [vmem:[%s6541_s3 + $0x538] sm:$0xff]  ;;  %380 = vst [vmem:[#allocation2 + $0x528] sm:$0xff] %v379_v37  ;;  %v385_v40 = vld [vmem:[%s6541_s3 + $0x540] sm:$0xff] }
  0x55   :  { %382 = vst [vmem:[#allocation2 + $0x530] sm:$0xff] %v381_v38  ;;  %384 = vst [vmem:[#allocation2 + $0x538] sm:$0xff] %v383_v39  ;;  %v387_v41 = vld [vmem:[%s6541_s3 + $0x548] sm:$0xff]  ;;  %v389_v42 = vld [vmem:[%s6541_s3 + $0x550] sm:$0xff] }
  0x56   :  { %386 = vst [vmem:[#allocation2 + $0x540] sm:$0xff] %v385_v40  ;;  %388 = vst [vmem:[#allocation2 + $0x548] sm:$0xff] %v387_v41  ;;  %v391_v43 = vld [vmem:[%s6541_s3 + $0x558] sm:$0xff]  ;;  %v393_v44 = vld [vmem:[%s6541_s3 + $0x560] sm:$0xff] }
  0x57   :  { %390 = vst [vmem:[#allocation2 + $0x550] sm:$0xff] %v389_v42  ;;  %v395_v45 = vld [vmem:[%s6541_s3 + $0x568] sm:$0xff]  ;;  %392 = vst [vmem:[#allocation2 + $0x558] sm:$0xff] %v391_v43  ;;  %v397_v46 = vld [vmem:[%s6541_s3 + $0x570] sm:$0xff] }
  0x58   :  { %394 = vst [vmem:[#allocation2 + $0x560] sm:$0xff] %v393_v44  ;;  %396 = vst [vmem:[#allocation2 + $0x568] sm:$0xff] %v395_v45  ;;  %v399_v47 = vld [vmem:[%s6541_s3 + $0x578] sm:$0xff]  ;;  %v401_v48 = vld [vmem:[%s6541_s3 + $0x580] sm:$0xff] }
  0x59   :  { %398 = vst [vmem:[#allocation2 + $0x570] sm:$0xff] %v397_v46  ;;  %400 = vst [vmem:[#allocation2 + $0x578] sm:$0xff] %v399_v47  ;;  %v403_v49 = vld [vmem:[%s6541_s3 + $0x588] sm:$0xff]  ;;  %v405_v50 = vld [vmem:[%s6541_s3 + $0x590] sm:$0xff] }
  0x5a   :  { %402 = vst [vmem:[#allocation2 + $0x580] sm:$0xff] %v401_v48  ;;  %v407_v51 = vld [vmem:[%s6541_s3 + $0x598] sm:$0xff]  ;;  %404 = vst [vmem:[#allocation2 + $0x588] sm:$0xff] %v403_v49  ;;  %v409_v52 = vld [vmem:[%s6541_s3 + $0x5a0] sm:$0xff] }
  0x5b   :  { %406 = vst [vmem:[#allocation2 + $0x590] sm:$0xff] %v405_v50  ;;  %408 = vst [vmem:[#allocation2 + $0x598] sm:$0xff] %v407_v51  ;;  %v411_v53 = vld [vmem:[%s6541_s3 + $0x5a8] sm:$0xff]  ;;  %v413_v54 = vld [vmem:[%s6541_s3 + $0x5b0] sm:$0xff] }
  0x5c   :  { %410 = vst [vmem:[#allocation2 + $0x5a0] sm:$0xff] %v409_v52  ;;  %412 = vst [vmem:[#allocation2 + $0x5a8] sm:$0xff] %v411_v53  ;;  %v415_v55 = vld [vmem:[%s6541_s3 + $0x5b8] sm:$0xff]  ;;  %v417_v56 = vld [vmem:[%s6541_s3 + $0x5c0] sm:$0xff] }
  0x5d   :  { %414 = vst [vmem:[#allocation2 + $0x5b0] sm:$0xff] %v413_v54  ;;  %v419_v57 = vld [vmem:[%s6541_s3 + $0x5c8] sm:$0xff]  ;;  %416 = vst [vmem:[#allocation2 + $0x5b8] sm:$0xff] %v415_v55  ;;  %v421_v58 = vld [vmem:[%s6541_s3 + $0x5d0] sm:$0xff] }
  0x5e   :  { %418 = vst [vmem:[#allocation2 + $0x5c0] sm:$0xff] %v417_v56  ;;  %420 = vst [vmem:[#allocation2 + $0x5c8] sm:$0xff] %v419_v57  ;;  %v423_v59 = vld [vmem:[%s6541_s3 + $0x5d8] sm:$0xff]  ;;  %v425_v60 = vld [vmem:[%s6541_s3 + $0x5e0] sm:$0xff] }
  0x5f   :  { %422 = vst [vmem:[#allocation2 + $0x5d0] sm:$0xff] %v421_v58  ;;  %424 = vst [vmem:[#allocation2 + $0x5d8] sm:$0xff] %v423_v59  ;;  %v427_v61 = vld [vmem:[%s6541_s3 + $0x5e8] sm:$0xff]  ;;  %v429_v62 = vld [vmem:[%s6541_s3 + $0x5f0] sm:$0xff] }
  0x60   :  { %426 = vst [vmem:[#allocation2 + $0x5e0] sm:$0xff] %v425_v60  ;;  %v431_v63 = vld [vmem:[%s6541_s3 + $0x5f8] sm:$0xff]  ;;  %428 = vst [vmem:[#allocation2 + $0x5e8] sm:$0xff] %v427_v61  ;;  %v433_v0 = vld [vmem:[%s6541_s3 + $0x600] sm:$0xff] }
  0x61   :  { %430 = vst [vmem:[#allocation2 + $0x5f0] sm:$0xff] %v429_v62  ;;  %432 = vst [vmem:[#allocation2 + $0x5f8] sm:$0xff] %v431_v63  ;;  %v435_v1 = vld [vmem:[%s6541_s3 + $0x608] sm:$0xff]  ;;  %v437_v2 = vld [vmem:[%s6541_s3 + $0x610] sm:$0xff] }
  0x62   :  { %434 = vst [vmem:[#allocation2 + $0x600] sm:$0xff] %v433_v0  ;;  %436 = vst [vmem:[#allocation2 + $0x608] sm:$0xff] %v435_v1  ;;  %v439_v3 = vld [vmem:[%s6541_s3 + $0x618] sm:$0xff]  ;;  %v441_v4 = vld [vmem:[%s6541_s3 + $0x620] sm:$0xff] }
  0x63   :  { %438 = vst [vmem:[#allocation2 + $0x610] sm:$0xff] %v437_v2  ;;  %v443_v5 = vld [vmem:[%s6541_s3 + $0x628] sm:$0xff]  ;;  %440 = vst [vmem:[#allocation2 + $0x618] sm:$0xff] %v439_v3  ;;  %v445_v6 = vld [vmem:[%s6541_s3 + $0x630] sm:$0xff] }
  0x64   :  { %442 = vst [vmem:[#allocation2 + $0x620] sm:$0xff] %v441_v4  ;;  %444 = vst [vmem:[#allocation2 + $0x628] sm:$0xff] %v443_v5  ;;  %v447_v7 = vld [vmem:[%s6541_s3 + $0x638] sm:$0xff]  ;;  %v449_v8 = vld [vmem:[%s6541_s3 + $0x640] sm:$0xff] }
  0x65   :  { %446 = vst [vmem:[#allocation2 + $0x630] sm:$0xff] %v445_v6  ;;  %448 = vst [vmem:[#allocation2 + $0x638] sm:$0xff] %v447_v7  ;;  %v451_v9 = vld [vmem:[%s6541_s3 + $0x648] sm:$0xff]  ;;  %v453_v10 = vld [vmem:[%s6541_s3 + $0x650] sm:$0xff] }
  0x66   :  { %450 = vst [vmem:[#allocation2 + $0x640] sm:$0xff] %v449_v8  ;;  %v455_v11 = vld [vmem:[%s6541_s3 + $0x658] sm:$0xff]  ;;  %452 = vst [vmem:[#allocation2 + $0x648] sm:$0xff] %v451_v9  ;;  %v457_v12 = vld [vmem:[%s6541_s3 + $0x660] sm:$0xff] }
  0x67   :  { %454 = vst [vmem:[#allocation2 + $0x650] sm:$0xff] %v453_v10  ;;  %456 = vst [vmem:[#allocation2 + $0x658] sm:$0xff] %v455_v11  ;;  %v459_v13 = vld [vmem:[%s6541_s3 + $0x668] sm:$0xff]  ;;  %v461_v14 = vld [vmem:[%s6541_s3 + $0x670] sm:$0xff] }
  0x68   :  { %458 = vst [vmem:[#allocation2 + $0x660] sm:$0xff] %v457_v12  ;;  %460 = vst [vmem:[#allocation2 + $0x668] sm:$0xff] %v459_v13  ;;  %v463_v15 = vld [vmem:[%s6541_s3 + $0x678] sm:$0xff]  ;;  %v465_v16 = vld [vmem:[%s6541_s3 + $0x680] sm:$0xff] }
  0x69   :  { %462 = vst [vmem:[#allocation2 + $0x670] sm:$0xff] %v461_v14  ;;  %v467_v17 = vld [vmem:[%s6541_s3 + $0x688] sm:$0xff]  ;;  %464 = vst [vmem:[#allocation2 + $0x678] sm:$0xff] %v463_v15  ;;  %v469_v18 = vld [vmem:[%s6541_s3 + $0x690] sm:$0xff] }
  0x6a   :  { %466 = vst [vmem:[#allocation2 + $0x680] sm:$0xff] %v465_v16  ;;  %468 = vst [vmem:[#allocation2 + $0x688] sm:$0xff] %v467_v17  ;;  %v471_v19 = vld [vmem:[%s6541_s3 + $0x698] sm:$0xff]  ;;  %v473_v20 = vld [vmem:[%s6541_s3 + $0x6a0] sm:$0xff] }
  0x6b   :  { %470 = vst [vmem:[#allocation2 + $0x690] sm:$0xff] %v469_v18  ;;  %472 = vst [vmem:[#allocation2 + $0x698] sm:$0xff] %v471_v19  ;;  %v475_v21 = vld [vmem:[%s6541_s3 + $0x6a8] sm:$0xff]  ;;  %v477_v22 = vld [vmem:[%s6541_s3 + $0x6b0] sm:$0xff] }
  0x6c   :  { %474 = vst [vmem:[#allocation2 + $0x6a0] sm:$0xff] %v473_v20  ;;  %v479_v23 = vld [vmem:[%s6541_s3 + $0x6b8] sm:$0xff]  ;;  %476 = vst [vmem:[#allocation2 + $0x6a8] sm:$0xff] %v475_v21  ;;  %v481_v24 = vld [vmem:[%s6541_s3 + $0x6c0] sm:$0xff] }
  0x6d   :  { %478 = vst [vmem:[#allocation2 + $0x6b0] sm:$0xff] %v477_v22  ;;  %480 = vst [vmem:[#allocation2 + $0x6b8] sm:$0xff] %v479_v23  ;;  %v483_v25 = vld [vmem:[%s6541_s3 + $0x6c8] sm:$0xff]  ;;  %v485_v26 = vld [vmem:[%s6541_s3 + $0x6d0] sm:$0xff] }
  0x6e   :  { %482 = vst [vmem:[#allocation2 + $0x6c0] sm:$0xff] %v481_v24  ;;  %484 = vst [vmem:[#allocation2 + $0x6c8] sm:$0xff] %v483_v25  ;;  %v487_v27 = vld [vmem:[%s6541_s3 + $0x6d8] sm:$0xff]  ;;  %v489_v28 = vld [vmem:[%s6541_s3 + $0x6e0] sm:$0xff] }
  0x6f   :  { %486 = vst [vmem:[#allocation2 + $0x6d0] sm:$0xff] %v485_v26  ;;  %v491_v29 = vld [vmem:[%s6541_s3 + $0x6e8] sm:$0xff]  ;;  %488 = vst [vmem:[#allocation2 + $0x6d8] sm:$0xff] %v487_v27  ;;  %v493_v30 = vld [vmem:[%s6541_s3 + $0x6f0] sm:$0xff] }
  0x70   :  { %490 = vst [vmem:[#allocation2 + $0x6e0] sm:$0xff] %v489_v28  ;;  %492 = vst [vmem:[#allocation2 + $0x6e8] sm:$0xff] %v491_v29  ;;  %v495_v31 = vld [vmem:[%s6541_s3 + $0x6f8] sm:$0xff]  ;;  %v497_v32 = vld [vmem:[%s6541_s3 + $0x700] sm:$0xff] }
  0x71   :  { %494 = vst [vmem:[#allocation2 + $0x6f0] sm:$0xff] %v493_v30  ;;  %496 = vst [vmem:[#allocation2 + $0x6f8] sm:$0xff] %v495_v31  ;;  %v499_v33 = vld [vmem:[%s6541_s3 + $0x708] sm:$0xff]  ;;  %v501_v34 = vld [vmem:[%s6541_s3 + $0x710] sm:$0xff] }
  0x72   :  { %498 = vst [vmem:[#allocation2 + $0x700] sm:$0xff] %v497_v32  ;;  %v503_v35 = vld [vmem:[%s6541_s3 + $0x718] sm:$0xff]  ;;  %500 = vst [vmem:[#allocation2 + $0x708] sm:$0xff] %v499_v33  ;;  %v505_v36 = vld [vmem:[%s6541_s3 + $0x720] sm:$0xff] }
  0x73   :  { %502 = vst [vmem:[#allocation2 + $0x710] sm:$0xff] %v501_v34  ;;  %504 = vst [vmem:[#allocation2 + $0x718] sm:$0xff] %v503_v35  ;;  %v507_v37 = vld [vmem:[%s6541_s3 + $0x728] sm:$0xff]  ;;  %v509_v38 = vld [vmem:[%s6541_s3 + $0x730] sm:$0xff] }
  0x74   :  { %506 = vst [vmem:[#allocation2 + $0x720] sm:$0xff] %v505_v36  ;;  %508 = vst [vmem:[#allocation2 + $0x728] sm:$0xff] %v507_v37  ;;  %v511_v39 = vld [vmem:[%s6541_s3 + $0x738] sm:$0xff]  ;;  %v513_v40 = vld [vmem:[%s6541_s3 + $0x740] sm:$0xff] }
  0x75   :  { %510 = vst [vmem:[#allocation2 + $0x730] sm:$0xff] %v509_v38  ;;  %v515_v41 = vld [vmem:[%s6541_s3 + $0x748] sm:$0xff]  ;;  %512 = vst [vmem:[#allocation2 + $0x738] sm:$0xff] %v511_v39  ;;  %v517_v42 = vld [vmem:[%s6541_s3 + $0x750] sm:$0xff] }
  0x76   :  { %514 = vst [vmem:[#allocation2 + $0x740] sm:$0xff] %v513_v40  ;;  %516 = vst [vmem:[#allocation2 + $0x748] sm:$0xff] %v515_v41  ;;  %v519_v43 = vld [vmem:[%s6541_s3 + $0x758] sm:$0xff]  ;;  %v521_v44 = vld [vmem:[%s6541_s3 + $0x760] sm:$0xff] }
  0x77   :  { %518 = vst [vmem:[#allocation2 + $0x750] sm:$0xff] %v517_v42  ;;  %520 = vst [vmem:[#allocation2 + $0x758] sm:$0xff] %v519_v43  ;;  %v523_v45 = vld [vmem:[%s6541_s3 + $0x768] sm:$0xff]  ;;  %v525_v46 = vld [vmem:[%s6541_s3 + $0x770] sm:$0xff] }
  0x78   :  { %522 = vst [vmem:[#allocation2 + $0x760] sm:$0xff] %v521_v44  ;;  %v527_v47 = vld [vmem:[%s6541_s3 + $0x778] sm:$0xff]  ;;  %524 = vst [vmem:[#allocation2 + $0x768] sm:$0xff] %v523_v45  ;;  %v529_v48 = vld [vmem:[%s6541_s3 + $0x780] sm:$0xff] }
  0x79   :  { %526 = vst [vmem:[#allocation2 + $0x770] sm:$0xff] %v525_v46  ;;  %528 = vst [vmem:[#allocation2 + $0x778] sm:$0xff] %v527_v47  ;;  %v531_v49 = vld [vmem:[%s6541_s3 + $0x788] sm:$0xff]  ;;  %v533_v50 = vld [vmem:[%s6541_s3 + $0x790] sm:$0xff] }
  0x7a   :  { %530 = vst [vmem:[#allocation2 + $0x780] sm:$0xff] %v529_v48  ;;  %532 = vst [vmem:[#allocation2 + $0x788] sm:$0xff] %v531_v49  ;;  %v535_v51 = vld [vmem:[%s6541_s3 + $0x798] sm:$0xff]  ;;  %v537_v52 = vld [vmem:[%s6541_s3 + $0x7a0] sm:$0xff] }
  0x7b   :  { %534 = vst [vmem:[#allocation2 + $0x790] sm:$0xff] %v533_v50  ;;  %v539_v53 = vld [vmem:[%s6541_s3 + $0x7a8] sm:$0xff]  ;;  %536 = vst [vmem:[#allocation2 + $0x798] sm:$0xff] %v535_v51  ;;  %v541_v54 = vld [vmem:[%s6541_s3 + $0x7b0] sm:$0xff] }
  0x7c   :  { %538 = vst [vmem:[#allocation2 + $0x7a0] sm:$0xff] %v537_v52  ;;  %540 = vst [vmem:[#allocation2 + $0x7a8] sm:$0xff] %v539_v53  ;;  %v543_v55 = vld [vmem:[%s6541_s3 + $0x7b8] sm:$0xff]  ;;  %v545_v56 = vld [vmem:[%s6541_s3 + $0x7c0] sm:$0xff] }
  0x7d   :  { %542 = vst [vmem:[#allocation2 + $0x7b0] sm:$0xff] %v541_v54  ;;  %544 = vst [vmem:[#allocation2 + $0x7b8] sm:$0xff] %v543_v55  ;;  %v547_v57 = vld [vmem:[%s6541_s3 + $0x7c8] sm:$0xff]  ;;  %v549_v58 = vld [vmem:[%s6541_s3 + $0x7d0] sm:$0xff] }
  0x7e   :  { %546 = vst [vmem:[#allocation2 + $0x7c0] sm:$0xff] %v545_v56  ;;  %v551_v59 = vld [vmem:[%s6541_s3 + $0x7d8] sm:$0xff]  ;;  %548 = vst [vmem:[#allocation2 + $0x7c8] sm:$0xff] %v547_v57  ;;  %v553_v60 = vld [vmem:[%s6541_s3 + $0x7e0] sm:$0xff] }
  0x7f   :  { %550 = vst [vmem:[#allocation2 + $0x7d0] sm:$0xff] %v549_v58  ;;  %552 = vst [vmem:[#allocation2 + $0x7d8] sm:$0xff] %v551_v59  ;;  %v555_v61 = vld [vmem:[%s6541_s3 + $0x7e8] sm:$0xff]  ;;  %v557_v62 = vld [vmem:[%s6541_s3 + $0x7f0] sm:$0xff] }
  0x80   :  { %554 = vst [vmem:[#allocation2 + $0x7e0] sm:$0xff] %v553_v60  ;;  %556 = vst [vmem:[#allocation2 + $0x7e8] sm:$0xff] %v555_v61  ;;  %v559_v63 = vld [vmem:[%s6541_s3 + $0x7f8] sm:$0xff] }
  0x81   :  { %558 = vst [vmem:[#allocation2 + $0x7f0] sm:$0xff] %v557_v62  ;;  %560 = vst [vmem:[#allocation2 + $0x7f8] sm:$0xff] %v559_v63 }
  0x82   :  { %568 = vsyncadd [#allocation3], 32768  ;;  %v662_v0 = vld [vmem:[%s6539_s1 + $0x1e8] sm:$0xff]  ;;  %v664_v1 = vld [vmem:[%s6539_s1 + $0x1f8] sm:$0xff]  ;;  %vm703_vm0 = vcmask 261120  }
  0x83   :  { %752 = vmatprep.subr.mxu0 %v662_v0  ;;  %913 = vmatprep.subr.mxu1 %v664_v1  ;;  %v661_v2 = vld [vmem:[%s6539_s1 + $0x1e0] sm:$0xff]  ;;  %v663_v3 = vld [vmem:[%s6539_s1 + $0x1f0] sm:$0xff]  ;;  %v658_v4 = vld [vmem:[%s6539_s1 + $0x1c8] sm:$0xff] }
  0x84   :  { %753 = vmatpush1.msra.mxu0 %v661_v2  ;;  %914 = vmatpush1.msra.mxu1 %v663_v3  ;;  %v660_v5 = vld [vmem:[%s6539_s1 + $0x1d8] sm:$0xff]  ;;  %v657_v6 = vld [vmem:[%s6539_s1 + $0x1c0] sm:$0xff]  ;;  %v659_v7 = vld [vmem:[%s6539_s1 + $0x1d0] sm:$0xff] }
  0x85   :  { %754 = vmatprep.subr.mxu0 %v658_v4  ;;  %915 = vmatprep.subr.mxu1 %v660_v5  ;;  %v654_v8 = vld [vmem:[%s6539_s1 + $0x1a8] sm:$0xff]  ;;  %v656_v9 = vld [vmem:[%s6539_s1 + $0x1b8] sm:$0xff]  ;;  %v653_v10 = vld [vmem:[%s6539_s1 + $0x1a0] sm:$0xff] }
  0x86   :  { %755 = vmatpush1.msra.mxu0 %v657_v6  ;;  %916 = vmatpush1.msra.mxu1 %v659_v7  ;;  %v655_v11 = vld [vmem:[%s6539_s1 + $0x1b0] sm:$0xff]  ;;  %v650_v12 = vld [vmem:[%s6539_s1 + $0x188] sm:$0xff]  ;;  %v652_v13 = vld [vmem:[%s6539_s1 + $0x198] sm:$0xff] }
  0x87   :  { %756 = vmatprep.subr.mxu0 %v654_v8  ;;  %917 = vmatprep.subr.mxu1 %v656_v9  ;;  %v649_v14 = vld [vmem:[%s6539_s1 + $0x180] sm:$0xff]  ;;  %v651_v15 = vld [vmem:[%s6539_s1 + $0x190] sm:$0xff]  ;;  %v646_v16 = vld [vmem:[%s6539_s1 + $0x168] sm:$0xff] }
  0x88   :  { %757 = vmatpush1.msra.mxu0 %v653_v10  ;;  %918 = vmatpush1.msra.mxu1 %v655_v11  ;;  %v648_v17 = vld [vmem:[%s6539_s1 + $0x178] sm:$0xff]  ;;  %v645_v18 = vld [vmem:[%s6539_s1 + $0x160] sm:$0xff]  ;;  %v647_v19 = vld [vmem:[%s6539_s1 + $0x170] sm:$0xff] }
  0x89   :  { %758 = vmatprep.subr.mxu0 %v650_v12  ;;  %919 = vmatprep.subr.mxu1 %v652_v13  ;;  %v642_v20 = vld [vmem:[%s6539_s1 + $0x148] sm:$0xff]  ;;  %v644_v21 = vld [vmem:[%s6539_s1 + $0x158] sm:$0xff]  ;;  %v641_v22 = vld [vmem:[%s6539_s1 + $0x140] sm:$0xff] }
  0x8a   :  { %759 = vmatpush1.msra.mxu0 %v649_v14  ;;  %920 = vmatpush1.msra.mxu1 %v651_v15  ;;  %v643_v23 = vld [vmem:[%s6539_s1 + $0x150] sm:$0xff]  ;;  %v638_v24 = vld [vmem:[%s6539_s1 + $0x128] sm:$0xff]  ;;  %v640_v25 = vld [vmem:[%s6539_s1 + $0x138] sm:$0xff] }
  0x8b   :  { %760 = vmatprep.subr.mxu0 %v646_v16  ;;  %921 = vmatprep.subr.mxu1 %v648_v17  ;;  %v637_v26 = vld [vmem:[%s6539_s1 + $0x120] sm:$0xff]  ;;  %v639_v27 = vld [vmem:[%s6539_s1 + $0x130] sm:$0xff]  ;;  %v634_v28 = vld [vmem:[%s6539_s1 + $0x108] sm:$0xff] }
  0x8c   :  { %761 = vmatpush1.msra.mxu0 %v645_v18  ;;  %922 = vmatpush1.msra.mxu1 %v647_v19  ;;  %v636_v29 = vld [vmem:[%s6539_s1 + $0x118] sm:$0xff]  ;;  %v633_v30 = vld [vmem:[%s6539_s1 + $0x100] sm:$0xff]  ;;  %v635_v31 = vld [vmem:[%s6539_s1 + $0x110] sm:$0xff] }
  0x8d   :  { %762 = vmatprep.subr.mxu0 %v642_v20  ;;  %923 = vmatprep.subr.mxu1 %v644_v21  ;;  %v630_v32 = vld [vmem:[%s6539_s1 + $0xe8] sm:$0xff]  ;;  %v632_v33 = vld [vmem:[%s6539_s1 + $0xf8] sm:$0xff]  ;;  %v629_v34 = vld [vmem:[%s6539_s1 + $0xe0] sm:$0xff] }
  0x8e   :  { %763 = vmatpush1.msra.mxu0 %v641_v22  ;;  %924 = vmatpush1.msra.mxu1 %v643_v23  ;;  %v631_v35 = vld [vmem:[%s6539_s1 + $0xf0] sm:$0xff]  ;;  %v626_v36 = vld [vmem:[%s6539_s1 + $0xc8] sm:$0xff]  ;;  %v628_v37 = vld [vmem:[%s6539_s1 + $0xd8] sm:$0xff] }
  0x8f   :  { %764 = vmatprep.subr.mxu0 %v638_v24  ;;  %925 = vmatprep.subr.mxu1 %v640_v25  ;;  %v625_v38 = vld [vmem:[%s6539_s1 + $0xc0] sm:$0xff]  ;;  %v627_v39 = vld [vmem:[%s6539_s1 + $0xd0] sm:$0xff]  ;;  %v622_v40 = vld [vmem:[%s6539_s1 + $0xa8] sm:$0xff] }
  0x90   :  { %765 = vmatpush1.msra.mxu0 %v637_v26  ;;  %926 = vmatpush1.msra.mxu1 %v639_v27  ;;  %v624_v41 = vld [vmem:[%s6539_s1 + $0xb8] sm:$0xff]  ;;  %v621_v42 = vld [vmem:[%s6539_s1 + $0xa0] sm:$0xff]  ;;  %v623_v43 = vld [vmem:[%s6539_s1 + $0xb0] sm:$0xff] }
  0x91   :  { %766 = vmatprep.subr.mxu0 %v634_v28  ;;  %927 = vmatprep.subr.mxu1 %v636_v29  ;;  %v618_v44 = vld [vmem:[%s6539_s1 + $0x88] sm:$0xff]  ;;  %v620_v45 = vld [vmem:[%s6539_s1 + $0x98] sm:$0xff]  ;;  %v617_v46 = vld [vmem:[%s6539_s1 + $0x80] sm:$0xff] }
  0x92   :  { %767 = vmatpush1.msra.mxu0 %v633_v30  ;;  %928 = vmatpush1.msra.mxu1 %v635_v31  ;;  %v619_v47 = vld [vmem:[%s6539_s1 + $0x90] sm:$0xff]  ;;  %v614_v48 = vld [vmem:[%s6539_s1 + $0x68] sm:$0xff]  ;;  %v616_v49 = vld [vmem:[%s6539_s1 + $0x78] sm:$0xff] }
  0x93   :  { %768 = vmatprep.subr.mxu0 %v630_v32  ;;  %929 = vmatprep.subr.mxu1 %v632_v33  ;;  %v613_v50 = vld [vmem:[%s6539_s1 + $0x60] sm:$0xff]  ;;  %v615_v51 = vld [vmem:[%s6539_s1 + $0x70] sm:$0xff]  ;;  %v610_v52 = vld [vmem:[%s6539_s1 + $0x48] sm:$0xff] }
  0x94   :  { %769 = vmatpush1.msra.mxu0 %v629_v34  ;;  %930 = vmatpush1.msra.mxu1 %v631_v35  ;;  %v612_v53 = vld [vmem:[%s6539_s1 + $0x58] sm:$0xff]  ;;  %v609_v54 = vld [vmem:[%s6539_s1 + $0x40] sm:$0xff]  ;;  %v611_v55 = vld [vmem:[%s6539_s1 + $0x50] sm:$0xff] }
  0x95   :  { %770 = vmatprep.subr.mxu0 %v626_v36  ;;  %931 = vmatprep.subr.mxu1 %v628_v37  ;;  %v606_v56 = vld [vmem:[%s6539_s1 + $0x28] sm:$0xff]  ;;  %v608_v57 = vld [vmem:[%s6539_s1 + $0x38] sm:$0xff]  ;;  %v605_v58 = vld [vmem:[%s6539_s1 + $0x20] sm:$0xff] }
  0x96   :  { %771 = vmatpush1.msra.mxu0 %v625_v38  ;;  %932 = vmatpush1.msra.mxu1 %v627_v39  ;;  %v607_v59 = vld [vmem:[%s6539_s1 + $0x30] sm:$0xff]  ;;  %v602_v60 = vld [vmem:[%s6539_s1 + $0x8] sm:$0xff]  ;;  %v604_v61 = vld [vmem:[%s6539_s1 + $0x18] sm:$0xff] }
  0x97   :  { %772 = vmatprep.subr.mxu0 %v622_v40  ;;  %933 = vmatprep.subr.mxu1 %v624_v41  ;;  %v601_v62 = vld [vmem:[%s6539_s1] sm:$0xff]  ;;  %v603_v63 = vld [vmem:[%s6539_s1 + $0x10] sm:$0xff]  ;;  %v678_v0 = vld [vmem:[%s6539_s1 + $0x268] sm:$0xff] }
  0x98   :  { %773 = vmatpush1.msra.mxu0 %v621_v42  ;;  %934 = vmatpush1.msra.mxu1 %v623_v43  ;;  %v680_v1 = vld [vmem:[%s6539_s1 + $0x278] sm:$0xff]  ;;  %v677_v2 = vld [vmem:[%s6539_s1 + $0x260] sm:$0xff]  ;;  %v679_v3 = vld [vmem:[%s6539_s1 + $0x270] sm:$0xff] }
  0x99   :  { %774 = vmatprep.subr.mxu0 %v618_v44  ;;  %935 = vmatprep.subr.mxu1 %v620_v45  ;;  %v674_v4 = vld [vmem:[%s6539_s1 + $0x248] sm:$0xff]  ;;  %v676_v5 = vld [vmem:[%s6539_s1 + $0x258] sm:$0xff]  ;;  %v673_v6 = vld [vmem:[%s6539_s1 + $0x240] sm:$0xff] }
  0x9a   :  { %775 = vmatpush1.msra.mxu0 %v617_v46  ;;  %936 = vmatpush1.msra.mxu1 %v619_v47  ;;  %v675_v7 = vld [vmem:[%s6539_s1 + $0x250] sm:$0xff]  ;;  %v670_v8 = vld [vmem:[%s6539_s1 + $0x228] sm:$0xff]  ;;  %v672_v9 = vld [vmem:[%s6539_s1 + $0x238] sm:$0xff] }
  0x9b   :  { %776 = vmatprep.subr.mxu0 %v614_v48  ;;  %937 = vmatprep.subr.mxu1 %v616_v49  ;;  %v669_v10 = vld [vmem:[%s6539_s1 + $0x220] sm:$0xff]  ;;  %v671_v11 = vld [vmem:[%s6539_s1 + $0x230] sm:$0xff]  ;;  %v666_v12 = vld [vmem:[%s6539_s1 + $0x208] sm:$0xff] }
  0x9c   :  { %777 = vmatpush1.msra.mxu0 %v613_v50  ;;  %938 = vmatpush1.msra.mxu1 %v615_v51  ;;  %v668_v13 = vld [vmem:[%s6539_s1 + $0x218] sm:$0xff]  ;;  %v665_v14 = vld [vmem:[%s6539_s1 + $0x200] sm:$0xff]  ;;  %v570_v15 = vld [vmem:[%s6538_s0 + $0x8] sm:$0xff] }
  0x9d   :  { %778 = vmatprep.subr.mxu0 %v610_v52  ;;  %939 = vmatprep.subr.mxu1 %v612_v53  ;;  %v667_v16 = vld [vmem:[%s6539_s1 + $0x210] sm:$0xff]  ;;  %v569_v17 = vld [vmem:[%s6538_s0] sm:$0xff]  ;;  %v572_v18 = vld [vmem:[%s6538_s0 + $0x18] sm:$0xff] }
  0x9e   :  { %779 = vmatpush1.msra.mxu0 %v609_v54  ;;  %940 = vmatpush1.msra.mxu1 %v611_v55  ;;  %v571_v19 = vld [vmem:[%s6538_s0 + $0x10] sm:$0xff]  ;;  %v574_v20 = vld [vmem:[%s6538_s0 + $0x28] sm:$0xff]  ;;  %v573_v21 = vld [vmem:[%s6538_s0 + $0x20] sm:$0xff] }
  0x9f   :  { %780 = vmatprep.subr.mxu0 %v606_v56  ;;  %941 = vmatprep.subr.mxu1 %v608_v57  ;;  %v576_v22 = vld [vmem:[%s6538_s0 + $0x38] sm:$0xff]  ;;  %v575_v23 = vld [vmem:[%s6538_s0 + $0x30] sm:$0xff]  ;;  %v578_v24 = vld [vmem:[%s6538_s0 + $0x48] sm:$0xff] }
  0xa0   :  { %781 = vmatpush1.msra.mxu0 %v605_v58  ;;  %942 = vmatpush1.msra.mxu1 %v607_v59  ;;  %v577_v25 = vld [vmem:[%s6538_s0 + $0x40] sm:$0xff]  ;;  %v580_v26 = vld [vmem:[%s6538_s0 + $0x58] sm:$0xff]  ;;  %v579_v27 = vld [vmem:[%s6538_s0 + $0x50] sm:$0xff]  ;;  %v683_v58 = vlaneseq }
  0xa1   :  { %782 = vmatprep.subr.mxu0 %v602_v60  ;;  %943 = vmatprep.subr.mxu1 %v604_v61  ;;  %v582_v28 = vld [vmem:[%s6538_s0 + $0x68] sm:$0xff]  ;;  %v581_v29 = vld [vmem:[%s6538_s0 + $0x60] sm:$0xff]  ;;  %v584_v30 = vld [vmem:[%s6538_s0 + $0x78] sm:$0xff] }
  0xa2   :  { %783 = vmatpush1.msra.mxu0 %v601_v62  ;;  %944 = vmatpush1.msra.mxu1 %v603_v63  ;;  %v583_v31 = vld [vmem:[%s6538_s0 + $0x70] sm:$0xff]  ;;  %v586_v32 = vld [vmem:[%s6538_s0 + $0x88] sm:$0xff]  ;;  %v585_v33 = vld [vmem:[%s6538_s0 + $0x80] sm:$0xff]  ;;  %v684_v63 = vshrl.u32 %v683_v58, 7 }
  0xa3   :  { %808 = vmatprep.subr.mxu0 %v678_v0  ;;  %969 = vmatprep.subr.mxu1 %v680_v1  ;;  %v588_v34 = vld [vmem:[%s6538_s0 + $0x98] sm:$0xff]  ;;  %v587_v35 = vld [vmem:[%s6538_s0 + $0x90] sm:$0xff]  ;;  %v590_v36 = vld [vmem:[%s6538_s0 + $0xa8] sm:$0xff] }
  0xa4   :  { %809 = vmatpush2.msra.mxu0 %v677_v2  ;;  %970 = vmatpush2.msra.mxu1 %v679_v3  ;;  %v589_v37 = vld [vmem:[%s6538_s0 + $0xa0] sm:$0xff]  ;;  %v592_v38 = vld [vmem:[%s6538_s0 + $0xb8] sm:$0xff]  ;;  %v591_v39 = vld [vmem:[%s6538_s0 + $0xb0] sm:$0xff] }
  0xa5   :  { %810 = vmatprep.subr.mxu0 %v674_v4  ;;  %971 = vmatprep.subr.mxu1 %v676_v5  ;;  %v594_v40 = vld [vmem:[%s6538_s0 + $0xc8] sm:$0xff]  ;;  %v593_v41 = vld [vmem:[%s6538_s0 + $0xc0] sm:$0xff]  ;;  %v596_v42 = vld [vmem:[%s6538_s0 + $0xd8] sm:$0xff]  ;;  %v685_v4 = vsub.s32 0, %v684_v63  ;;  %v693_v5 = vsub.s32 2, %v684_v63 }
  0xa6   :  { %811 = vmatpush2.msra.mxu0 %v673_v6  ;;  %972 = vmatpush2.msra.mxu1 %v675_v7  ;;  %v595_v43 = vld [vmem:[%s6538_s0 + $0xd0] sm:$0xff]  ;;  %v598_v44 = vld [vmem:[%s6538_s0 + $0xe8] sm:$0xff]  ;;  %v597_v45 = vld [vmem:[%s6538_s0 + $0xe0] sm:$0xff]  ;;  %v689_v7 = vsub.s32 1, %v684_v63 }
  0xa7   :  { %812 = vmatprep.subr.mxu0 %v670_v8  ;;  %973 = vmatprep.subr.mxu1 %v672_v9  ;;  %v600_v46 = vld [vmem:[%s6538_s0 + $0xf8] sm:$0xff]  ;;  %v599_v47 = vld [vmem:[%s6538_s0 + $0xf0] sm:$0xff]  ;;  %v697_v8 = vsub.s32 3, %v684_v63 }
  0xa8   :  { %813 = vmatpush2.msra.mxu0 %v669_v10  ;;  %974 = vmatpush2.msra.mxu1 %v671_v11  ;;  %v681_v6 = vld [vmem:[%s6540_s2] ss:$8 sm:$0xf] }
  0xa9   :  { %814 = vmatprep.subr.mxu0 %v666_v12  ;;  %975 = vmatprep.subr.mxu1 %v668_v13  ;;  %v6179_v13 = vrot.slane %v681_v6, %v685_v4 }
  0xaa   :  { %815 = vmatpush2.msra.mxu0 %v665_v14  ;;  %4062 = vmatprep.mubr.msk.f32.mxu0 %vm703_vm0, %v570_v15  ;;  %v6181_v14 = vrot.slane %v681_v6, %v693_v5 }
  0xab   :  { %976 = vmatpush2.msra.mxu1 %v667_v16  ;;  %4078 = vmatprep.mubr.msk.f32.mxu1 %vm703_vm0, %v570_v15  ;;  %v6183_v15 = vrot.slane %v681_v6, %v689_v7  ;;  %v6185_v16 = vrot.slane %v681_v6, %v697_v8 }
  0xac   :  { %817 = vmatmul.mubr.f32.vlgmr.msra.gmra.mxu0 %v569_v17  ;;  %978 = vmatmul.mubr.f32.vlgmr.msra.gmra.mxu1 %v569_v17 }
  0xad   :  { %4063 = vmatprep.mubr.msk.f32.mxu0 %vm703_vm0, %v572_v18  ;;  %4079 = vmatprep.mubr.msk.f32.mxu1 %vm703_vm0, %v572_v18 }
  0xb0   :  { %823 = vmatmul.mubr.f32.gmra.mxu0 %v571_v19  ;;  %984 = vmatmul.mubr.f32.gmra.mxu1 %v571_v19 }
  0xb1   :  { %4064 = vmatprep.mubr.msk.f32.mxu0 %vm703_vm0, %v574_v20  ;;  %4080 = vmatprep.mubr.msk.f32.mxu1 %vm703_vm0, %v574_v20 }
  0xb4   :  { %829 = vmatmul.mubr.f32.gmra.mxu0 %v573_v21  ;;  %990 = vmatmul.mubr.f32.gmra.mxu1 %v573_v21 }
  0xb5   :  { %4065 = vmatprep.mubr.msk.f32.mxu0 %vm703_vm0, %v576_v22  ;;  %4081 = vmatprep.mubr.msk.f32.mxu1 %vm703_vm0, %v576_v22 }
  0xb8   :  { %835 = vmatmul.mubr.f32.gmra.mxu0 %v575_v23  ;;  %996 = vmatmul.mubr.f32.gmra.mxu1 %v575_v23 }
  0xb9   :  { %4066 = vmatprep.mubr.msk.f32.mxu0 %vm703_vm0, %v578_v24  ;;  %4082 = vmatprep.mubr.msk.f32.mxu1 %vm703_vm0, %v578_v24 }
  0xbc   :  { %841 = vmatmul.mubr.f32.gmra.mxu0 %v577_v25  ;;  %1002 = vmatmul.mubr.f32.gmra.mxu1 %v577_v25 }
  0xbd   :  { %4067 = vmatprep.mubr.msk.f32.mxu0 %vm703_vm0, %v580_v26  ;;  %4083 = vmatprep.mubr.msk.f32.mxu1 %vm703_vm0, %v580_v26 }
  0xc0   :  { %847 = vmatmul.mubr.f32.gmra.mxu0 %v579_v27  ;;  %1008 = vmatmul.mubr.f32.gmra.mxu1 %v579_v27 }
  0xc1   :  { %4068 = vmatprep.mubr.msk.f32.mxu0 %vm703_vm0, %v582_v28  ;;  %4084 = vmatprep.mubr.msk.f32.mxu1 %vm703_vm0, %v582_v28 }
  0xc4   :  { %853 = vmatmul.mubr.f32.gmra.mxu0 %v581_v29  ;;  %1014 = vmatmul.mubr.f32.gmra.mxu1 %v581_v29 }
  0xc5   :  { %4069 = vmatprep.mubr.msk.f32.mxu0 %vm703_vm0, %v584_v30  ;;  %4085 = vmatprep.mubr.msk.f32.mxu1 %vm703_vm0, %v584_v30 }
  0xc8   :  { %859 = vmatmul.mubr.f32.gmra.mxu0 %v583_v31  ;;  %1020 = vmatmul.mubr.f32.gmra.mxu1 %v583_v31 }
  0xc9   :  { %4070 = vmatprep.mubr.msk.f32.mxu0 %vm703_vm0, %v586_v32  ;;  %4086 = vmatprep.mubr.msk.f32.mxu1 %vm703_vm0, %v586_v32 }
  0xcc   :  { %865 = vmatmul.mubr.f32.gmra.mxu0 %v585_v33  ;;  %1026 = vmatmul.mubr.f32.gmra.mxu1 %v585_v33 }
  0xcd   :  { %4071 = vmatprep.mubr.msk.f32.mxu0 %vm703_vm0, %v588_v34  ;;  %4087 = vmatprep.mubr.msk.f32.mxu1 %vm703_vm0, %v588_v34 }
  0xd0   :  { %871 = vmatmul.mubr.f32.gmra.mxu0 %v587_v35  ;;  %1032 = vmatmul.mubr.f32.gmra.mxu1 %v587_v35 }
  0xd1   :  { %4072 = vmatprep.mubr.msk.f32.mxu0 %vm703_vm0, %v590_v36  ;;  %4088 = vmatprep.mubr.msk.f32.mxu1 %vm703_vm0, %v590_v36 }
  0xd4   :  { %877 = vmatmul.mubr.f32.gmra.mxu0 %v589_v37  ;;  %1038 = vmatmul.mubr.f32.gmra.mxu1 %v589_v37 }
  0xd5   :  { %4073 = vmatprep.mubr.msk.f32.mxu0 %vm703_vm0, %v592_v38  ;;  %4089 = vmatprep.mubr.msk.f32.mxu1 %vm703_vm0, %v592_v38 }
  0xd8   :  { %883 = vmatmul.mubr.f32.gmra.mxu0 %v591_v39  ;;  %1044 = vmatmul.mubr.f32.gmra.mxu1 %v591_v39 }
  0xd9   :  { %4074 = vmatprep.mubr.msk.f32.mxu0 %vm703_vm0, %v594_v40  ;;  %4090 = vmatprep.mubr.msk.f32.mxu1 %vm703_vm0, %v594_v40 }
  0xdc   :  { %889 = vmatmul.mubr.f32.gmra.mxu0 %v593_v41  ;;  %1050 = vmatmul.mubr.f32.gmra.mxu1 %v593_v41 }
  0xdd   :  { %4075 = vmatprep.mubr.msk.f32.mxu0 %vm703_vm0, %v596_v42  ;;  %4091 = vmatprep.mubr.msk.f32.mxu1 %vm703_vm0, %v596_v42 }
  0xe0   :  { %895 = vmatmul.mubr.f32.gmra.mxu0 %v595_v43  ;;  %1056 = vmatmul.mubr.f32.gmra.mxu1 %v595_v43 }
  0xe1   :  { %4076 = vmatprep.mubr.msk.f32.mxu0 %vm703_vm0, %v598_v44  ;;  %4092 = vmatprep.mubr.msk.f32.mxu1 %vm703_vm0, %v598_v44 }
  0xe4   :  { %901 = vmatmul.mubr.f32.gmra.mxu0 %v597_v45  ;;  %1062 = vmatmul.mubr.f32.gmra.mxu1 %v597_v45 }
  0xe5   :  { %4077 = vmatprep.mubr.msk.f32.mxu0 %vm703_vm0, %v600_v46  ;;  %4093 = vmatprep.mubr.msk.f32.mxu1 %vm703_vm0, %v600_v46 }
  0xe8   :  { %907 = vmatmul.mubr.f32.gmra.mxu0 %v599_v47  ;;  %1068 = vmatmul.mubr.f32.gmra.mxu1 %v599_v47 }
 0x16c   :  { %v818_v48 = vpop.f32.mrf.mxu0  ;;  %v979_v49 = vpop.f32.mrf.mxu1 }
 0x16d   :  { %v819_v21 = vadd.f32 %v818_v48, %v6179_v13  ;;  %v980_v22 = vadd.f32 %v979_v49, %v6181_v14 }
 0x16e   :  { %v820_v50 = vpop.f32.mrf.mxu0  ;;  %v981_v51 = vpop.f32.mrf.mxu1 }
 0x16f   :  { %v6198_v23 = vadd.f32 %v820_v50, %v6183_v15  ;;  %v6201_v24 = vadd.f32 %v981_v51, %v6185_v16  ;;  %v1074_v35 = vmax.f32 %v819_v21, 0.0  ;;  %v1076_v36 = vmax.f32 %v980_v22, 0.0 }
 0x170   :  { %v824_v52 = vpop.f32.mrf.mxu0  ;;  %v985_v53 = vpop.f32.mrf.mxu1 }
 0x171   :  { %v6208_v27 = vadd.f32 %v824_v52, %v6179_v13  ;;  %v6211_v28 = vadd.f32 %v985_v53, %v6181_v14  ;;  %v1075_v39 = vmax.f32 %v6198_v23, 0.0  ;;  %v1077_v40 = vmax.f32 %v6201_v24, 0.0 }
 0x172   :  { %v826_v54 = vpop.f32.mrf.mxu0  ;;  %v987_v55 = vpop.f32.mrf.mxu1 }
 0x173   :  { %v6214_v29 = vadd.f32 %v826_v54, %v6183_v15  ;;  %v6217_v30 = vadd.f32 %v987_v55, %v6185_v16  ;;  %v1078_v45 = vmax.f32 %v6208_v27, 0.0  ;;  %v1080_v46 = vmax.f32 %v6211_v28, 0.0 }
 0x174   :  { %v830_v56 = vpop.f32.mrf.mxu0  ;;  %v991_v57 = vpop.f32.mrf.mxu1 }
 0x175   :  { %v6220_v31 = vadd.f32 %v830_v56, %v6179_v13  ;;  %v6223_v32 = vadd.f32 %v991_v57, %v6181_v14  ;;  %v1079_v47 = vmax.f32 %v6214_v29, 0.0  ;;  %v1081_v48 = vmax.f32 %v6217_v30, 0.0 }
 0x176   :  { %v832_v59 = vpop.f32.mrf.mxu0  ;;  %v993_v60 = vpop.f32.mrf.mxu1 }
 0x177   :  { %v6230_v37 = vadd.f32 %v832_v59, %v6183_v15  ;;  %v6233_v38 = vadd.f32 %v993_v60, %v6185_v16  ;;  %v1082_v49 = vmax.f32 %v6220_v31, 0.0  ;;  %v1084_v50 = vmax.f32 %v6223_v32, 0.0 }
 0x178   :  { %v836_v61 = vpop.f32.mrf.mxu0  ;;  %v997_v62 = vpop.f32.mrf.mxu1 }
 0x179   :  { %v6238_v41 = vadd.f32 %v836_v61, %v6179_v13  ;;  %v6241_v42 = vadd.f32 %v997_v62, %v6181_v14  ;;  %v1083_v55 = vmax.f32 %v6230_v37, 0.0  ;;  %v1085_v56 = vmax.f32 %v6233_v38, 0.0 }
 0x17a   :  { %v838_v0 = vpop.f32.mrf.mxu0  ;;  %v999_v1 = vpop.f32.mrf.mxu1 }
 0x17b   :  { %v6254_v51 = vadd.f32 %v838_v0, %v6183_v15  ;;  %v6257_v52 = vadd.f32 %v999_v1, %v6185_v16  ;;  %v1086_v59 = vmax.f32 %v6238_v41, 0.0  ;;  %v1088_v60 = vmax.f32 %v6241_v42, 0.0 }
 0x17c   :  { %v842_v2 = vpop.f32.mrf.mxu0  ;;  %v1003_v3 = vpop.f32.mrf.mxu1 }
 0x17d   :  { %v6266_v61 = vadd.f32 %v842_v2, %v6179_v13  ;;  %v6269_v62 = vadd.f32 %v1003_v3, %v6181_v14  ;;  %v1087_v7 = vmax.f32 %v6254_v51, 0.0  ;;  %v1089_v8 = vmax.f32 %v6257_v52, 0.0 }
 0x17e   :  { %v844_v9 = vpop.f32.mrf.mxu0  ;;  %v1005_v10 = vpop.f32.mrf.mxu1 }
 0x17f   :  { %v6276_v21 = vadd.f32 %v844_v9, %v6183_v15  ;;  %v6279_v2 = vadd.f32 %v1005_v10, %v6185_v16  ;;  %v1090_v29 = vmax.f32 %v6266_v61, 0.0 }
 0x180   :  { %v6175_v11 = vpop.f32.mrf.mxu0  ;;  %v6177_v12 = vpop.f32.mrf.mxu1 }
 0x182   :  { %v6187_v17 = vpop.f32.mrf.mxu0  ;;  %v6189_v18 = vpop.f32.mrf.mxu1 }
 0x184   :  { %v6191_v19 = vpop.f32.mrf.mxu0  ;;  %v6193_v20 = vpop.f32.mrf.mxu1 }
 0x185   :  { %v855_v37 = vadd.f32 %v6191_v19, %v6179_v13  ;;  %v1016_v38 = vadd.f32 %v6193_v20, %v6181_v14 }
 0x186   :  { %v6203_v25 = vpop.f32.mrf.mxu0  ;;  %v6205_v26 = vpop.f32.mrf.mxu1 }
 0x187   :  { %v857_v20 = vadd.f32 %v6203_v25, %v6183_v15  ;;  %v6543_v25 = vmax.f32 %v6269_v62, 0.0 }
 0x188   :  { %v6225_v33 = vpop.f32.mrf.mxu0  ;;  %v6227_v34 = vpop.f32.mrf.mxu1 }
 0x18a   :  { %v6243_v43 = vpop.f32.mrf.mxu0  ;;  %v6245_v44 = vpop.f32.mrf.mxu1 }
 0x18c   :  { %v866_v53 = vpop.f32.mrf.mxu0  ;;  %v1027_v54 = vpop.f32.mrf.mxu1 }
 0x18d   :  { %v867_v57 = vadd.f32 %v866_v53, %v6179_v13  ;;  %v1028_v58 = vadd.f32 %v1027_v54, %v6181_v14 }
 0x18e   :  { %v868_v63 = vpop.f32.mrf.mxu0  ;;  %v1029_v0 = vpop.f32.mrf.mxu1 }
 0x18f   :  { %v1106_v1 = vmax.f32 %v867_v57, 0.0  ;;  %v1108_v4 = vmax.f32 %v1028_v58, 0.0  ;;  %v869_v5 = vadd.f32 %v868_v63, %v6183_v15  ;;  %v1030_v6 = vadd.f32 %v1029_v0, %v6185_v16 }
 0x190   :  { %v872_v3 = vpop.f32.mrf.mxu0  ;;  %v1033_v22 = vpop.f32.mrf.mxu1  ;;  %v1091_v63 = vmax.f32 %v6276_v21, 0.0  ;;  %v1093_v0 = vmax.f32 %v6279_v2, 0.0 }
 0x191   :  { %v6281_v23 = vmax.f32 %v1074_v35, %v1106_v1  ;;  %v6283_v24 = vmax.f32 %v1076_v36, %v1108_v4  ;;  %v1107_v27 = vmax.f32 %v869_v5, 0.0  ;;  %v1109_v28 = vmax.f32 %v1030_v6, 0.0 }
 0x192   :  { %v873_v53 = vadd.f32 %v872_v3, %v6179_v13  ;;  %v1034_v9 = vadd.f32 %v1033_v22, %v6181_v14  ;;  %v874_v54 = vpop.f32.mrf.mxu0  ;;  %v1035_v57 = vpop.f32.mrf.mxu1 }
 0x193   :  { %v6289_v10 = vmax.f32 %v1075_v39, %v1107_v27  ;;  %v6291_v58 = vmax.f32 %v1077_v40, %v1109_v28  ;;  %v875_v35 = vadd.f32 %v874_v54, %v6183_v15  ;;  %v1036_v36 = vadd.f32 %v1035_v57, %v6185_v16 }
 0x194   :  { %v1110_v1 = vmax.f32 %v873_v53, 0.0  ;;  %v1112_v4 = vmax.f32 %v1034_v9, 0.0  ;;  %v878_v5 = vpop.f32.mrf.mxu0  ;;  %v1039_v6 = vpop.f32.mrf.mxu1  ;;  %v6301_v40 = vadd.f32 %v6175_v11, %v6179_v13  ;;  %v6305_v27 = vadd.f32 %v6177_v12, %v6181_v14 }
 0x195   :  { %v1111_v3 = vmax.f32 %v875_v35, 0.0  ;;  %v1113_v22 = vmax.f32 %v1036_v36, 0.0  ;;  %v879_v30 = vadd.f32 %v878_v5, %v6179_v13  ;;  %v1040_v39 = vadd.f32 %v1039_v6, %v6181_v14 }
 0x196   :  { %v6307_v28 = vmax.f32 %v1078_v45, %v1110_v1  ;;  %v6309_v53 = vmax.f32 %v1080_v46, %v1112_v4  ;;  %v880_v9 = vpop.f32.mrf.mxu0  ;;  %v1041_v54 = vpop.f32.mrf.mxu1  ;;  %v6317_v11 = vadd.f32 %v6187_v17, %v6183_v15  ;;  %v6321_v12 = vadd.f32 %v6189_v18, %v6185_v16 }
 0x197   :  { %v6311_v57 = vmax.f32 %v1079_v47, %v1111_v3  ;;  %v6313_v35 = vmax.f32 %v1081_v48, %v1113_v22  ;;  %v1114_v36 = vmax.f32 %v879_v30, 0.0  ;;  %v1116_v5 = vmax.f32 %v1040_v39, 0.0 }
 0x198   :  { %v881_v45 = vadd.f32 %v880_v9, %v6183_v15  ;;  %v1042_v46 = vadd.f32 %v1041_v54, %v6185_v16  ;;  %v884_v1 = vpop.f32.mrf.mxu0  ;;  %v1045_v4 = vpop.f32.mrf.mxu1  ;;  %v1094_v18 = vmax.f32 %v6301_v40, 0.0  ;;  %v1096_v6 = vmax.f32 %v6305_v27, 0.0 }
 0x199   :  { %v6327_v47 = vmax.f32 %v1082_v49, %v1114_v36  ;;  %v6331_v48 = vmax.f32 %v1084_v50, %v1116_v5  ;;  %v885_v17 = vadd.f32 %v884_v1, %v6179_v13  ;;  %v1046_v30 = vadd.f32 %v1045_v4, %v6181_v14 }
 0x19a   :  { %v1115_v3 = vmax.f32 %v881_v45, 0.0  ;;  %v1117_v22 = vmax.f32 %v1042_v46, 0.0  ;;  %v886_v39 = vpop.f32.mrf.mxu0  ;;  %v1047_v9 = vpop.f32.mrf.mxu1  ;;  %v1095_v50 = vmax.f32 %v6317_v11, 0.0  ;;  %v1097_v36 = vmax.f32 %v6321_v12, 0.0 }
 0x19b   :  { %v1118_v54 = vmax.f32 %v885_v17, 0.0  ;;  %v1120_v31 = vmax.f32 %v1046_v30, 0.0  ;;  %v887_v49 = vadd.f32 %v886_v39, %v6183_v15  ;;  %v1048_v32 = vadd.f32 %v1047_v9, %v6185_v16 }
 0x19c   :  { %v6343_v5 = vmax.f32 %v1083_v55, %v1115_v3  ;;  %v6347_v40 = vmax.f32 %v1085_v56, %v1117_v22  ;;  %v890_v27 = vpop.f32.mrf.mxu0  ;;  %v1051_v45 = vpop.f32.mrf.mxu1  ;;  %v1018_v17 = vadd.f32 %v6205_v26, %v6185_v16  ;;  %v1098_v9 = vmax.f32 %v855_v37, 0.0 }
 0x19d   :  { %v6351_v46 = vmax.f32 %v1086_v59, %v1118_v54  ;;  %v6355_v1 = vmax.f32 %v1088_v60, %v1120_v31  ;;  %v1119_v11 = vmax.f32 %v887_v49, 0.0  ;;  %v1121_v12 = vmax.f32 %v1048_v32, 0.0 }
 0x19e   :  { %v891_v55 = vadd.f32 %v890_v27, %v6179_v13  ;;  %v1052_v56 = vadd.f32 %v1051_v45, %v6181_v14  ;;  %v892_v4 = vpop.f32.mrf.mxu0  ;;  %v1053_v41 = vpop.f32.mrf.mxu1  ;;  %v1100_v54 = vmax.f32 %v1016_v38, 0.0  ;;  %v1099_v37 = vmax.f32 %v857_v20, 0.0 }
 0x19f   :  { %v6365_v59 = vmax.f32 %v1087_v7, %v1119_v11  ;;  %v6369_v42 = vmax.f32 %v1089_v8, %v1121_v12  ;;  %v893_v60 = vadd.f32 %v892_v4, %v6183_v15  ;;  %v1054_v19 = vadd.f32 %v1053_v41, %v6185_v16 }
 0x1a0   :  { %v1122_v30 = vmax.f32 %v891_v55, 0.0  ;;  %v1124_v3 = vmax.f32 %v1052_v56, 0.0  ;;  %v896_v22 = vpop.f32.mrf.mxu0  ;;  %v1057_v51 = vpop.f32.mrf.mxu1  ;;  %v1101_v61 = vmax.f32 %v1018_v17, 0.0 }
 0x1a1   :  { %v1123_v7 = vmax.f32 %v893_v60, 0.0  ;;  %v1125_v39 = vmax.f32 %v1054_v19, 0.0  ;;  %v897_v52 = vadd.f32 %v896_v22, %v6179_v13  ;;  %v1058_v8 = vadd.f32 %v1057_v51, %v6181_v14 }
 0x1a2   :  { %v6381_v31 = vmax.f32 %v1090_v29, %v1122_v30  ;;  %v6385_v49 = vmax.f32 %v6543_v25, %v1124_v3  ;;  %v898_v26 = vpop.f32.mrf.mxu0  ;;  %v1059_v32 = vpop.f32.mrf.mxu1  ;;  %v863_v3 = vadd.f32 %v6243_v43, %v6183_v15  ;;  %v1024_v22 = vadd.f32 %v6245_v44, %v6185_v16 }
 0x1a3   :  { %v6389_v27 = vmax.f32 %v1091_v63, %v1123_v7  ;;  %v6393_v45 = vmax.f32 %v1093_v0, %v1125_v39  ;;  %v1126_v11 = vmax.f32 %v897_v52, 0.0  ;;  %v1128_v12 = vmax.f32 %v1058_v8, 0.0 }
 0x1a4   :  { %v899_v29 = vadd.f32 %v898_v26, %v6183_v15  ;;  %v1060_v62 = vadd.f32 %v1059_v32, %v6185_v16  ;;  %v902_v38 = vpop.f32.mrf.mxu0  ;;  %v1063_v55 = vpop.f32.mrf.mxu1  ;;  %v861_v63 = vadd.f32 %v6225_v33, %v6179_v13  ;;  %v1022_v0 = vadd.f32 %v6227_v34, %v6181_v14 }
 0x1a5   :  { %v6397_v56 = vmax.f32 %v1094_v18, %v1126_v11  ;;  %v6399_v4 = vmax.f32 %v1096_v6, %v1128_v12  ;;  %v903_v21 = vadd.f32 %v902_v38, %v6179_v13  ;;  %v1064_v2 = vadd.f32 %v1063_v55, %v6181_v14 }
 0x1a6   :  { %v1127_v41 = vmax.f32 %v899_v29, 0.0  ;;  %v1129_v60 = vmax.f32 %v1060_v62, 0.0  ;;  %v904_v19 = vpop.f32.mrf.mxu0  ;;  %v1065_v20 = vpop.f32.mrf.mxu1  ;;  %v1104_v29 = vmax.f32 %v1022_v0, 0.0  ;;  %v1103_v38 = vmax.f32 %v863_v3, 0.0 }
 0x1a7   :  { %v1130_v17 = vmax.f32 %v903_v21, 0.0  ;;  %v1132_v30 = vmax.f32 %v1064_v2, 0.0  ;;  %v905_v18 = vadd.f32 %v904_v19, %v6183_v15  ;;  %v1066_v6 = vadd.f32 %v1065_v20, %v6185_v16 }
 0x1a8   :  { %v6413_v33 = vmax.f32 %v1095_v50, %v1127_v41  ;;  %v6415_v51 = vmax.f32 %v1097_v36, %v1129_v60  ;;  %v908_v34 = vpop.f32.mrf.mxu0  ;;  %v1069_v7 = vpop.f32.mrf.mxu1  ;;  %v1105_v55 = vmax.f32 %v1024_v22, 0.0 }
 0x1a9   :  { %v6417_v39 = vmax.f32 %v1098_v9, %v1130_v17  ;;  %v6419_v52 = vmax.f32 %v1100_v54, %v1132_v30  ;;  %v1131_v8 = vmax.f32 %v905_v18, 0.0  ;;  %v1133_v25 = vmax.f32 %v1066_v6, 0.0 }
 0x1aa   :  { %v909_v26 = vadd.f32 %v908_v34, %v6179_v13  ;;  %v1070_v32 = vadd.f32 %v1069_v7, %v6181_v14  ;;  %v910_v43 = vpop.f32.mrf.mxu0  ;;  %v1071_v11 = vpop.f32.mrf.mxu1  ;;  %v1102_v9 = vmax.f32 %v861_v63, 0.0 }
 0x1ab   :  { %v6423_v12 = vmax.f32 %v1099_v37, %v1131_v8  ;;  %v6425_v44 = vmax.f32 %v1101_v61, %v1133_v25  ;;  %v911_v50 = vadd.f32 %v910_v43, %v6183_v15  ;;  %v1072_v36 = vadd.f32 %v1071_v11, %v6185_v16 }
 0x1ac   :  { %v1134_v54 = vmax.f32 %v909_v26, 0.0  ;;  %v1136_v62 = vmax.f32 %v1070_v32, 0.0 }
 0x1ad   :  { %v1135_v21 = vmax.f32 %v911_v50, 0.0  ;;  %v1137_v13 = vmax.f32 %v1072_v36, 0.0 }
 0x1ae   :  { %v6429_v2 = vmax.f32 %v1102_v9, %v1134_v54  ;;  %v6431_v14 = vmax.f32 %v1104_v29, %v1136_v62 }
 0x1af   :  { %v6433_v37 = vmax.f32 %v1103_v38, %v1135_v21  ;;  %v6435_v61 = vmax.f32 %v1105_v55, %v1137_v13 }
 0x1b0   :  { %5004 = dma.done.wait [#allocation3], 32768 }
 0x1b1   :  { %5005 = vsyncadd [#allocation3], 4294934528  ;;  %v1243_v15 = vpack.c.bf16 %v6311_v57, %v6311_v57  ;;  %v1245_v16 = vpack.c.bf16 %v6313_v35, %v6313_v35  ;;  %v4728_v63 = vld [vmem:[#allocation2 + $0x178] sm:$0xff]   ;;  %v4732_v19 = vld [vmem:[#allocation2 + $0x170] sm:$0xff]   ;;  %s5006_s3 = smov 64   ;;  %vm5008_vm1 = vmmov 0  }
 0x1b2   :  { %v4729_v0 = vld [vmem:[#allocation2 + $0x1f8] sm:$0xff]   ;;  %4355 = vmatprep.subr.bf16.mxu0 %v4728_v63  ;;  %v4733_v20 = vld [vmem:[#allocation2 + $0x1f0] sm:$0xff]   ;;  %v4736_v57 = vld [vmem:[#allocation2 + $0x168] sm:$0xff]   ;;  %s5009_s23 = smov 96   ;;  %s5010_s24 = smov 32   ;;  %vm4039_vm2 = vcmask 7168  }
 0x1b3   :  { %1534 = vmatprep.mubr.bf16.mxu0 %v1243_v15  ;;  %1574 = vmatprep.mubr.bf16.mxu1 %v1245_v16  ;;  %v4730_v41 = vld [vmem:[#allocation2 + $0x138] sm:$0xff]   ;;  %v4734_v17 = vld [vmem:[#allocation2 + $0x130] sm:$0xff]   ;;  %v4737_v35 = vld [vmem:[#allocation2 + $0x1e8] sm:$0xff]   ;;  %v1242_v15 = vpack.c.bf16 %v6307_v28, %v6307_v28  ;;  %v1244_v16 = vpack.c.bf16 %v6309_v53, %v6309_v53  ;;  %vm4042_vm3 = vcmask 1024  }
 0x1b4   :  { %4377 = vmatprep.subr.bf16.mxu1 %v4729_v0  ;;  %v4731_v60 = vld [vmem:[#allocation2 + $0x1b8] sm:$0xff]   ;;  %4356 = vmatpush3.bf16.msra.mxu0 %v4730_v41  ;;  %v4735_v30 = vld [vmem:[#allocation2 + $0x1b0] sm:$0xff]   ;;  %v4738_v18 = vld [vmem:[#allocation2 + $0x128] sm:$0xff]   ;;  %v1583_v41 = vpack.c.bf16 %v6343_v5, %v6343_v5 }
 0x1b5   :  { %4378 = vmatpush3.bf16.msra.mxu1 %v4731_v60  ;;  %4357 = vmatprep.subr.bf16.mxu0 %v4732_v19  ;;  %v4739_v6 = vld [vmem:[#allocation2 + $0x1a8] sm:$0xff]   ;;  %v4740_v3 = vld [vmem:[#allocation2 + $0x160] sm:$0xff]   ;;  %v4744_v8 = vld [vmem:[#allocation2 + $0x158] sm:$0xff]   ;;  %v1585_v19 = vpack.c.bf16 %v6347_v40, %v6347_v40 }
 0x1b6   :  { %4379 = vmatprep.subr.bf16.mxu1 %v4733_v20  ;;  %v4741_v22 = vld [vmem:[#allocation2 + $0x1e0] sm:$0xff]   ;;  %v4745_v25 = vld [vmem:[#allocation2 + $0x1d8] sm:$0xff]   ;;  %v4748_v43 = vld [vmem:[#allocation2 + $0x150] sm:$0xff]  }
 0x1b7   :  { %v4742_v34 = vld [vmem:[#allocation2 + $0x120] sm:$0xff]   ;;  %v4746_v26 = vld [vmem:[#allocation2 + $0x118] sm:$0xff]   ;;  %v4749_v11 = vld [vmem:[#allocation2 + $0x1d0] sm:$0xff]  }
 0x1b8   :  { %4358 = vmatpush3.bf16.msra.mxu0 %v4734_v17  ;;  %v4743_v7 = vld [vmem:[#allocation2 + $0x1a0] sm:$0xff]   ;;  %v4747_v32 = vld [vmem:[#allocation2 + $0x198] sm:$0xff]   ;;  %v4750_v50 = vld [vmem:[#allocation2 + $0x110] sm:$0xff]  }
 0x1b9   :  { %4380 = vmatpush3.bf16.msra.mxu1 %v4735_v30  ;;  %4359 = vmatprep.subr.bf16.mxu0 %v4736_v57  ;;  %v4751_v36 = vld [vmem:[#allocation2 + $0x190] sm:$0xff]   ;;  %v4752_v9 = vld [vmem:[#allocation2 + $0x148] sm:$0xff]   ;;  %v4756_v38 = vld [vmem:[#allocation2 + $0x140] sm:$0xff]  }
 0x1ba   :  { %4381 = vmatprep.subr.bf16.mxu1 %v4737_v35  ;;  %v4753_v29 = vld [vmem:[#allocation2 + $0x1c8] sm:$0xff]   ;;  %v4757_v55 = vld [vmem:[#allocation2 + $0x1c0] sm:$0xff]   ;;  %v4760_v63 = vld [vmem:[#allocation2 + $0x278] sm:$0xff]  }
 0x1bb   :  { %v4754_v54 = vld [vmem:[#allocation2 + $0x108] sm:$0xff]   ;;  %v4758_v21 = vld [vmem:[#allocation2 + $0x100] sm:$0xff]   ;;  %v4761_v0 = vld [vmem:[#allocation2 + $0x2f8] sm:$0xff]  }
 0x1bc   :  { %4360 = vmatpush3.bf16.msra.mxu0 %v4738_v18  ;;  %v4755_v62 = vld [vmem:[#allocation2 + $0x188] sm:$0xff]   ;;  %v4759_v13 = vld [vmem:[#allocation2 + $0x180] sm:$0xff]   ;;  %v4762_v60 = vld [vmem:[#allocation2 + $0x238] sm:$0xff]  }
 0x1bd   :  { %4382 = vmatpush3.bf16.msra.mxu1 %v4739_v6  ;;  %4361 = vmatprep.subr.bf16.mxu0 %v4740_v3  ;;  %v4763_v20 = vld [vmem:[#allocation2 + $0x2b8] sm:$0xff]   ;;  %v4764_v28 = vld [vmem:[#allocation2 + $0x270] sm:$0xff]   ;;  %v4768_v5 = vld [vmem:[#allocation2 + $0x268] sm:$0xff]  }
 0x1be   :  { %4383 = vmatprep.subr.bf16.mxu1 %v4741_v22  ;;  %v4765_v17 = vld [vmem:[#allocation2 + $0x2f0] sm:$0xff]   ;;  %v4769_v57 = vld [vmem:[#allocation2 + $0x2e8] sm:$0xff]   ;;  %v4772_v18 = vld [vmem:[#allocation2 + $0x260] sm:$0xff]  }
 0x1bf   :  { %v4766_v53 = vld [vmem:[#allocation2 + $0x230] sm:$0xff]   ;;  %v4770_v40 = vld [vmem:[#allocation2 + $0x228] sm:$0xff]   ;;  %v4773_v6 = vld [vmem:[#allocation2 + $0x2e0] sm:$0xff]  }
 0x1c0   :  { %4362 = vmatpush3.bf16.msra.mxu0 %v4742_v34  ;;  %v4767_v30 = vld [vmem:[#allocation2 + $0x2b0] sm:$0xff]   ;;  %v4771_v35 = vld [vmem:[#allocation2 + $0x2a8] sm:$0xff]   ;;  %v4774_v3 = vld [vmem:[#allocation2 + $0x220] sm:$0xff]  }
 0x1c1   :  { %4384 = vmatpush3.bf16.msra.mxu1 %v4743_v7  ;;  %4363 = vmatprep.subr.bf16.mxu0 %v4744_v8  ;;  %v4775_v22 = vld [vmem:[#allocation2 + $0x2a0] sm:$0xff]   ;;  %v4776_v34 = vld [vmem:[#allocation2 + $0x258] sm:$0xff]  }
 0x1c2   :  { %4385 = vmatprep.subr.bf16.mxu1 %v4745_v25  ;;  %v4777_v7 = vld [vmem:[#allocation2 + $0x2d8] sm:$0xff]  }
 0x1c3   :  { %v4778_v8 = vld [vmem:[#allocation2 + $0x218] sm:$0xff]  }
 0x1c4   :  { %4364 = vmatpush3.bf16.msra.mxu0 %v4746_v26  ;;  %v4779_v25 = vld [vmem:[#allocation2 + $0x298] sm:$0xff]   ;;  %v4780_v26 = vld [vmem:[#allocation2 + $0x250] sm:$0xff]  }
 0x1c5   :  { %4386 = vmatpush3.bf16.msra.mxu1 %v4747_v32  ;;  %4365 = vmatprep.subr.bf16.mxu0 %v4748_v43  ;;  %v4781_v32 = vld [vmem:[#allocation2 + $0x2d0] sm:$0xff]  }
 0x1c6   :  { %4387 = vmatprep.subr.bf16.mxu1 %v4749_v11  ;;  %v4782_v43 = vld [vmem:[#allocation2 + $0x210] sm:$0xff]  }
 0x1c7   :  { %v4783_v11 = vld [vmem:[#allocation2 + $0x290] sm:$0xff]  }
 0x1c8   :  { %4366 = vmatpush3.bf16.msra.mxu0 %v4750_v50  ;;  %v4784_v50 = vld [vmem:[#allocation2 + $0x248] sm:$0xff]  }
 0x1c9   :  { %4388 = vmatpush3.bf16.msra.mxu1 %v4751_v36  ;;  %4367 = vmatprep.subr.bf16.mxu0 %v4752_v9  ;;  %v4785_v36 = vld [vmem:[#allocation2 + $0x2c8] sm:$0xff]  }
 0x1ca   :  { %4389 = vmatprep.subr.bf16.mxu1 %v4753_v29  ;;  %v4786_v9 = vld [vmem:[#allocation2 + $0x208] sm:$0xff]  }
 0x1cb   :  { %v4787_v29 = vld [vmem:[#allocation2 + $0x288] sm:$0xff]  }
 0x1cc   :  { %4368 = vmatpush3.bf16.msra.mxu0 %v4754_v54  ;;  %v4788_v54 = vld [vmem:[#allocation2 + $0x240] sm:$0xff]  }
 0x1cd   :  { %4390 = vmatpush3.bf16.msra.mxu1 %v4755_v62  ;;  %4369 = vmatprep.subr.bf16.mxu0 %v4756_v38  ;;  %v4789_v62 = vld [vmem:[#allocation2 + $0x2c0] sm:$0xff]  }
 0x1ce   :  { %4391 = vmatprep.subr.bf16.mxu1 %v4757_v55  ;;  %v4790_v38 = vld [vmem:[#allocation2 + $0x200] sm:$0xff]  }
 0x1cf   :  { %v4791_v55 = vld [vmem:[#allocation2 + $0x280] sm:$0xff]  }
 0x1d0   :  { %4370 = vmatpush3.bf16.msra.mxu0 %v4758_v21  ;;  %v1582_v21 = vpack.c.bf16 %v6327_v47, %v6327_v47  ;;  %v4796_v47 = vld [vmem:[#allocation2 + $0x370] sm:$0xff]  }
 0x1d1   :  { %4392 = vmatpush3.bf16.msra.mxu1 %v4759_v13  ;;  %4399 = vmatprep.subr.bf16.mxu0 %v4760_v63  ;;  %v1584_v13 = vpack.c.bf16 %v6331_v48, %v6331_v48  ;;  %v1923_v63 = vpack.c.bf16 %v6365_v59, %v6365_v59  ;;  %v4798_v48 = vld [vmem:[#allocation2 + $0x330] sm:$0xff]   ;;  %v4800_v59 = vld [vmem:[#allocation2 + $0x368] sm:$0xff]  }
 0x1d2   :  { %4421 = vmatprep.subr.bf16.mxu1 %v4761_v0  ;;  %v4794_v0 = vld [vmem:[#allocation2 + $0x338] sm:$0xff]  }
 0x1d3   :  { %1535 = vmatmul.mubr.bf16.vlgmr.msra.gmra.mxu0 %v1242_v15  ;;  %v4792_v15 = vld [vmem:[#allocation2 + $0x378] sm:$0xff]  }
 0x1d4   :  { %1575 = vmatmul.mubr.bf16.vlgmr.msra.gmra.mxu1 %v1244_v16  ;;  %4400 = vmatpush3.bf16.msra.mxu0 %v4762_v60  ;;  %v4793_v16 = vld [vmem:[#allocation2 + $0x3f8] sm:$0xff]  }
 0x1d5   :  { %4422 = vmatpush3.bf16.msra.mxu1 %v4763_v20  ;;  %1874 = vmatprep.mubr.bf16.mxu0 %v1583_v41  ;;  %v1925_v41 = vpack.c.bf16 %v6369_v42, %v6369_v42  ;;  %v4795_v60 = vld [vmem:[#allocation2 + $0x3b8] sm:$0xff]   ;;  %v4799_v20 = vld [vmem:[#allocation2 + $0x3b0] sm:$0xff]   ;;  %v4802_v42 = vld [vmem:[#allocation2 + $0x328] sm:$0xff]  }
 0x1d6   :  { %4401 = vmatprep.subr.bf16.mxu0 %v4764_v28  ;;  %1914 = vmatprep.mubr.bf16.mxu1 %v1585_v19  ;;  %v4797_v19 = vld [vmem:[#allocation2 + $0x3f0] sm:$0xff]   ;;  %v4801_v28 = vld [vmem:[#allocation2 + $0x3e8] sm:$0xff]  }
 0x1d7   :  { %4423 = vmatprep.subr.bf16.mxu1 %v4765_v17  ;;  %v4803_v17 = vld [vmem:[#allocation2 + $0x3a8] sm:$0xff]  }
 0x1d8   :  { %4402 = vmatpush3.bf16.msra.mxu0 %v4766_v53  ;;  %v4804_v53 = vld [vmem:[#allocation2 + $0x360] sm:$0xff]  }
 0x1d9   :  { %4424 = vmatpush3.bf16.msra.mxu1 %v4767_v30  ;;  %4403 = vmatprep.subr.bf16.mxu0 %v4768_v5  ;;  %v4805_v30 = vld [vmem:[#allocation2 + $0x3e0] sm:$0xff]  }
 0x1da   :  { %4425 = vmatprep.subr.bf16.mxu1 %v4769_v57  ;;  %v4806_v5 = vld [vmem:[#allocation2 + $0x320] sm:$0xff]  }
 0x1db   :  { %v4807_v57 = vld [vmem:[#allocation2 + $0x3a0] sm:$0xff]  }
 0x1dc   :  { %4404 = vmatpush3.bf16.msra.mxu0 %v4770_v40  ;;  %v4808_v40 = vld [vmem:[#allocation2 + $0x358] sm:$0xff]  }
 0x1dd   :  { %4426 = vmatpush3.bf16.msra.mxu1 %v4771_v35  ;;  %4405 = vmatprep.subr.bf16.mxu0 %v4772_v18  ;;  %v4809_v35 = vld [vmem:[#allocation2 + $0x3d8] sm:$0xff]  }
 0x1de   :  { %4427 = vmatprep.subr.bf16.mxu1 %v4773_v6  ;;  %v4810_v18 = vld [vmem:[#allocation2 + $0x318] sm:$0xff]  }
 0x1df   :  { %v4811_v6 = vld [vmem:[#allocation2 + $0x398] sm:$0xff]  }
 0x1e0   :  { %4406 = vmatpush3.bf16.msra.mxu0 %v4774_v3  ;;  %v4812_v3 = vld [vmem:[#allocation2 + $0x350] sm:$0xff]  }
 0x1e1   :  { %4428 = vmatpush3.bf16.msra.mxu1 %v4775_v22  ;;  %4407 = vmatprep.subr.bf16.mxu0 %v4776_v34  ;;  %v4813_v22 = vld [vmem:[#allocation2 + $0x3d0] sm:$0xff]  }
 0x1e2   :  { %4429 = vmatprep.subr.bf16.mxu1 %v4777_v7  ;;  %v4814_v34 = vld [vmem:[#allocation2 + $0x310] sm:$0xff]  }
 0x1e3   :  { %v4815_v7 = vld [vmem:[#allocation2 + $0x390] sm:$0xff]  }
 0x1e4   :  { %4408 = vmatpush3.bf16.msra.mxu0 %v4778_v8  ;;  %v4816_v8 = vld [vmem:[#allocation2 + $0x348] sm:$0xff]  }
 0x1e5   :  { %4430 = vmatpush3.bf16.msra.mxu1 %v4779_v25  ;;  %4409 = vmatprep.subr.bf16.mxu0 %v4780_v26  ;;  %v4817_v25 = vld [vmem:[#allocation2 + $0x3c8] sm:$0xff]  }
 0x1e6   :  { %4431 = vmatprep.subr.bf16.mxu1 %v4781_v32  ;;  %v4818_v26 = vld [vmem:[#allocation2 + $0x308] sm:$0xff]  }
 0x1e7   :  { %v4819_v32 = vld [vmem:[#allocation2 + $0x388] sm:$0xff]  }
 0x1e8   :  { %4410 = vmatpush3.bf16.msra.mxu0 %v4782_v43  ;;  %v4820_v43 = vld [vmem:[#allocation2 + $0x340] sm:$0xff]  }
 0x1e9   :  { %4432 = vmatpush3.bf16.msra.mxu1 %v4783_v11  ;;  %4411 = vmatprep.subr.bf16.mxu0 %v4784_v50  ;;  %v4821_v11 = vld [vmem:[#allocation2 + $0x3c0] sm:$0xff]  }
 0x1ea   :  { %4433 = vmatprep.subr.bf16.mxu1 %v4785_v36  ;;  %v4822_v50 = vld [vmem:[#allocation2 + $0x300] sm:$0xff]  }
 0x1eb   :  { %v4823_v36 = vld [vmem:[#allocation2 + $0x380] sm:$0xff]  }
 0x1ec   :  { %4412 = vmatpush3.bf16.msra.mxu0 %v4786_v9  ;;  %v1922_v9 = vpack.c.bf16 %v6351_v46, %v6351_v46  ;;  %v4828_v46 = vld [vmem:[#allocation2 + $0x470] sm:$0xff]  }
 0x1ed   :  { %4434 = vmatpush3.bf16.msra.mxu1 %v4787_v29  ;;  %4413 = vmatprep.subr.bf16.mxu0 %v4788_v54  ;;  %v1924_v29 = vpack.c.bf16 %v6355_v1, %v6355_v1  ;;  %v4824_v54 = vld [vmem:[#allocation2 + $0x478] sm:$0xff]   ;;  %v4830_v1 = vld [vmem:[#allocation2 + $0x430] sm:$0xff]  }
 0x1ee   :  { %4435 = vmatprep.subr.bf16.mxu1 %v4789_v62  ;;  %v4825_v62 = vld [vmem:[#allocation2 + $0x4f8] sm:$0xff]  }
 0x1f0   :  { %4414 = vmatpush3.bf16.msra.mxu0 %v4790_v38  ;;  %v2263_v38 = vpack.c.bf16 %v6389_v27, %v6389_v27  ;;  %v4832_v27 = vld [vmem:[#allocation2 + $0x468] sm:$0xff]  }
 0x1f1   :  { %4436 = vmatpush3.bf16.msra.mxu1 %v4791_v55  ;;  %4443 = vmatprep.subr.bf16.mxu0 %v4792_v15  ;;  %v4826_v55 = vld [vmem:[#allocation2 + $0x438] sm:$0xff]   ;;  %v4829_v15 = vld [vmem:[#allocation2 + $0x4f0] sm:$0xff]  }
 0x1f2   :  { %4465 = vmatprep.subr.bf16.mxu1 %v4793_v16  ;;  %v4831_v16 = vld [vmem:[#allocation2 + $0x4b0] sm:$0xff]  }
 0x1f3   :  { %1875 = vmatmul.mubr.bf16.vlgmr.msra.gmra.mxu0 %v1582_v21  ;;  %v2265_v21 = vpack.c.bf16 %v6393_v45, %v6393_v45  ;;  %v4834_v45 = vld [vmem:[#allocation2 + $0x428] sm:$0xff]  }
 0x1f4   :  { %1915 = vmatmul.mubr.bf16.vlgmr.msra.gmra.mxu1 %v1584_v13  ;;  %4444 = vmatpush3.bf16.msra.mxu0 %v4794_v0  ;;  %v4827_v13 = vld [vmem:[#allocation2 + $0x4b8] sm:$0xff]   ;;  %v4835_v0 = vld [vmem:[#allocation2 + $0x4a8] sm:$0xff]  }
 0x1f5   :  { %4466 = vmatpush3.bf16.msra.mxu1 %v4795_v60  ;;  %2214 = vmatprep.mubr.bf16.mxu0 %v1923_v63  ;;  %v4833_v63 = vld [vmem:[#allocation2 + $0x4e8] sm:$0xff]   ;;  %v4837_v60 = vld [vmem:[#allocation2 + $0x4e0] sm:$0xff]  }
 0x1f6   :  { %4445 = vmatprep.subr.bf16.mxu0 %v4796_v47  ;;  %2254 = vmatprep.mubr.bf16.mxu1 %v1925_v41  ;;  %v4836_v41 = vld [vmem:[#allocation2 + $0x460] sm:$0xff]  }
 0x1f7   :  { %4467 = vmatprep.subr.bf16.mxu1 %v4797_v19  ;;  %v4838_v47 = vld [vmem:[#allocation2 + $0x420] sm:$0xff]  }
 0x1f8   :  { %4446 = vmatpush3.bf16.msra.mxu0 %v4798_v48  ;;  %v4839_v19 = vld [vmem:[#allocation2 + $0x4a0] sm:$0xff]   ;;  %v4840_v48 = vld [vmem:[#allocation2 + $0x458] sm:$0xff]  }
 0x1f9   :  { %4468 = vmatpush3.bf16.msra.mxu1 %v4799_v20  ;;  %4447 = vmatprep.subr.bf16.mxu0 %v4800_v59  ;;  %v4841_v20 = vld [vmem:[#allocation2 + $0x4d8] sm:$0xff]  }
 0x1fa   :  { %4469 = vmatprep.subr.bf16.mxu1 %v4801_v28  ;;  %v4842_v59 = vld [vmem:[#allocation2 + $0x418] sm:$0xff]  }
 0x1fb   :  { %v4843_v28 = vld [vmem:[#allocation2 + $0x498] sm:$0xff]  }
 0x1fc   :  { %4448 = vmatpush3.bf16.msra.mxu0 %v4802_v42  ;;  %v4844_v42 = vld [vmem:[#allocation2 + $0x450] sm:$0xff]  }
 0x1fd   :  { %4470 = vmatpush3.bf16.msra.mxu1 %v4803_v17  ;;  %4449 = vmatprep.subr.bf16.mxu0 %v4804_v53  ;;  %v4845_v17 = vld [vmem:[#allocation2 + $0x4d0] sm:$0xff]  }
 0x1fe   :  { %4471 = vmatprep.subr.bf16.mxu1 %v4805_v30  ;;  %v4846_v53 = vld [vmem:[#allocation2 + $0x410] sm:$0xff]  }
 0x1ff   :  { %v4847_v30 = vld [vmem:[#allocation2 + $0x490] sm:$0xff]  }
 0x200   :  { %4450 = vmatpush3.bf16.msra.mxu0 %v4806_v5  ;;  %v4848_v5 = vld [vmem:[#allocation2 + $0x448] sm:$0xff]  }
 0x201   :  { %4472 = vmatpush3.bf16.msra.mxu1 %v4807_v57  ;;  %4451 = vmatprep.subr.bf16.mxu0 %v4808_v40  ;;  %v4849_v57 = vld [vmem:[#allocation2 + $0x4c8] sm:$0xff]  }
 0x202   :  { %4473 = vmatprep.subr.bf16.mxu1 %v4809_v35  ;;  %v4850_v40 = vld [vmem:[#allocation2 + $0x408] sm:$0xff]  }
 0x203   :  { %v4851_v35 = vld [vmem:[#allocation2 + $0x488] sm:$0xff]  }
 0x204   :  { %4452 = vmatpush3.bf16.msra.mxu0 %v4810_v18  ;;  %v4852_v18 = vld [vmem:[#allocation2 + $0x440] sm:$0xff]  }
 0x205   :  { %4474 = vmatpush3.bf16.msra.mxu1 %v4811_v6  ;;  %4453 = vmatprep.subr.bf16.mxu0 %v4812_v3  ;;  %v4853_v6 = vld [vmem:[#allocation2 + $0x4c0] sm:$0xff]  }
 0x206   :  { %4475 = vmatprep.subr.bf16.mxu1 %v4813_v22  ;;  %v4854_v3 = vld [vmem:[#allocation2 + $0x400] sm:$0xff]  }
 0x207   :  { %v4855_v22 = vld [vmem:[#allocation2 + $0x480] sm:$0xff]  }
 0x208   :  { %4454 = vmatpush3.bf16.msra.mxu0 %v4814_v34  ;;  %v2262_v34 = vpack.c.bf16 %v6381_v31, %v6381_v31  ;;  %v4860_v31 = vld [vmem:[#allocation2 + $0x570] sm:$0xff]  }
 0x209   :  { %4476 = vmatpush3.bf16.msra.mxu1 %v4815_v7  ;;  %4455 = vmatprep.subr.bf16.mxu0 %v4816_v8  ;;  %v2264_v7 = vpack.c.bf16 %v6385_v49, %v6385_v49  ;;  %v4856_v8 = vld [vmem:[#allocation2 + $0x578] sm:$0xff]   ;;  %v4862_v49 = vld [vmem:[#allocation2 + $0x530] sm:$0xff]  }
 0x20a   :  { %4477 = vmatprep.subr.bf16.mxu1 %v4817_v25  ;;  %v4857_v25 = vld [vmem:[#allocation2 + $0x5f8] sm:$0xff]  }
 0x20c   :  { %4456 = vmatpush3.bf16.msra.mxu0 %v4818_v26  ;;  %v2603_v26 = vpack.c.bf16 %v6413_v33, %v6413_v33  ;;  %v4864_v33 = vld [vmem:[#allocation2 + $0x568] sm:$0xff]  }
 0x20d   :  { %4478 = vmatpush3.bf16.msra.mxu1 %v4819_v32  ;;  %4457 = vmatprep.subr.bf16.mxu0 %v4820_v43  ;;  %v4858_v32 = vld [vmem:[#allocation2 + $0x538] sm:$0xff]   ;;  %v2605_v43 = vpack.c.bf16 %v6415_v51, %v6415_v51  ;;  %v4866_v51 = vld [vmem:[#allocation2 + $0x528] sm:$0xff]  }
 0x20e   :  { %4479 = vmatprep.subr.bf16.mxu1 %v4821_v11  ;;  %v4859_v11 = vld [vmem:[#allocation2 + $0x5b8] sm:$0xff]  }
 0x210   :  { %4458 = vmatpush3.bf16.msra.mxu0 %v4822_v50  ;;  %v4861_v50 = vld [vmem:[#allocation2 + $0x5f0] sm:$0xff]  }
 0x211   :  { %4480 = vmatpush3.bf16.msra.mxu1 %v4823_v36  ;;  %4487 = vmatprep.subr.bf16.mxu0 %v4824_v54  ;;  %v4863_v36 = vld [vmem:[#allocation2 + $0x5b0] sm:$0xff]   ;;  %v4868_v54 = vld [vmem:[#allocation2 + $0x560] sm:$0xff]  }
 0x212   :  { %4509 = vmatprep.subr.bf16.mxu1 %v4825_v62  ;;  %v4869_v62 = vld [vmem:[#allocation2 + $0x5e0] sm:$0xff]  }
 0x213   :  { %2215 = vmatmul.mubr.bf16.vlgmr.msra.gmra.mxu0 %v1922_v9  ;;  %v4865_v9 = vld [vmem:[#allocation2 + $0x5e8] sm:$0xff]  }
 0x214   :  { %2255 = vmatmul.mubr.bf16.vlgmr.msra.gmra.mxu1 %v1924_v29  ;;  %4488 = vmatpush3.bf16.msra.mxu0 %v4826_v55  ;;  %v4867_v29 = vld [vmem:[#allocation2 + $0x5a8] sm:$0xff]   ;;  %v4871_v55 = vld [vmem:[#allocation2 + $0x5a0] sm:$0xff]  }
 0x215   :  { %4510 = vmatpush3.bf16.msra.mxu1 %v4827_v13  ;;  %2554 = vmatprep.mubr.bf16.mxu0 %v2263_v38  ;;  %v4870_v38 = vld [vmem:[#allocation2 + $0x520] sm:$0xff]   ;;  %v4873_v13 = vld [vmem:[#allocation2 + $0x5d8] sm:$0xff]  }
 0x216   :  { %4489 = vmatprep.subr.bf16.mxu0 %v4828_v46  ;;  %2594 = vmatprep.mubr.bf16.mxu1 %v2265_v21  ;;  %v4872_v21 = vld [vmem:[#allocation2 + $0x558] sm:$0xff]  }
 0x217   :  { %4511 = vmatprep.subr.bf16.mxu1 %v4829_v15  ;;  %v4874_v46 = vld [vmem:[#allocation2 + $0x518] sm:$0xff]  }
 0x218   :  { %4490 = vmatpush3.bf16.msra.mxu0 %v4830_v1  ;;  %v4875_v15 = vld [vmem:[#allocation2 + $0x598] sm:$0xff]   ;;  %v4876_v1 = vld [vmem:[#allocation2 + $0x550] sm:$0xff]  }
 0x219   :  { %4512 = vmatpush3.bf16.msra.mxu1 %v4831_v16  ;;  %4491 = vmatprep.subr.bf16.mxu0 %v4832_v27  ;;  %v4877_v16 = vld [vmem:[#allocation2 + $0x5d0] sm:$0xff]  }
 0x21a   :  { %4513 = vmatprep.subr.bf16.mxu1 %v4833_v63  ;;  %v4878_v27 = vld [vmem:[#allocation2 + $0x510] sm:$0xff]  }
 0x21b   :  { %v4879_v63 = vld [vmem:[#allocation2 + $0x590] sm:$0xff]  }
 0x21c   :  { %4492 = vmatpush3.bf16.msra.mxu0 %v4834_v45  ;;  %v4880_v45 = vld [vmem:[#allocation2 + $0x548] sm:$0xff]  }
 0x21d   :  { %4514 = vmatpush3.bf16.msra.mxu1 %v4835_v0  ;;  %4493 = vmatprep.subr.bf16.mxu0 %v4836_v41  ;;  %v4881_v0 = vld [vmem:[#allocation2 + $0x5c8] sm:$0xff]  }
 0x21e   :  { %4515 = vmatprep.subr.bf16.mxu1 %v4837_v60  ;;  %v4882_v41 = vld [vmem:[#allocation2 + $0x508] sm:$0xff]  }
 0x21f   :  { %v4883_v60 = vld [vmem:[#allocation2 + $0x588] sm:$0xff]  }
 0x220   :  { %4494 = vmatpush3.bf16.msra.mxu0 %v4838_v47  ;;  %v4884_v47 = vld [vmem:[#allocation2 + $0x540] sm:$0xff]  }
 0x221   :  { %4516 = vmatpush3.bf16.msra.mxu1 %v4839_v19  ;;  %4495 = vmatprep.subr.bf16.mxu0 %v4840_v48  ;;  %v4885_v19 = vld [vmem:[#allocation2 + $0x5c0] sm:$0xff]  }
 0x222   :  { %4517 = vmatprep.subr.bf16.mxu1 %v4841_v20  ;;  %v4886_v48 = vld [vmem:[#allocation2 + $0x500] sm:$0xff]  }
 0x223   :  { %v4887_v20 = vld [vmem:[#allocation2 + $0x580] sm:$0xff]  }
 0x224   :  { %4496 = vmatpush3.bf16.msra.mxu0 %v4842_v59  ;;  %v2602_v59 = vpack.c.bf16 %v6397_v56, %v6397_v56  ;;  %v4892_v56 = vld [vmem:[#allocation2 + $0x670] sm:$0xff]  }
 0x225   :  { %4518 = vmatpush3.bf16.msra.mxu1 %v4843_v28  ;;  %4497 = vmatprep.subr.bf16.mxu0 %v4844_v42  ;;  %v2604_v28 = vpack.c.bf16 %v6399_v4, %v6399_v4  ;;  %v4888_v42 = vld [vmem:[#allocation2 + $0x678] sm:$0xff]   ;;  %v4894_v4 = vld [vmem:[#allocation2 + $0x630] sm:$0xff]  }
 0x226   :  { %4519 = vmatprep.subr.bf16.mxu1 %v4845_v17  ;;  %v4889_v17 = vld [vmem:[#allocation2 + $0x6f8] sm:$0xff]  }
 0x228   :  { %4498 = vmatpush3.bf16.msra.mxu0 %v4846_v53  ;;  %v2943_v53 = vpack.c.bf16 %v6423_v12, %v6423_v12  ;;  %v4896_v12 = vld [vmem:[#allocation2 + $0x668] sm:$0xff]  }
 0x229   :  { %4520 = vmatpush3.bf16.msra.mxu1 %v4847_v30  ;;  %4499 = vmatprep.subr.bf16.mxu0 %v4848_v5  ;;  %v4890_v30 = vld [vmem:[#allocation2 + $0x638] sm:$0xff]   ;;  %v2945_v5 = vpack.c.bf16 %v6425_v44, %v6425_v44  ;;  %v4898_v44 = vld [vmem:[#allocation2 + $0x628] sm:$0xff]  }
 0x22a   :  { %4521 = vmatprep.subr.bf16.mxu1 %v4849_v57  ;;  %v4891_v57 = vld [vmem:[#allocation2 + $0x6b8] sm:$0xff]  }
 0x22c   :  { %4500 = vmatpush3.bf16.msra.mxu0 %v4850_v40  ;;  %v4893_v40 = vld [vmem:[#allocation2 + $0x6f0] sm:$0xff]  }
 0x22d   :  { %4522 = vmatpush3.bf16.msra.mxu1 %v4851_v35  ;;  %4501 = vmatprep.subr.bf16.mxu0 %v4852_v18  ;;  %v4895_v35 = vld [vmem:[#allocation2 + $0x6b0] sm:$0xff]   ;;  %v4897_v18 = vld [vmem:[#allocation2 + $0x6e8] sm:$0xff]  }
 0x22e   :  { %4523 = vmatprep.subr.bf16.mxu1 %v4853_v6  ;;  %v4899_v6 = vld [vmem:[#allocation2 + $0x6a8] sm:$0xff]  }
 0x230   :  { %4502 = vmatpush3.bf16.msra.mxu0 %v4854_v3  ;;  %v4900_v3 = vld [vmem:[#allocation2 + $0x660] sm:$0xff]  }
 0x231   :  { %4524 = vmatpush3.bf16.msra.mxu1 %v4855_v22  ;;  %4531 = vmatprep.subr.bf16.mxu0 %v4856_v8  ;;  %v4901_v22 = vld [vmem:[#allocation2 + $0x6e0] sm:$0xff]   ;;  %v4904_v8 = vld [vmem:[#allocation2 + $0x658] sm:$0xff]  }
 0x232   :  { %4553 = vmatprep.subr.bf16.mxu1 %v4857_v25  ;;  %v4905_v25 = vld [vmem:[#allocation2 + $0x6d8] sm:$0xff]  }
 0x233   :  { %2555 = vmatmul.mubr.bf16.vlgmr.msra.gmra.mxu0 %v2262_v34  ;;  %v4902_v34 = vld [vmem:[#allocation2 + $0x620] sm:$0xff]  }
 0x234   :  { %2595 = vmatmul.mubr.bf16.vlgmr.msra.gmra.mxu1 %v2264_v7  ;;  %4532 = vmatpush3.bf16.msra.mxu0 %v4858_v32  ;;  %v4903_v7 = vld [vmem:[#allocation2 + $0x6a0] sm:$0xff]   ;;  %v4907_v32 = vld [vmem:[#allocation2 + $0x698] sm:$0xff]  }
 0x235   :  { %4554 = vmatpush3.bf16.msra.mxu1 %v4859_v11  ;;  %2894 = vmatprep.mubr.bf16.mxu0 %v2603_v26  ;;  %v4906_v26 = vld [vmem:[#allocation2 + $0x618] sm:$0xff]   ;;  %v4909_v11 = vld [vmem:[#allocation2 + $0x6d0] sm:$0xff]  }
 0x236   :  { %4533 = vmatprep.subr.bf16.mxu0 %v4860_v31  ;;  %2934 = vmatprep.mubr.bf16.mxu1 %v2605_v43  ;;  %v4908_v43 = vld [vmem:[#allocation2 + $0x650] sm:$0xff]  }
 0x237   :  { %4555 = vmatprep.subr.bf16.mxu1 %v4861_v50  ;;  %v4910_v31 = vld [vmem:[#allocation2 + $0x610] sm:$0xff]  }
 0x238   :  { %4534 = vmatpush3.bf16.msra.mxu0 %v4862_v49  ;;  %v4911_v50 = vld [vmem:[#allocation2 + $0x690] sm:$0xff]   ;;  %v4912_v49 = vld [vmem:[#allocation2 + $0x648] sm:$0xff]  }
 0x239   :  { %4556 = vmatpush3.bf16.msra.mxu1 %v4863_v36  ;;  %4535 = vmatprep.subr.bf16.mxu0 %v4864_v33  ;;  %v4913_v36 = vld [vmem:[#allocation2 + $0x6c8] sm:$0xff]  }
 0x23a   :  { %4557 = vmatprep.subr.bf16.mxu1 %v4865_v9  ;;  %v4914_v33 = vld [vmem:[#allocation2 + $0x608] sm:$0xff]  }
 0x23b   :  { %v4915_v9 = vld [vmem:[#allocation2 + $0x688] sm:$0xff]  }
 0x23c   :  { %4536 = vmatpush3.bf16.msra.mxu0 %v4866_v51  ;;  %v4916_v51 = vld [vmem:[#allocation2 + $0x640] sm:$0xff]  }
 0x23d   :  { %4558 = vmatpush3.bf16.msra.mxu1 %v4867_v29  ;;  %4537 = vmatprep.subr.bf16.mxu0 %v4868_v54  ;;  %v4917_v29 = vld [vmem:[#allocation2 + $0x6c0] sm:$0xff]  }
 0x23e   :  { %4559 = vmatprep.subr.bf16.mxu1 %v4869_v62  ;;  %v4918_v54 = vld [vmem:[#allocation2 + $0x600] sm:$0xff]  }
 0x23f   :  { %v4919_v62 = vld [vmem:[#allocation2 + $0x680] sm:$0xff]  }
 0x240   :  { %4538 = vmatpush3.bf16.msra.mxu0 %v4870_v38  ;;  %v2942_v38 = vpack.c.bf16 %v6417_v39, %v6417_v39  ;;  %v4924_v39 = vld [vmem:[#allocation2 + $0x770] sm:$0xff]  }
 0x241   :  { %4560 = vmatpush3.bf16.msra.mxu1 %v4871_v55  ;;  %4539 = vmatprep.subr.bf16.mxu0 %v4872_v21  ;;  %v2944_v55 = vpack.c.bf16 %v6419_v52, %v6419_v52  ;;  %v4920_v21 = vld [vmem:[#allocation2 + $0x778] sm:$0xff]   ;;  %v4926_v52 = vld [vmem:[#allocation2 + $0x730] sm:$0xff]  }
 0x242   :  { %4561 = vmatprep.subr.bf16.mxu1 %v4873_v13  ;;  %v4921_v13 = vld [vmem:[#allocation2 + $0x7f8] sm:$0xff]  }
 0x244   :  { %4540 = vmatpush3.bf16.msra.mxu0 %v4874_v46  ;;  %v3283_v46 = vpack.c.bf16 %v6433_v37, %v6433_v37  ;;  %v4928_v37 = vld [vmem:[#allocation2 + $0x768] sm:$0xff]  }
 0x245   :  { %4562 = vmatpush3.bf16.msra.mxu1 %v4875_v15  ;;  %4541 = vmatprep.subr.bf16.mxu0 %v4876_v1  ;;  %v4922_v15 = vld [vmem:[#allocation2 + $0x738] sm:$0xff]   ;;  %v3285_v1 = vpack.c.bf16 %v6435_v61, %v6435_v61  ;;  %v4930_v61 = vld [vmem:[#allocation2 + $0x728] sm:$0xff]  }
 0x246   :  { %4563 = vmatprep.subr.bf16.mxu1 %v4877_v16  ;;  %v4923_v16 = vld [vmem:[#allocation2 + $0x7b8] sm:$0xff]  }
 0x248   :  { %4542 = vmatpush3.bf16.msra.mxu0 %v4878_v27  ;;  %v4925_v27 = vld [vmem:[#allocation2 + $0x7f0] sm:$0xff]  }
 0x249   :  { %4564 = vmatpush3.bf16.msra.mxu1 %v4879_v63  ;;  %4543 = vmatprep.subr.bf16.mxu0 %v4880_v45  ;;  %v4927_v63 = vld [vmem:[#allocation2 + $0x7b0] sm:$0xff]   ;;  %v4929_v45 = vld [vmem:[#allocation2 + $0x7e8] sm:$0xff]  }
 0x24a   :  { %4565 = vmatprep.subr.bf16.mxu1 %v4881_v0  ;;  %v4931_v0 = vld [vmem:[#allocation2 + $0x7a8] sm:$0xff]  }
 0x24c   :  { %4544 = vmatpush3.bf16.msra.mxu0 %v4882_v41  ;;  %v4932_v41 = vld [vmem:[#allocation2 + $0x760] sm:$0xff]  }
 0x24d   :  { %4566 = vmatpush3.bf16.msra.mxu1 %v4883_v60  ;;  %4545 = vmatprep.subr.bf16.mxu0 %v4884_v47  ;;  %v4933_v60 = vld [vmem:[#allocation2 + $0x7e0] sm:$0xff]  }
 0x24e   :  { %4567 = vmatprep.subr.bf16.mxu1 %v4885_v19  ;;  %v4934_v47 = vld [vmem:[#allocation2 + $0x720] sm:$0xff]  }
 0x24f   :  { %v4935_v19 = vld [vmem:[#allocation2 + $0x7a0] sm:$0xff]  }
 0x250   :  { %4546 = vmatpush3.bf16.msra.mxu0 %v4886_v48  ;;  %v4936_v48 = vld [vmem:[#allocation2 + $0x758] sm:$0xff]  }
 0x251   :  { %4568 = vmatpush3.bf16.msra.mxu1 %v4887_v20  ;;  %4575 = vmatprep.subr.bf16.mxu0 %v4888_v42  ;;  %v4937_v20 = vld [vmem:[#allocation2 + $0x7d8] sm:$0xff]   ;;  %v4940_v42 = vld [vmem:[#allocation2 + $0x750] sm:$0xff]  }
 0x252   :  { %4597 = vmatprep.subr.bf16.mxu1 %v4889_v17  ;;  %v4941_v17 = vld [vmem:[#allocation2 + $0x7d0] sm:$0xff]  }
 0x253   :  { %2895 = vmatmul.mubr.bf16.vlgmr.msra.gmra.mxu0 %v2602_v59  ;;  %v4938_v59 = vld [vmem:[#allocation2 + $0x718] sm:$0xff]  }
 0x254   :  { %2935 = vmatmul.mubr.bf16.vlgmr.msra.gmra.mxu1 %v2604_v28  ;;  %4576 = vmatpush3.bf16.msra.mxu0 %v4890_v30  ;;  %v4939_v28 = vld [vmem:[#allocation2 + $0x798] sm:$0xff]   ;;  %v4943_v30 = vld [vmem:[#allocation2 + $0x790] sm:$0xff]  }
 0x255   :  { %4598 = vmatpush3.bf16.msra.mxu1 %v4891_v57  ;;  %3234 = vmatprep.mubr.bf16.mxu0 %v2943_v53  ;;  %v4942_v53 = vld [vmem:[#allocation2 + $0x710] sm:$0xff]   ;;  %v4945_v57 = vld [vmem:[#allocation2 + $0x7c8] sm:$0xff]  }
 0x256   :  { %4577 = vmatprep.subr.bf16.mxu0 %v4892_v56  ;;  %3274 = vmatprep.mubr.bf16.mxu1 %v2945_v5  ;;  %v4944_v5 = vld [vmem:[#allocation2 + $0x748] sm:$0xff]  }
 0x257   :  { %4599 = vmatprep.subr.bf16.mxu1 %v4893_v40  ;;  %v4946_v56 = vld [vmem:[#allocation2 + $0x708] sm:$0xff]  }
 0x258   :  { %4578 = vmatpush3.bf16.msra.mxu0 %v4894_v4  ;;  %v4947_v40 = vld [vmem:[#allocation2 + $0x788] sm:$0xff]   ;;  %v4948_v4 = vld [vmem:[#allocation2 + $0x740] sm:$0xff]  }
 0x259   :  { %4600 = vmatpush3.bf16.msra.mxu1 %v4895_v35  ;;  %4579 = vmatprep.subr.bf16.mxu0 %v4896_v12  ;;  %v4949_v35 = vld [vmem:[#allocation2 + $0x7c0] sm:$0xff]  }
 0x25a   :  { %4601 = vmatprep.subr.bf16.mxu1 %v4897_v18  ;;  %v4950_v12 = vld [vmem:[#allocation2 + $0x700] sm:$0xff]  }
 0x25b   :  { %v4951_v18 = vld [vmem:[#allocation2 + $0x780] sm:$0xff]  }
 0x25c   :  { %4580 = vmatpush3.bf16.msra.mxu0 %v4898_v44  ;;  %v3282_v44 = vpack.c.bf16 %v6429_v2, %v6429_v2 }
 0x25d   :  { %4602 = vmatpush3.bf16.msra.mxu1 %v4899_v6  ;;  %4581 = vmatprep.subr.bf16.mxu0 %v4900_v3  ;;  %v3284_v6 = vpack.c.bf16 %v6431_v14, %v6431_v14  ;;  %v4952_v3 = vld [vmem:[#allocation2 + $0x78] sm:$0xff]  }
 0x25e   :  { %4603 = vmatprep.subr.bf16.mxu1 %v4901_v22  ;;  %v4953_v22 = vld [vmem:[#allocation2 + $0xf8] sm:$0xff]  }
 0x260   :  { %4582 = vmatpush3.bf16.msra.mxu0 %v4902_v34  ;;  %v1175_v34 = vpack.c.bf16 %v6289_v10, %v6289_v10  ;;  %v4958_v10 = vld [vmem:[#allocation2 + $0x30] sm:$0xff]  }
 0x261   :  { %4604 = vmatpush3.bf16.msra.mxu1 %v4903_v7  ;;  %4583 = vmatprep.subr.bf16.mxu0 %v4904_v8  ;;  %v4954_v7 = vld [vmem:[#allocation2 + $0x38] sm:$0xff]   ;;  %v1177_v8 = vpack.c.bf16 %v6291_v58, %v6291_v58  ;;  %v4959_v58 = vld [vmem:[#allocation2 + $0xb0] sm:$0xff]  }
 0x262   :  { %4605 = vmatprep.subr.bf16.mxu1 %v4905_v25 }
 0x264   :  { %4584 = vmatpush3.bf16.msra.mxu0 %v4906_v26  ;;  %v4955_v26 = vld [vmem:[#allocation2 + $0xb8] sm:$0xff]  }
 0x265   :  { %4606 = vmatpush3.bf16.msra.mxu1 %v4907_v32  ;;  %4585 = vmatprep.subr.bf16.mxu0 %v4908_v43  ;;  %v4956_v32 = vld [vmem:[#allocation2 + $0x70] sm:$0xff]  }
 0x266   :  { %4607 = vmatprep.subr.bf16.mxu1 %v4909_v11  ;;  %v4957_v43 = vld [vmem:[#allocation2 + $0xf0] sm:$0xff]  }
 0x268   :  { %4586 = vmatpush3.bf16.msra.mxu0 %v4910_v31 }
 0x269   :  { %4608 = vmatpush3.bf16.msra.mxu1 %v4911_v50  ;;  %4587 = vmatprep.subr.bf16.mxu0 %v4912_v49 }
 0x26a   :  { %4609 = vmatprep.subr.bf16.mxu1 %v4913_v36 }
 0x26c   :  { %4588 = vmatpush3.bf16.msra.mxu0 %v4914_v33  ;;  %v4960_v33 = vld [vmem:[#allocation2 + $0x68] sm:$0xff]  }
 0x26d   :  { %4610 = vmatpush3.bf16.msra.mxu1 %v4915_v9  ;;  %4589 = vmatprep.subr.bf16.mxu0 %v4916_v51 }
 0x26e   :  { %4611 = vmatprep.subr.bf16.mxu1 %v4917_v29  ;;  %v4961_v29 = vld [vmem:[#allocation2 + $0xe8] sm:$0xff]  }
 0x270   :  { %4590 = vmatpush3.bf16.msra.mxu0 %v4918_v54 }
 0x271   :  { %4612 = vmatpush3.bf16.msra.mxu1 %v4919_v62  ;;  %4619 = vmatprep.subr.bf16.mxu0 %v4920_v21  ;;  %v4962_v62 = vld [vmem:[#allocation2 + $0x28] sm:$0xff]   ;;  %v4965_v21 = vld [vmem:[#allocation2 + $0xe0] sm:$0xff]  }
 0x272   :  { %4641 = vmatprep.subr.bf16.mxu1 %v4921_v13  ;;  %v4966_v13 = vld [vmem:[#allocation2 + $0x20] sm:$0xff]  }
 0x273   :  { %3235 = vmatmul.mubr.bf16.vlgmr.msra.gmra.mxu0 %v2942_v38  ;;  %v4963_v38 = vld [vmem:[#allocation2 + $0xa8] sm:$0xff]  }
 0x274   :  { %3275 = vmatmul.mubr.bf16.vlgmr.msra.gmra.mxu1 %v2944_v55  ;;  %4620 = vmatpush3.bf16.msra.mxu0 %v4922_v15  ;;  %v4964_v55 = vld [vmem:[#allocation2 + $0x60] sm:$0xff]   ;;  %v4968_v15 = vld [vmem:[#allocation2 + $0x58] sm:$0xff]  }
 0x275   :  { %4642 = vmatpush3.bf16.msra.mxu1 %v4923_v16  ;;  %3574 = vmatprep.mubr.bf16.mxu0 %v3283_v46  ;;  %v4967_v46 = vld [vmem:[#allocation2 + $0xa0] sm:$0xff]   ;;  %v4970_v16 = vld [vmem:[#allocation2 + $0x18] sm:$0xff]  }
 0x276   :  { %4621 = vmatprep.subr.bf16.mxu0 %v4924_v39  ;;  %3614 = vmatprep.mubr.bf16.mxu1 %v3285_v1  ;;  %v4969_v1 = vld [vmem:[#allocation2 + $0xd8] sm:$0xff]  }
 0x277   :  { %4643 = vmatprep.subr.bf16.mxu1 %v4925_v27  ;;  %v4971_v39 = vld [vmem:[#allocation2 + $0x98] sm:$0xff]   ;;  %v4972_v27 = vld [vmem:[#allocation2 + $0x50] sm:$0xff]  }
 0x278   :  { %4622 = vmatpush3.bf16.msra.mxu0 %v4926_v52  ;;  %v4973_v52 = vld [vmem:[#allocation2 + $0xd0] sm:$0xff]  }
 0x279   :  { %4644 = vmatpush3.bf16.msra.mxu1 %v4927_v63  ;;  %4623 = vmatprep.subr.bf16.mxu0 %v4928_v37  ;;  %v4974_v63 = vld [vmem:[#allocation2 + $0x10] sm:$0xff]  }
 0x27a   :  { %4645 = vmatprep.subr.bf16.mxu1 %v4929_v45  ;;  %v4975_v37 = vld [vmem:[#allocation2 + $0x90] sm:$0xff]   ;;  %v4976_v45 = vld [vmem:[#allocation2 + $0x48] sm:$0xff]  }
 0x27c   :  { %4624 = vmatpush3.bf16.msra.mxu0 %v4930_v61  ;;  %v4977_v61 = vld [vmem:[#allocation2 + $0xc8] sm:$0xff]  }
 0x27d   :  { %4646 = vmatpush3.bf16.msra.mxu1 %v4931_v0  ;;  %4625 = vmatprep.subr.bf16.mxu0 %v4932_v41  ;;  %v4978_v0 = vld [vmem:[#allocation2 + $0x8] sm:$0xff]  }
 0x27e   :  { %4647 = vmatprep.subr.bf16.mxu1 %v4933_v60  ;;  %v4979_v41 = vld [vmem:[#allocation2 + $0x88] sm:$0xff]   ;;  %v4980_v60 = vld [vmem:[#allocation2 + $0x40] sm:$0xff]  }
 0x280   :  { %4626 = vmatpush3.bf16.msra.mxu0 %v4934_v47  ;;  %v4981_v47 = vld [vmem:[#allocation2 + $0xc0] sm:$0xff]  }
 0x281   :  { %4648 = vmatpush3.bf16.msra.mxu1 %v4935_v19  ;;  %4627 = vmatprep.subr.bf16.mxu0 %v4936_v48  ;;  %v4982_v19 = vld [vmem:[#allocation2] sm:$0xff]  }
 0x282   :  { %4649 = vmatprep.subr.bf16.mxu1 %v4937_v20  ;;  %v4983_v48 = vld [vmem:[#allocation2 + $0x80] sm:$0xff]   ;;  %v1174_v20 = vpack.c.bf16 %v6281_v23, %v6281_v23 }
 0x284   :  { %4628 = vmatpush3.bf16.msra.mxu0 %v4938_v59  ;;  %v1176_v59 = vpack.c.bf16 %v6283_v24, %v6283_v24 }
 0x285   :  { %4650 = vmatpush3.bf16.msra.mxu1 %v4939_v28  ;;  %4629 = vmatprep.subr.bf16.mxu0 %v4940_v42 }
 0x286   :  { %4651 = vmatprep.subr.bf16.mxu1 %v4941_v17 }
 0x288   :  { %4630 = vmatpush3.bf16.msra.mxu0 %v4942_v53 }
 0x289   :  { %4652 = vmatpush3.bf16.msra.mxu1 %v4943_v30  ;;  %4631 = vmatprep.subr.bf16.mxu0 %v4944_v5 }
 0x28a   :  { %4653 = vmatprep.subr.bf16.mxu1 %v4945_v57 }
 0x28c   :  { %4632 = vmatpush3.bf16.msra.mxu0 %v4946_v56 }
 0x28d   :  { %4654 = vmatpush3.bf16.msra.mxu1 %v4947_v40  ;;  %4633 = vmatprep.subr.bf16.mxu0 %v4948_v4 }
 0x28e   :  { %4655 = vmatprep.subr.bf16.mxu1 %v4949_v35 }
 0x290   :  { %4634 = vmatpush3.bf16.msra.mxu0 %v4950_v12 }
 0x291   :  { %4656 = vmatpush3.bf16.msra.mxu1 %v4951_v18  ;;  %4663 = vmatprep.subr.bf16.mxu0 %v4952_v3 }
 0x292   :  { %4685 = vmatprep.subr.bf16.mxu1 %v4953_v22 }
 0x293   :  { %v4371_v25 = vpop.f32.mrf.mxu0  ;;  %3575 = vmatmul.mubr.bf16.vlgmr.msra.gmra.mxu0 %v3282_v44 }
 0x294   :  { %v4393_v2 = vpop.f32.mrf.mxu1  ;;  %3615 = vmatmul.mubr.bf16.vlgmr.msra.gmra.mxu1 %v3284_v6  ;;  %4664 = vmatpush3.bf16.msra.mxu0 %v4954_v7 }
 0x295   :  { %4686 = vmatpush3.bf16.msra.mxu1 %v4955_v26  ;;  %v4372_v14 = vpop.f32.mrf.mxu0  ;;  %3846 = vmatprep.mubr.bf16.mxu0 %v1175_v34 }
 0x296   :  { %v4373_v11 = vadd.f32 %v4372_v14, %v4371_v25  ;;  %v4394_v31 = vpop.f32.mrf.mxu1  ;;  %4665 = vmatprep.subr.bf16.mxu0 %v4956_v32  ;;  %3886 = vmatprep.mubr.bf16.mxu1 %v1177_v8 }
 0x297   :  { %v4395_v50 = vadd.f32 %v4394_v31, %v4393_v2  ;;  %v4374_v49 = vpop.f32.mrf.mxu0  ;;  %4687 = vmatprep.subr.bf16.mxu1 %v4957_v43 }
 0x298   :  { %v4396_v36 = vpop.f32.mrf.mxu1  ;;  %4666 = vmatpush3.bf16.msra.mxu0 %v4958_v10 }
 0x299   :  { %v6497_v9 = vadd.f32 %v4395_v50, %v4373_v11  ;;  %4688 = vmatpush3.bf16.msra.mxu1 %v4959_v58  ;;  %v4375_v51 = vpop.f32.mrf.mxu0  ;;  %4667 = vmatprep.subr.bf16.mxu0 %v4960_v33 }
 0x29a   :  { %v4397_v54 = vpop.f32.mrf.mxu1  ;;  %4689 = vmatprep.subr.bf16.mxu1 %v4961_v29 }
 0x29c   :  { %4668 = vmatpush3.bf16.msra.mxu0 %v4962_v62 }
 0x29d   :  { %4690 = vmatpush3.bf16.msra.mxu1 %v4963_v38  ;;  %4669 = vmatprep.subr.bf16.mxu0 %v4964_v55 }
 0x29e   :  { %4691 = vmatprep.subr.bf16.mxu1 %v4965_v21 }
 0x2a0   :  { %4670 = vmatpush3.bf16.msra.mxu0 %v4966_v13 }
 0x2a1   :  { %4692 = vmatpush3.bf16.msra.mxu1 %v4967_v46  ;;  %4671 = vmatprep.subr.bf16.mxu0 %v4968_v15 }
 0x2a2   :  { %4693 = vmatprep.subr.bf16.mxu1 %v4969_v1 }
 0x2a4   :  { %4672 = vmatpush3.bf16.msra.mxu0 %v4970_v16 }
 0x2a5   :  { %4694 = vmatpush3.bf16.msra.mxu1 %v4971_v39  ;;  %4673 = vmatprep.subr.bf16.mxu0 %v4972_v27 }
 0x2a6   :  { %4695 = vmatprep.subr.bf16.mxu1 %v4973_v52 }
 0x2a8   :  { %4674 = vmatpush3.bf16.msra.mxu0 %v4974_v63 }
 0x2a9   :  { %4696 = vmatpush3.bf16.msra.mxu1 %v4975_v37  ;;  %4675 = vmatprep.subr.bf16.mxu0 %v4976_v45 }
 0x2aa   :  { %4697 = vmatprep.subr.bf16.mxu1 %v4977_v61 }
 0x2ac   :  { %4676 = vmatpush3.bf16.msra.mxu0 %v4978_v0 }
 0x2ad   :  { %4698 = vmatpush3.bf16.msra.mxu1 %v4979_v41  ;;  %4677 = vmatprep.subr.bf16.mxu0 %v4980_v60 }
 0x2ae   :  { %4699 = vmatprep.subr.bf16.mxu1 %v4981_v47 }
 0x2b0   :  { %4678 = vmatpush3.bf16.msra.mxu0 %v4982_v19 }
 0x2b1   :  { %4700 = vmatpush3.bf16.msra.mxu1 %v4983_v48 }
 0x2b3   :  { %v4415_v28 = vpop.f32.mrf.mxu0  ;;  %3847 = vmatmul.mubr.bf16.vlgmr.msra.gmra.mxu0 %v1174_v20 }
 0x2b4   :  { %v4437_v42 = vpop.f32.mrf.mxu1  ;;  %3887 = vmatmul.mubr.bf16.vlgmr.msra.gmra.mxu1 %v1176_v59 }
 0x2b5   :  { %v4416_v17 = vpop.f32.mrf.mxu0 }
 0x2b6   :  { %v4417_v53 = vadd.f32 %v4416_v17, %v4415_v28  ;;  %v4438_v30 = vpop.f32.mrf.mxu1 }
 0x2b7   :  { %v4439_v5 = vadd.f32 %v4438_v30, %v4437_v42  ;;  %v4418_v57 = vpop.f32.mrf.mxu0 }
 0x2b8   :  { %v4440_v56 = vpop.f32.mrf.mxu1 }
 0x2b9   :  { %v6503_v40 = vadd.f32 %v4439_v5, %v4417_v53  ;;  %v4419_v4 = vpop.f32.mrf.mxu0 }
 0x2ba   :  { %v4441_v35 = vpop.f32.mrf.mxu1 }
 0x2d3   :  { %v4459_v23 = vpop.f32.mrf.mxu0 }
 0x2d4   :  { %v4481_v12 = vpop.f32.mrf.mxu1 }
 0x2d5   :  { %v4460_v18 = vpop.f32.mrf.mxu0 }
 0x2d6   :  { %v4461_v44 = vadd.f32 %v4460_v18, %v4459_v23  ;;  %v4482_v24 = vpop.f32.mrf.mxu1 }
 0x2d7   :  { %v4483_v6 = vadd.f32 %v4482_v24, %v4481_v12  ;;  %v4462_v3 = vpop.f32.mrf.mxu0 }
 0x2d8   :  { %v4484_v22 = vpop.f32.mrf.mxu1 }
 0x2d9   :  { %v2257_v34 = vadd.f32 %v4483_v6, %v4461_v44  ;;  %v4463_v7 = vpop.f32.mrf.mxu0 }
 0x2da   :  { %v4485_v8 = vpop.f32.mrf.mxu1 }
 0x2f3   :  { %v4503_v25 = vpop.f32.mrf.mxu0 }
 0x2f4   :  { %v4525_v26 = vpop.f32.mrf.mxu1 }
 0x2f5   :  { %v4504_v2 = vpop.f32.mrf.mxu0 }
 0x2f6   :  { %v4505_v32 = vadd.f32 %v4504_v2, %v4503_v25  ;;  %v4526_v14 = vpop.f32.mrf.mxu1  ;;  %v3900_v25 = vld [vmem:[%s6540_s2 + $0x1] ss:$0 sm:$0xff] }
 0x2f7   :  { %v4527_v43 = vadd.f32 %v4526_v14, %v4525_v26  ;;  %v4506_v11 = vpop.f32.mrf.mxu0 }
 0x2f8   :  { %v4528_v31 = vpop.f32.mrf.mxu1 }
 0x2f9   :  { %v2597_v10 = vadd.f32 %v4527_v43, %v4505_v32  ;;  %v4507_v50 = vpop.f32.mrf.mxu0  ;;  %v3923_v31 = vld [vmem:[%s6540_s2 + $0x80] sm:$0xff] }
 0x2fa   :  { %v4529_v49 = vpop.f32.mrf.mxu1  ;;  %v3922_v50 = vld [vmem:[%s6540_s2 + $0x60] sm:$0xff] }
 0x2fb   :  { %v3921_v49 = vld [vmem:[%s6540_s2 + $0x40] sm:$0xff] }
 0x313   :  { %v4547_v58 = vpop.f32.mrf.mxu0 }
 0x314   :  { %v4569_v36 = vpop.f32.mrf.mxu1 }
 0x315   :  { %v4548_v33 = vpop.f32.mrf.mxu0 }
 0x316   :  { %v4549_v51 = vadd.f32 %v4548_v33, %v4547_v58  ;;  %v4570_v29 = vpop.f32.mrf.mxu1  ;;  %v3920_v58 = vld [vmem:[%s6540_s2 + $0x20] sm:$0xff] }
 0x317   :  { %v4571_v54 = vadd.f32 %v4570_v29, %v4569_v36  ;;  %v4550_v62 = vpop.f32.mrf.mxu0 }
 0x318   :  { %v4572_v38 = vpop.f32.mrf.mxu1 }
 0x319   :  { %v2937_v55 = vadd.f32 %v4571_v54, %v4549_v51  ;;  %v4551_v21 = vpop.f32.mrf.mxu0  ;;  %v3924_v54 = vld [vmem:[%s6540_s2 + $0x2] ss:$0 sm:$0xff] }
 0x31a   :  { %v4573_v13 = vpop.f32.mrf.mxu1 }
 0x31b   :  { %v4018_v13 = vld [vmem:[%s6540_s2 + $0x3] ss:$0 sm:$0xff] }
 0x333   :  { %v4591_v46 = vpop.f32.mrf.mxu0 }
 0x334   :  { %v4613_v15 = vpop.f32.mrf.mxu1 }
 0x335   :  { %v4592_v1 = vpop.f32.mrf.mxu0 }
 0x336   :  { %v4593_v16 = vadd.f32 %v4592_v1, %v4591_v46  ;;  %v4614_v39 = vpop.f32.mrf.mxu1 }
 0x337   :  { %v4615_v27 = vadd.f32 %v4614_v39, %v4613_v15  ;;  %v4594_v52 = vpop.f32.mrf.mxu0 }
 0x338   :  { %v4616_v63 = vpop.f32.mrf.mxu1 }
 0x339   :  { %v3277_v37 = vadd.f32 %v4615_v27, %v4593_v16  ;;  %v4595_v45 = vpop.f32.mrf.mxu0 }
 0x33a   :  { %v4617_v61 = vpop.f32.mrf.mxu1 }
 0x353   :  { %v4635_v0 = vpop.f32.mrf.mxu0 }
 0x354   :  { %v4657_v41 = vpop.f32.mrf.mxu1 }
 0x355   :  { %v4636_v60 = vpop.f32.mrf.mxu0 }
 0x356   :  { %v4658_v47 = vpop.f32.mrf.mxu1  ;;  %v4637_v24 = vadd.f32 %v4636_v60, %v4635_v0  ;;  %v4031_v60 = vld [vmem:[%s6540_s2 + $0x4] ss:$0 sm:$0xff] }
 0x357   :  { %v4638_v19 = vpop.f32.mrf.mxu0  ;;  %v4659_v6 = vadd.f32 %v4658_v47, %v4657_v41 }
 0x358   :  { %v4660_v48 = vpop.f32.mrf.mxu1 }
 0x359   :  { %v4639_v20 = vpop.f32.mrf.mxu0  ;;  %v3617_v7 = vadd.f32 %v4659_v6, %v4637_v24 }
 0x35a   :  { %v4661_v59 = vpop.f32.mrf.mxu1 }
 0x373   :  { %v4679_v28 = vpop.f32.mrf.mxu0 }
 0x374   :  { %v4701_v42 = vpop.f32.mrf.mxu1 }
 0x375   :  { %v4680_v17 = vpop.f32.mrf.mxu0 }
 0x376   :  { %v4681_v53 = vadd.f32 %v4680_v17, %v4679_v28  ;;  %v4702_v30 = vpop.f32.mrf.mxu1 }
 0x377   :  { %v4682_v5 = vpop.f32.mrf.mxu0  ;;  %v4703_v56 = vadd.f32 %v4702_v30, %v4701_v42 }
 0x378   :  { %v3849_v57 = vadd.f32 %v4681_v53, %v6497_v9  ;;  %v4704_v4 = vpop.f32.mrf.mxu1 }
 0x379   :  { %v4683_v35 = vpop.f32.mrf.mxu0 }
 0x37a   :  { %v3889_v23 = vadd.f32 %v4703_v56, %v3849_v57  ;;  %v4705_v12 = vpop.f32.mrf.mxu1 }
 0x37c   :  { %v3894_v18 = vadd.f32 %v3889_v23, %v6503_v40 }
 0x37e   :  { %v3895_v44 = vadd.f32 %v3894_v18, %v2257_v34 }
 0x380   :  { %v3896_v3 = vadd.f32 %v3895_v44, %v2597_v10  ;;  %v5007_v10 = vmov 0.0  }
 0x381   :  { %4712 = vmatprep.subr.mxu0 %v5007_v10  ;;  %4720 = vmatprep.mubr.msk.f32.mxu0 %vm5008_vm1, %v5007_v10 }
 0x382   :  { %v3897_v22 = vadd.f32 %v3896_v3, %v2937_v55  ;;  %4713 = vmatpush3.msra.mxu0 %v3923_v31 }
 0x383   :  { %4714 = vmatprep.subr.mxu0 %v5007_v10 }
 0x384   :  { %v3898_v8 = vadd.f32 %v3897_v22, %v3277_v37  ;;  %4715 = vmatpush3.msra.mxu0 %v3922_v50 }
 0x385   :  { %4716 = vmatprep.subr.mxu0 %v5007_v10 }
 0x386   :  { %v3899_v26 = vadd.f32 %v3898_v8, %v3617_v7  ;;  %4717 = vmatpush3.msra.mxu0 %v3921_v49 }
 0x387   :  { %4718 = vmatprep.subr.mxu0 %v5007_v10 }
 0x388   :  { %v3901_v9 = vadd.f32 %v3900_v25, %v3899_v26  ;;  %4719 = vmatpush3.msra.mxu0 %v3920_v58 }
 0x38a   :  { %4984 = vtanh.f32 %v3901_v9  ;;  %v4350_v32 = vmul.f32 -1.442695, %v3901_v9 }
 0x38c   :  { %4986 = vpow2.f32 %v4350_v32 }
 0x397   :  { %v4985_v2 = vpop.eup %4984 }
 0x398   :  { %3910 = vrot.lane.b32.xlu0 %v4985_v2, %s5006_s3 }
 0x399   :  { %v4987_v40 = vpop.eup %4986 }
 0x39a   :  { %v3905_v34 = vadd.f32 1.0, %v4987_v40 }
 0x39c   :  { %4988 = vrcp.f32 %v3905_v34 }
 0x3a9   :  { %v4989_v14 = vpop.eup %4988 }
 0x40a   :  { %v3911_v43 = vpop.permute.xlu0 %3910 }
 0x40b   :  { %v3913_v11 = vmul.f32 %v4989_v14, %v3911_v43 }
 0x40d   :  { %4990 = vtanh.f32 %v3913_v11 }
 0x41a   :  { %v4991_v36 = vpop.eup %4990 }
 0x41b   :  { %3916 = vrot.lane.b32.xlu0 %v4991_v36, %s5009_s23 }
 0x48d   :  { %v3917_v33 = vpop.permute.xlu0 %3916 }
 0x48e   :  { %v3919_v51 = vmul.f32 %v4989_v14, %v3917_v33 }
 0x490   :  { %3926 = vrot.lane.b32.xlu1 %v3919_v51, %s5010_s24 }
 0x502   :  { %v3927_v29 = vpop.permute.xlu1 %3926 }
 0x503   :  { %4721 = vmatmul.mubr.msk.f32.vlgmr.msra.gmra.mxu0 %vm703_vm0, %v3927_v29 }
 0x5c3   :  { %v3996_v62 = vpop.f32.mrf.mxu0 }
 0x5c4   :  { %v3997_v38 = vadd.f32 %v3996_v62, %v3924_v54 }
 0x5c5   :  { %v4722_v55 = vpop.f32.mrf.mxu0 }
 0x5c6   :  { %4992 = vtanh.f32 %v3997_v38  ;;  %v4352_v46 = vmul.f32 -1.442695, %v3997_v38 }
 0x5c8   :  { %4994 = vpow2.f32 %v4352_v46 }
 0x5d3   :  { %v4993_v21 = vpop.eup %4992 }
 0x5d4   :  { %4008 = vrot.lane.b32.xlu1 %v4993_v21, %s5006_s3 }
 0x5d5   :  { %v4995_v15 = vpop.eup %4994 }
 0x5d6   :  { %v4003_v1 = vadd.f32 1.0, %v4995_v15 }
 0x5d8   :  { %4020 = vrot.lane.b32.xlu1 %v4018_v13, %s5009_s23  ;;  %4996 = vrcp.f32 %v4003_v1 }
 0x5e5   :  { %v4997_v16 = vpop.eup %4996 }
 0x646   :  { %v4009_v39 = vpop.permute.xlu1 %4008 }
 0x647   :  { %v4011_v27 = vmul.f32 %v4997_v16, %v4009_v39 }
 0x649   :  { %4998 = vtanh.f32 %v4011_v27 }
 0x64a   :  { %v4021_v37 = vpop.permute.xlu1 %4020 }
 0x656   :  { %v4999_v52 = vpop.eup %4998 }
 0x657   :  { %4014 = vrot.lane.b32.xlu0 %v4999_v52, %s5009_s23 }
 0x6c9   :  { %v4015_v63 = vpop.permute.xlu0 %4014 }
 0x6ca   :  { %v4017_v45 = vmul.f32 %v4997_v16, %v4015_v63 }
 0x6cc   :  { %v4023_v61 = vmul.f32 %v4021_v37, %v4017_v45 }
 0x6ce   :  { %4025 = vrot.lane.b32.xlu0 %v4023_v61, %s5010_s24 }
 0x740   :  { %v4026_v0 = vpop.permute.xlu0 %4025 }
 0x741   :  { %v4028_v41 = vsel %vm703_vm0, %v4026_v0, 0.0 }
 0x742   :  { %4029 = vadd.xlane.f32.xlu1 %v4028_v41 }
 0x7cb   :  { %v4030_v47 = vpop.xlane.xlu1 %4029 }
 0x7cc   :  { %v4032_v19 = vadd.f32 %v4031_v60, %v4030_v47 }
 0x7ce   :  { %v4353_v48 = vmul.f32 -1.442695, %v4032_v19 }
 0x7d0   :  { %5000 = vpow2.f32 %v4353_v48 }
 0x7dd   :  { %v5001_v20 = vpop.eup %5000 }
 0x7de   :  { %v4036_v59 = vadd.f32 1.0, %v5001_v20 }
 0x7e0   :  { %5002 = vrcp.f32 %v4036_v59 }
 0x7ed   :  { %v5003_v28 = vpop.eup %5002 }
 0x7ee   :  { %4040 = vst.msk [vmem:[#allocation4] sm:$0xff] %vm4039_vm2, %v5003_v28 }
 0x7f5   :  { %v4041_v42 = vld [vmem:[#allocation4] sm:$0x3] }
 0x7f6   :  { %4043 = vst.msk [vmem:[%s6542_s4] sm:$0x3] %vm4042_vm3, %v4041_v42 }
 0x7f7   :  { %4048 = vsyncmov [#allocation3] }
 0x7fa   :  { %s4049_s7 = vpop.sfrf %4048 }
 0x7fb   :  { %p4354_p0 = scmp.ne.s32.totalorder %s4049_s7, 0 }
 0x7fd   :  { %4053 = shalt.err (%p4354_p0)  }

</bundles_post_ra>
